<compile_context>
chip_gen: v5e
topology: v5e:2x2
jax: 0.10.0
libtpu: 0.0.40
codegen_flags: <defaults>
</compile_context>

<pallas_src>
import jax
import jax.numpy as jnp
from jax.experimental import pallas as pl
from jax.experimental.pallas import tpu as pltpu


# ----------------------------------------------------------------------------
# Pallas kernels (everything fits easily in VMEM at these sizes -> no grid)
# ----------------------------------------------------------------------------

def _block1_kernel(*refs):
    """conv1 -> conv2 -> MaxPool2x2 -> ReLU -> BN16, fused.

    Inputs : 9 shifted conv1-patch matrices q[s*3+t] of shape [N*49, 4]
             (conv1 2x2 patches taken at conv1-output positions
              (2*po+s, 2*qo+t), po,qo in [0,7), s,t in [0,3)),
             w1 [4,4], b1 [1,4], w2 [16,16] (rows in (kh,kw,cin) order),
             b2 [1,16], bn scale [1,16], bn shift [1,16].
    Output : [N*49, 16] = BN(ReLU(maxpool(conv2(conv1(x))))) rows in (n,po,qo).
    """
    q = refs[:9]
    w1_ref, b1_ref, w2_ref, b2_ref, sc_ref, sh_ref, o_ref = refs[9:]
    w1 = w1_ref[...]
    b1 = b1_ref[...]
    w2 = w2_ref[...]
    # conv1 output at the 9 distinct shifted position grids.
    h = [jnp.dot(qr[...], w1, preferred_element_type=jnp.float32) + b1 for qr in q]
    # conv2 output (minus bias) at each of the 4 pool-window corners (di, dj).
    corners = []
    for di in range(2):
        for dj in range(2):
            acc = None
            for ki in range(2):
                for kj in range(2):
                    w_blk = w2[(ki * 2 + kj) * 4:(ki * 2 + kj) * 4 + 4, :]
                    term = jnp.dot(h[(di + ki) * 3 + (dj + kj)], w_blk,
                                   preferred_element_type=jnp.float32)
                    acc = term if acc is None else acc + term
            corners.append(acc)
    # max-pool (bias is constant across corners, so it commutes with max).
    m = jnp.maximum(jnp.maximum(corners[0], corners[1]),
                    jnp.maximum(corners[2], corners[3])) + b2_ref[...]
    m = jnp.maximum(m, 0.0)                                   # ReLU
    o_ref[...] = m * sc_ref[...] + sh_ref[...]                # BN (folded)


def _block2_kernel(p00_ref, p01_ref, p10_ref, p11_ref,
                   w_ref, b_ref, sc_ref, sh_ref, o_ref):
    """conv3 -> MaxPool2x2 -> ReLU -> BN64, fused.

    Inputs : 4 corner patch matrices [N*4, 144] (3x3x16 patches at conv3-output
             positions (2*po+di, 2*qo+dj)), w3 [144,64], b3 [1,64],
             bn scale [1,64], bn shift [1,64].
    Output : [N*4, 64], rows in (n, po, qo) order.
    """
    w = w_ref[...]
    y00 = jnp.dot(p00_ref[...], w, preferred_element_type=jnp.float32)
    y01 = jnp.dot(p01_ref[...], w, preferred_element_type=jnp.float32)
    y10 = jnp.dot(p10_ref[...], w, preferred_element_type=jnp.float32)
    y11 = jnp.dot(p11_ref[...], w, preferred_element_type=jnp.float32)
    m = jnp.maximum(jnp.maximum(y00, y01), jnp.maximum(y10, y11)) + b_ref[...]
    m = jnp.maximum(m, 0.0)
    o_ref[...] = m * sc_ref[...] + sh_ref[...]


def _softmax_rows(z):
    z = z - jnp.max(z, axis=-1, keepdims=True)
    e = jnp.exp(z)
    return e * pl.reciprocal(jnp.sum(e, axis=-1, keepdims=True), approx=True)


def _heads_kernel(*refs):
    """BaseNet classifier for both views + top classifier, fused.

    f [2B,256] -> fc1/ReLU/BN -> fc2/ReLU/BN -> fc3/softmax -> out0/out1 [B,10]
    -> (split instead of concat) gc1/ReLU/BN -> gc2/ReLU/BN -> gc3/softmax.
    """
    (f_ref,
     fc1w, fc1b, s170, t170,
     fc2w, fc2b, s90, t90,
     fc3w, fc3b,
     gc1w0, gc1w1, gc1b, s25, t25,
     gc2w, gc2b, s10, t10,
     gc3w, gc3b,
     xf_ref, out0_ref, out1_ref) = refs

    f = f_ref[...]                                                  # [2B, 256]
    h = jnp.dot(f, fc1w[...], preferred_element_type=jnp.float32) + fc1b[...]
    h = jnp.maximum(h, 0.0) * s170[...] + t170[...]
    h = jnp.dot(h, fc2w[...], preferred_element_type=jnp.float32) + fc2b[...]
    h = jnp.maximum(h, 0.0) * s90[...] + t90[...]
    y = _softmax_rows(
        jnp.dot(h, fc3w[...], preferred_element_type=jnp.float32) + fc3b[...])

    nb = out0_ref.shape[0]                  # rows 0..B-1 = view 0, B..2B-1 = view 1
    y0 = y[:nb, :]
    y1 = y[nb:, :]
    out0_ref[...] = y0
    out1_ref[...] = y1

    # cat([y0, y1]) @ gc1_w  ==  y0 @ gc1_w[:10] + y1 @ gc1_w[10:]
    g = (jnp.dot(y0, gc1w0[...], preferred_element_type=jnp.float32)
         + jnp.dot(y1, gc1w1[...], preferred_element_type=jnp.float32)
         + gc1b[...])
    g = jnp.maximum(g, 0.0) * s25[...] + t25[...]
    g = jnp.dot(g, gc2w[...], preferred_element_type=jnp.float32) + gc2b[...]
    g = jnp.maximum(g, 0.0) * s10[...] + t10[...]
    xf_ref[...] = _softmax_rows(
        jnp.dot(g, gc3w[...], preferred_element_type=jnp.float32) + gc3b[...])


_VMEM = pl.BlockSpec(memory_space=pltpu.MemorySpace.VMEM)


def _pallas(kernel, out_shapes, *args):
    """Run a kernel with all operands as whole-array VMEM blocks (no grid)."""
    out = pl.pallas_call(
        kernel,
        out_shape=tuple(jax.ShapeDtypeStruct(s, jnp.float32) for s in out_shapes),
        in_specs=[_VMEM] * len(args),
        out_specs=tuple(_VMEM for _ in out_shapes),
    )(*args)
    return out if len(out_shapes) > 1 else out[0]


# ----------------------------------------------------------------------------
# Layout glue (plain JAX): patch matrices pre-grouped by pool-window corner
# ----------------------------------------------------------------------------

def _block1_patches(x_img):
    """x_img: [N,16,16] -> 9 matrices [N*49, 4] of conv1 2x2 patches taken at
    conv1-output positions (2*po+s, 2*qo+t), po,qo in [0,7), s,t in [0,3)."""
    n = x_img.shape[0]
    qs = []
    for s in range(3):
        for t in range(3):
            cols = [x_img[:, s + a:s + a + 13:2, t + b:t + b + 13:2]
                    for a in range(2) for b in range(2)]
            qs.append(jnp.stack(cols, axis=-1).reshape(n * 49, 4))
    return qs


def _block2_patches(z1):
    """z1: [N,7,7,16] -> 4 matrices [N*4, 144] of conv3 3x3 patches taken at
    conv3-output positions (2*po+di, 2*qo+dj), po,qo in [0,2), di,dj in [0,2).
    (Floor-mode 2x2 pooling of the 5x5 conv3 output uses only rows/cols 0..3.)"""
    n = z1.shape[0]
    ps = []
    for di in range(2):
        for dj in range(2):
            cols = [z1[:, di + ki:di + ki + 3:2, dj + kj:dj + kj + 3:2, :]
                    for ki in range(3) for kj in range(3)]
            ps.append(jnp.concatenate(cols, axis=-1).reshape(n * 4, 144))
    return ps


# ----------------------------------------------------------------------------
# Deterministic parameter construction (synthetic weights, BN folded)
# ----------------------------------------------------------------------------

_BN_EPS = 1e-5


def _bn_fold(key, c):
    kg, kb, km, kv = jax.random.split(key, 4)
    gamma = 1.0 + 0.1 * jax.random.normal(kg, (c,), jnp.float32)
    beta = 0.1 * jax.random.normal(kb, (c,), jnp.float32)
    rmean = 0.1 * jax.random.normal(km, (c,), jnp.float32)
    rvar = 1.0 + 0.1 * jnp.abs(jax.random.normal(kv, (c,), jnp.float32))
    scale = gamma / jnp.sqrt(rvar + _BN_EPS)
    shift = beta - rmean * scale
    return scale, shift


def _dense(key, cin, cout, s=0.1):
    kw, kb = jax.random.split(key)
    w = s * jax.random.normal(kw, (cin, cout), jnp.float32)
    b = s * jax.random.normal(kb, (cout,), jnp.float32)
    return w, b


def make_params(seed=0):
    key = jax.random.PRNGKey(seed)
    ks = jax.random.split(key, 16)
    p = {}
    # BaseNet features (shared across the two siamese branches).
    # Conv weight rows are in (kh, kw, cin) order.
    p["conv1_w"], p["conv1_b"] = _dense(ks[0], 2 * 2 * 1, 4)      # Conv2d(1, 4, 2)
    p["conv2_w"], p["conv2_b"] = _dense(ks[1], 2 * 2 * 4, 16)     # Conv2d(4, 16, 2)
    p["bn16_scale"], p["bn16_shift"] = _bn_fold(ks[2], 16)        # BatchNorm2d(16)
    p["conv3_w"], p["conv3_b"] = _dense(ks[3], 3 * 3 * 16, 64)    # Conv2d(16, 64, 3)
    p["bn64_scale"], p["bn64_shift"] = _bn_fold(ks[4], 64)        # BatchNorm2d(64)
    # BaseNet classifier: 256 -> 170 -> 90 -> 10.
    # fc1_w rows are in NHWC (h, w, c) flatten order (no runtime transpose).
    p["fc1_w"], p["fc1_b"] = _dense(ks[5], 256, 170)
    p["bn170_scale"], p["bn170_shift"] = _bn_fold(ks[6], 170)
    p["fc2_w"], p["fc2_b"] = _dense(ks[7], 170, 90)
    p["bn90_scale"], p["bn90_shift"] = _bn_fold(ks[8], 90)
    p["fc3_w"], p["fc3_b"] = _dense(ks[9], 90, 10)
    # Top classifier: 20 -> 25 -> 10 -> 2
    p["gc1_w"], p["gc1_b"] = _dense(ks[10], 20, 25)
    p["bn25_scale"], p["bn25_shift"] = _bn_fold(ks[11], 25)
    p["gc2_w"], p["gc2_b"] = _dense(ks[12], 25, 10)
    p["bn10_scale"], p["bn10_shift"] = _bn_fold(ks[13], 10)
    p["gc3_w"], p["gc3_b"] = _dense(ks[14], 10, 2)
    return p


# ----------------------------------------------------------------------------
# Forward pass (3 pallas_call launches)
# ----------------------------------------------------------------------------

@jax.jit
def siamese_share_forward(p, x):
    """x: [B, 2, H, W] -> (x_final [B,2], out0 [B,10], out1 [B,10])."""
    bsz = x.shape[0]
    # Batch the two shared-weight siamese views into a single BaseNet pass
    # (rows 0..B-1 = view 0, rows B..2B-1 = view 1).
    xb = jnp.concatenate([x[:, 0], x[:, 1]], axis=0).astype(jnp.float32)  # [2B,16,16]
    n = 2 * bsz

    # K1: conv1 + conv2 + maxpool + relu + bn16 -> [2B*49, 16]
    qs = _block1_patches(xb)
    z1 = _pallas(_block1_kernel, [(n * 49, 16)], *qs,
                 p["conv1_w"], p["conv1_b"].reshape(1, 4),
                 p["conv2_w"], p["conv2_b"].reshape(1, 16),
                 p["bn16_scale"].reshape(1, 16), p["bn16_shift"].reshape(1, 16))
    z1 = z1.reshape(n, 7, 7, 16)

    # K2: conv3 + maxpool + relu + bn64 -> [2B*4, 64]
    ps = _block2_patches(z1)
    z2 = _pallas(_block2_kernel, [(n * 4, 64)], *ps,
                 p["conv3_w"], p["conv3_b"].reshape(1, 64),
                 p["bn64_scale"].reshape(1, 64), p["bn64_shift"].reshape(1, 64))
    feats = z2.reshape(n, 256)       # NHWC (h, w, c) flatten; fc1_w rows match.

    # K3: BaseNet classifier (both views) + top classifier in one kernel.
    x_final, out0, out1 = _pallas(
        _heads_kernel, [(bsz, 2), (bsz, 10), (bsz, 10)],
        feats,
        p["fc1_w"], p["fc1_b"].reshape(1, 170),
        p["bn170_scale"].reshape(1, 170), p["bn170_shift"].reshape(1, 170),
        p["fc2_w"], p["fc2_b"].reshape(1, 90),
        p["bn90_scale"].reshape(1, 90), p["bn90_shift"].reshape(1, 90),
        p["fc3_w"], p["fc3_b"].reshape(1, 10),
        p["gc1_w"][:10], p["gc1_w"][10:], p["gc1_b"].reshape(1, 25),
        p["bn25_scale"].reshape(1, 25), p["bn25_shift"].reshape(1, 25),
        p["gc2_w"], p["gc2_b"].reshape(1, 10),
        p["bn10_scale"].reshape(1, 10), p["bn10_shift"].reshape(1, 10),
        p["gc3_w"], p["gc3_b"].reshape(1, 2))
    return x_final, out0, out1


# ----------------------------------------------------------------------------
# Pure-JAX reference of the same (folded) network, for correctness checking
# ----------------------------------------------------------------------------

def _reference_forward(p, x):
    def conv(h, w, b, k, cin, cout):
        wk = w.reshape(k, k, cin, cout)
        y = jax.lax.conv_general_dilated(
            h, wk, window_strides=(1, 1), padding="VALID",
            dimension_numbers=("NHWC", "HWIO", "NHWC"))
        return y + b

    def pool_relu_bn(h, scale, shift):
        m = jax.lax.reduce_window(h, -jnp.inf, jax.lax.max,
                                  (1, 2, 2, 1), (1, 2, 2, 1), "VALID")
        return jnp.maximum(m, 0.0) * scale + shift

    def basenet(h):                                     # h: [B,16,16,1]
        h = conv(h, p["conv1_w"], p["conv1_b"], 2, 1, 4)
        h = conv(h, p["conv2_w"], p["conv2_b"], 2, 4, 16)
        h = pool_relu_bn(h, p["bn16_scale"], p["bn16_shift"])
        h = conv(h, p["conv3_w"], p["conv3_b"], 3, 16, 64)
        h = pool_relu_bn(h, p["bn64_scale"], p["bn64_shift"])
        f = h.reshape(h.shape[0], 256)                  # NHWC flatten (matches fc1_w)
        f = jnp.maximum(f @ p["fc1_w"] + p["fc1_b"], 0.0) * p["bn170_scale"] + p["bn170_shift"]
        f = jnp.maximum(f @ p["fc2_w"] + p["fc2_b"], 0.0) * p["bn90_scale"] + p["bn90_shift"]
        return jax.nn.softmax(f @ p["fc3_w"] + p["fc3_b"], axis=-1)

    out0 = basenet(x[:, 0][..., None])
    out1 = basenet(x[:, 1][..., None])
    cat = jnp.concatenate([out0, out1], axis=1)
    g = jnp.maximum(cat @ p["gc1_w"] + p["gc1_b"], 0.0) * p["bn25_scale"] + p["bn25_shift"]
    g = jnp.maximum(g @ p["gc2_w"] + p["gc2_b"], 0.0) * p["bn10_scale"] + p["bn10_shift"]
    xf = jax.nn.softmax(g @ p["gc3_w"] + p["gc3_b"], axis=-1)
    return xf, out0, out1


if __name__ == "__main__":
    key = jax.random.PRNGKey(0)
    # Input: batch=2, two siamese views, 16x16 spatial (so 64*2*2 == 256,
    # matching BaseNet's classifier input_size).
    x = jax.random.normal(key, (2, 2, 16, 16), jnp.float32)
    params = make_params(seed=0)

    outs = siamese_share_forward(params, x)
    jax.block_until_ready(outs)
    x_final, out0, out1 = outs

    assert x_final.shape == (2, 2) and out0.shape == (2, 10) and out1.shape == (2, 10)
    # Softmax rows must sum to ~1 (tolerance covers the approximate-reciprocal
    # EUP path used in the in-kernel softmax).
    for o in (x_final, out0, out1):
        assert jnp.allclose(jnp.sum(o, axis=1), 1.0, atol=1e-2)

    # Cross-check against a plain-JAX reference of the same folded network.
    rf, r0, r1 = _reference_forward(params, x)
    assert jnp.allclose(x_final, rf, atol=1e-2)
    assert jnp.allclose(out0, r0, atol=1e-2)
    assert jnp.allclose(out1, r1, atol=1e-2)

    print("KERNEL_OK")
</pallas_src>

<mosaic_0001>
module attributes {stable_mosaic.version = 11 : i64} {
  func.func @_block1_kernel(%arg0: memref<196x4xf32, #tpu.memory_space<vmem>>, %arg1: memref<196x4xf32, #tpu.memory_space<vmem>>, %arg2: memref<196x4xf32, #tpu.memory_space<vmem>>, %arg3: memref<196x4xf32, #tpu.memory_space<vmem>>, %arg4: memref<196x4xf32, #tpu.memory_space<vmem>>, %arg5: memref<196x4xf32, #tpu.memory_space<vmem>>, %arg6: memref<196x4xf32, #tpu.memory_space<vmem>>, %arg7: memref<196x4xf32, #tpu.memory_space<vmem>>, %arg8: memref<196x4xf32, #tpu.memory_space<vmem>>, %arg9: memref<4x4xf32, #tpu.memory_space<vmem>>, %arg10: memref<1x4xf32, #tpu.memory_space<vmem>>, %arg11: memref<16x16xf32, #tpu.memory_space<vmem>>, %arg12: memref<1x16xf32, #tpu.memory_space<vmem>>, %arg13: memref<1x16xf32, #tpu.memory_space<vmem>>, %arg14: memref<1x16xf32, #tpu.memory_space<vmem>>, %arg15: memref<196x16xf32, #tpu.memory_space<vmem>>) attributes {dimension_semantics = [], scalar_prefetch = 0 : i64, scratch_operands = 0 : i64, tpu.core_type = #tpu.core_type<tc>} {
    %c0 = arith.constant 0 : index
    %c0_0 = arith.constant 0 : index
    %0 = vector.load %arg9[%c0, %c0_0] : memref<4x4xf32, #tpu.memory_space<vmem>>, vector<4x4xf32>
    %c0_1 = arith.constant 0 : index
    %c0_2 = arith.constant 0 : index
    %1 = vector.load %arg10[%c0_1, %c0_2] : memref<1x4xf32, #tpu.memory_space<vmem>>, vector<1x4xf32>
    %c0_3 = arith.constant 0 : index
    %c0_4 = arith.constant 0 : index
    %2 = vector.load %arg11[%c0_3, %c0_4] : memref<16x16xf32, #tpu.memory_space<vmem>>, vector<16x16xf32>
    %c0_5 = arith.constant 0 : index
    %c0_6 = arith.constant 0 : index
    %3 = vector.load %arg0[%c0_5, %c0_6] : memref<196x4xf32, #tpu.memory_space<vmem>>, vector<196x4xf32>
    %cst = arith.constant dense<0.000000e+00> : vector<196x4xf32>
    %4 = tpu.matmul %3, %0, %cst {dimension_numbers = #tpu.dot_dimension_numbers<[1], [0], [0], [1], [0, 0, 1, 1], [], []>} : vector<196x4xf32>, vector<4x4xf32>, vector<196x4xf32> -> vector<196x4xf32>
    %5 = vector.broadcast %1 : vector<1x4xf32> to vector<196x4xf32>
    %6 = arith.addf %4, %5 : vector<196x4xf32>
    %c0_7 = arith.constant 0 : index
    %c0_8 = arith.constant 0 : index
    %7 = vector.load %arg1[%c0_7, %c0_8] : memref<196x4xf32, #tpu.memory_space<vmem>>, vector<196x4xf32>
    %cst_9 = arith.constant dense<0.000000e+00> : vector<196x4xf32>
    %8 = tpu.matmul %7, %0, %cst_9 {dimension_numbers = #tpu.dot_dimension_numbers<[1], [0], [0], [1], [0, 0, 1, 1], [], []>} : vector<196x4xf32>, vector<4x4xf32>, vector<196x4xf32> -> vector<196x4xf32>
    %9 = vector.broadcast %1 : vector<1x4xf32> to vector<196x4xf32>
    %10 = arith.addf %8, %9 : vector<196x4xf32>
    %c0_10 = arith.constant 0 : index
    %c0_11 = arith.constant 0 : index
    %11 = vector.load %arg2[%c0_10, %c0_11] : memref<196x4xf32, #tpu.memory_space<vmem>>, vector<196x4xf32>
    %cst_12 = arith.constant dense<0.000000e+00> : vector<196x4xf32>
    %12 = tpu.matmul %11, %0, %cst_12 {dimension_numbers = #tpu.dot_dimension_numbers<[1], [0], [0], [1], [0, 0, 1, 1], [], []>} : vector<196x4xf32>, vector<4x4xf32>, vector<196x4xf32> -> vector<196x4xf32>
    %13 = vector.broadcast %1 : vector<1x4xf32> to vector<196x4xf32>
    %14 = arith.addf %12, %13 : vector<196x4xf32>
    %c0_13 = arith.constant 0 : index
    %c0_14 = arith.constant 0 : index
    %15 = vector.load %arg3[%c0_13, %c0_14] : memref<196x4xf32, #tpu.memory_space<vmem>>, vector<196x4xf32>
    %cst_15 = arith.constant dense<0.000000e+00> : vector<196x4xf32>
    %16 = tpu.matmul %15, %0, %cst_15 {dimension_numbers = #tpu.dot_dimension_numbers<[1], [0], [0], [1], [0, 0, 1, 1], [], []>} : vector<196x4xf32>, vector<4x4xf32>, vector<196x4xf32> -> vector<196x4xf32>
    %17 = vector.broadcast %1 : vector<1x4xf32> to vector<196x4xf32>
    %18 = arith.addf %16, %17 : vector<196x4xf32>
    %c0_16 = arith.constant 0 : index
    %c0_17 = arith.constant 0 : index
    %19 = vector.load %arg4[%c0_16, %c0_17] : memref<196x4xf32, #tpu.memory_space<vmem>>, vector<196x4xf32>
    %cst_18 = arith.constant dense<0.000000e+00> : vector<196x4xf32>
    %20 = tpu.matmul %19, %0, %cst_18 {dimension_numbers = #tpu.dot_dimension_numbers<[1], [0], [0], [1], [0, 0, 1, 1], [], []>} : vector<196x4xf32>, vector<4x4xf32>, vector<196x4xf32> -> vector<196x4xf32>
    %21 = vector.broadcast %1 : vector<1x4xf32> to vector<196x4xf32>
    %22 = arith.addf %20, %21 : vector<196x4xf32>
    %c0_19 = arith.constant 0 : index
    %c0_20 = arith.constant 0 : index
    %23 = vector.load %arg5[%c0_19, %c0_20] : memref<196x4xf32, #tpu.memory_space<vmem>>, vector<196x4xf32>
    %cst_21 = arith.constant dense<0.000000e+00> : vector<196x4xf32>
    %24 = tpu.matmul %23, %0, %cst_21 {dimension_numbers = #tpu.dot_dimension_numbers<[1], [0], [0], [1], [0, 0, 1, 1], [], []>} : vector<196x4xf32>, vector<4x4xf32>, vector<196x4xf32> -> vector<196x4xf32>
    %25 = vector.broadcast %1 : vector<1x4xf32> to vector<196x4xf32>
    %26 = arith.addf %24, %25 : vector<196x4xf32>
    %c0_22 = arith.constant 0 : index
    %c0_23 = arith.constant 0 : index
    %27 = vector.load %arg6[%c0_22, %c0_23] : memref<196x4xf32, #tpu.memory_space<vmem>>, vector<196x4xf32>
    %cst_24 = arith.constant dense<0.000000e+00> : vector<196x4xf32>
    %28 = tpu.matmul %27, %0, %cst_24 {dimension_numbers = #tpu.dot_dimension_numbers<[1], [0], [0], [1], [0, 0, 1, 1], [], []>} : vector<196x4xf32>, vector<4x4xf32>, vector<196x4xf32> -> vector<196x4xf32>
    %29 = vector.broadcast %1 : vector<1x4xf32> to vector<196x4xf32>
    %30 = arith.addf %28, %29 : vector<196x4xf32>
    %c0_25 = arith.constant 0 : index
    %c0_26 = arith.constant 0 : index
    %31 = vector.load %arg7[%c0_25, %c0_26] : memref<196x4xf32, #tpu.memory_space<vmem>>, vector<196x4xf32>
    %cst_27 = arith.constant dense<0.000000e+00> : vector<196x4xf32>
    %32 = tpu.matmul %31, %0, %cst_27 {dimension_numbers = #tpu.dot_dimension_numbers<[1], [0], [0], [1], [0, 0, 1, 1], [], []>} : vector<196x4xf32>, vector<4x4xf32>, vector<196x4xf32> -> vector<196x4xf32>
    %33 = vector.broadcast %1 : vector<1x4xf32> to vector<196x4xf32>
    %34 = arith.addf %32, %33 : vector<196x4xf32>
    %c0_28 = arith.constant 0 : index
    %c0_29 = arith.constant 0 : index
    %35 = vector.load %arg8[%c0_28, %c0_29] : memref<196x4xf32, #tpu.memory_space<vmem>>, vector<196x4xf32>
    %cst_30 = arith.constant dense<0.000000e+00> : vector<196x4xf32>
    %36 = tpu.matmul %35, %0, %cst_30 {dimension_numbers = #tpu.dot_dimension_numbers<[1], [0], [0], [1], [0, 0, 1, 1], [], []>} : vector<196x4xf32>, vector<4x4xf32>, vector<196x4xf32> -> vector<196x4xf32>
    %37 = vector.broadcast %1 : vector<1x4xf32> to vector<196x4xf32>
    %38 = arith.addf %36, %37 : vector<196x4xf32>
    %39 = vector.extract_strided_slice %2 {offsets = [0, 0], sizes = [4, 16], strides = [1, 1]} : vector<16x16xf32> to vector<4x16xf32>
    %cst_31 = arith.constant dense<0.000000e+00> : vector<196x16xf32>
    %40 = tpu.matmul %6, %39, %cst_31 {dimension_numbers = #tpu.dot_dimension_numbers<[1], [0], [0], [1], [0, 0, 1, 1], [], []>} : vector<196x4xf32>, vector<4x16xf32>, vector<196x16xf32> -> vector<196x16xf32>
    %41 = vector.extract_strided_slice %2 {offsets = [4, 0], sizes = [4, 16], strides = [1, 1]} : vector<16x16xf32> to vector<4x16xf32>
    %cst_32 = arith.constant dense<0.000000e+00> : vector<196x16xf32>
    %42 = tpu.matmul %10, %41, %cst_32 {dimension_numbers = #tpu.dot_dimension_numbers<[1], [0], [0], [1], [0, 0, 1, 1], [], []>} : vector<196x4xf32>, vector<4x16xf32>, vector<196x16xf32> -> vector<196x16xf32>
    %43 = arith.addf %40, %42 : vector<196x16xf32>
    %44 = vector.extract_strided_slice %2 {offsets = [8, 0], sizes = [4, 16], strides = [1, 1]} : vector<16x16xf32> to vector<4x16xf32>
    %cst_33 = arith.constant dense<0.000000e+00> : vector<196x16xf32>
    %45 = tpu.matmul %18, %44, %cst_33 {dimension_numbers = #tpu.dot_dimension_numbers<[1], [0], [0], [1], [0, 0, 1, 1], [], []>} : vector<196x4xf32>, vector<4x16xf32>, vector<196x16xf32> -> vector<196x16xf32>
    %46 = arith.addf %43, %45 : vector<196x16xf32>
    %47 = vector.extract_strided_slice %2 {offsets = [12, 0], sizes = [4, 16], strides = [1, 1]} : vector<16x16xf32> to vector<4x16xf32>
    %cst_34 = arith.constant dense<0.000000e+00> : vector<196x16xf32>
    %48 = tpu.matmul %22, %47, %cst_34 {dimension_numbers = #tpu.dot_dimension_numbers<[1], [0], [0], [1], [0, 0, 1, 1], [], []>} : vector<196x4xf32>, vector<4x16xf32>, vector<196x16xf32> -> vector<196x16xf32>
    %49 = arith.addf %46, %48 : vector<196x16xf32>
    %50 = vector.extract_strided_slice %2 {offsets = [0, 0], sizes = [4, 16], strides = [1, 1]} : vector<16x16xf32> to vector<4x16xf32>
    %cst_35 = arith.constant dense<0.000000e+00> : vector<196x16xf32>
    %51 = tpu.matmul %10, %50, %cst_35 {dimension_numbers = #tpu.dot_dimension_numbers<[1], [0], [0], [1], [0, 0, 1, 1], [], []>} : vector<196x4xf32>, vector<4x16xf32>, vector<196x16xf32> -> vector<196x16xf32>
    %52 = vector.extract_strided_slice %2 {offsets = [4, 0], sizes = [4, 16], strides = [1, 1]} : vector<16x16xf32> to vector<4x16xf32>
    %cst_36 = arith.constant dense<0.000000e+00> : vector<196x16xf32>
    %53 = tpu.matmul %14, %52, %cst_36 {dimension_numbers = #tpu.dot_dimension_numbers<[1], [0], [0], [1], [0, 0, 1, 1], [], []>} : vector<196x4xf32>, vector<4x16xf32>, vector<196x16xf32> -> vector<196x16xf32>
    %54 = arith.addf %51, %53 : vector<196x16xf32>
    %55 = vector.extract_strided_slice %2 {offsets = [8, 0], sizes = [4, 16], strides = [1, 1]} : vector<16x16xf32> to vector<4x16xf32>
    %cst_37 = arith.constant dense<0.000000e+00> : vector<196x16xf32>
    %56 = tpu.matmul %22, %55, %cst_37 {dimension_numbers = #tpu.dot_dimension_numbers<[1], [0], [0], [1], [0, 0, 1, 1], [], []>} : vector<196x4xf32>, vector<4x16xf32>, vector<196x16xf32> -> vector<196x16xf32>
    %57 = arith.addf %54, %56 : vector<196x16xf32>
    %58 = vector.extract_strided_slice %2 {offsets = [12, 0], sizes = [4, 16], strides = [1, 1]} : vector<16x16xf32> to vector<4x16xf32>
    %cst_38 = arith.constant dense<0.000000e+00> : vector<196x16xf32>
    %59 = tpu.matmul %26, %58, %cst_38 {dimension_numbers = #tpu.dot_dimension_numbers<[1], [0], [0], [1], [0, 0, 1, 1], [], []>} : vector<196x4xf32>, vector<4x16xf32>, vector<196x16xf32> -> vector<196x16xf32>
    %60 = arith.addf %57, %59 : vector<196x16xf32>
    %61 = vector.extract_strided_slice %2 {offsets = [0, 0], sizes = [4, 16], strides = [1, 1]} : vector<16x16xf32> to vector<4x16xf32>
    %cst_39 = arith.constant dense<0.000000e+00> : vector<196x16xf32>
    %62 = tpu.matmul %18, %61, %cst_39 {dimension_numbers = #tpu.dot_dimension_numbers<[1], [0], [0], [1], [0, 0, 1, 1], [], []>} : vector<196x4xf32>, vector<4x16xf32>, vector<196x16xf32> -> vector<196x16xf32>
    %63 = vector.extract_strided_slice %2 {offsets = [4, 0], sizes = [4, 16], strides = [1, 1]} : vector<16x16xf32> to vector<4x16xf32>
    %cst_40 = arith.constant dense<0.000000e+00> : vector<196x16xf32>
    %64 = tpu.matmul %22, %63, %cst_40 {dimension_numbers = #tpu.dot_dimension_numbers<[1], [0], [0], [1], [0, 0, 1, 1], [], []>} : vector<196x4xf32>, vector<4x16xf32>, vector<196x16xf32> -> vector<196x16xf32>
    %65 = arith.addf %62, %64 : vector<196x16xf32>
    %66 = vector.extract_strided_slice %2 {offsets = [8, 0], sizes = [4, 16], strides = [1, 1]} : vector<16x16xf32> to vector<4x16xf32>
    %cst_41 = arith.constant dense<0.000000e+00> : vector<196x16xf32>
    %67 = tpu.matmul %30, %66, %cst_41 {dimension_numbers = #tpu.dot_dimension_numbers<[1], [0], [0], [1], [0, 0, 1, 1], [], []>} : vector<196x4xf32>, vector<4x16xf32>, vector<196x16xf32> -> vector<196x16xf32>
    %68 = arith.addf %65, %67 : vector<196x16xf32>
    %69 = vector.extract_strided_slice %2 {offsets = [12, 0], sizes = [4, 16], strides = [1, 1]} : vector<16x16xf32> to vector<4x16xf32>
    %cst_42 = arith.constant dense<0.000000e+00> : vector<196x16xf32>
    %70 = tpu.matmul %34, %69, %cst_42 {dimension_numbers = #tpu.dot_dimension_numbers<[1], [0], [0], [1], [0, 0, 1, 1], [], []>} : vector<196x4xf32>, vector<4x16xf32>, vector<196x16xf32> -> vector<196x16xf32>
    %71 = arith.addf %68, %70 : vector<196x16xf32>
    %72 = vector.extract_strided_slice %2 {offsets = [0, 0], sizes = [4, 16], strides = [1, 1]} : vector<16x16xf32> to vector<4x16xf32>
    %cst_43 = arith.constant dense<0.000000e+00> : vector<196x16xf32>
    %73 = tpu.matmul %22, %72, %cst_43 {dimension_numbers = #tpu.dot_dimension_numbers<[1], [0], [0], [1], [0, 0, 1, 1], [], []>} : vector<196x4xf32>, vector<4x16xf32>, vector<196x16xf32> -> vector<196x16xf32>
    %74 = vector.extract_strided_slice %2 {offsets = [4, 0], sizes = [4, 16], strides = [1, 1]} : vector<16x16xf32> to vector<4x16xf32>
    %cst_44 = arith.constant dense<0.000000e+00> : vector<196x16xf32>
    %75 = tpu.matmul %26, %74, %cst_44 {dimension_numbers = #tpu.dot_dimension_numbers<[1], [0], [0], [1], [0, 0, 1, 1], [], []>} : vector<196x4xf32>, vector<4x16xf32>, vector<196x16xf32> -> vector<196x16xf32>
    %76 = arith.addf %73, %75 : vector<196x16xf32>
    %77 = vector.extract_strided_slice %2 {offsets = [8, 0], sizes = [4, 16], strides = [1, 1]} : vector<16x16xf32> to vector<4x16xf32>
    %cst_45 = arith.constant dense<0.000000e+00> : vector<196x16xf32>
    %78 = tpu.matmul %34, %77, %cst_45 {dimension_numbers = #tpu.dot_dimension_numbers<[1], [0], [0], [1], [0, 0, 1, 1], [], []>} : vector<196x4xf32>, vector<4x16xf32>, vector<196x16xf32> -> vector<196x16xf32>
    %79 = arith.addf %76, %78 : vector<196x16xf32>
    %80 = vector.extract_strided_slice %2 {offsets = [12, 0], sizes = [4, 16], strides = [1, 1]} : vector<16x16xf32> to vector<4x16xf32>
    %cst_46 = arith.constant dense<0.000000e+00> : vector<196x16xf32>
    %81 = tpu.matmul %38, %80, %cst_46 {dimension_numbers = #tpu.dot_dimension_numbers<[1], [0], [0], [1], [0, 0, 1, 1], [], []>} : vector<196x4xf32>, vector<4x16xf32>, vector<196x16xf32> -> vector<196x16xf32>
    %82 = arith.addf %79, %81 : vector<196x16xf32>
    %83 = arith.maximumf %49, %60 : vector<196x16xf32>
    %84 = arith.maximumf %71, %82 : vector<196x16xf32>
    %85 = arith.maximumf %83, %84 : vector<196x16xf32>
    %c0_47 = arith.constant 0 : index
    %c0_48 = arith.constant 0 : index
    %86 = vector.load %arg12[%c0_47, %c0_48] : memref<1x16xf32, #tpu.memory_space<vmem>>, vector<1x16xf32>
    %87 = vector.broadcast %86 : vector<1x16xf32> to vector<196x16xf32>
    %88 = arith.addf %85, %87 : vector<196x16xf32>
    %cst_49 = arith.constant 0.000000e+00 : f32
    %89 = vector.broadcast %cst_49 : f32 to vector<196x16xf32>
    %90 = arith.maximumf %88, %89 : vector<196x16xf32>
    %c0_50 = arith.constant 0 : index
    %c0_51 = arith.constant 0 : index
    %91 = vector.load %arg13[%c0_50, %c0_51] : memref<1x16xf32, #tpu.memory_space<vmem>>, vector<1x16xf32>
    %92 = vector.broadcast %91 : vector<1x16xf32> to vector<196x16xf32>
    %93 = arith.mulf %90, %92 : vector<196x16xf32>
    %c0_52 = arith.constant 0 : index
    %c0_53 = arith.constant 0 : index
    %94 = vector.load %arg14[%c0_52, %c0_53] : memref<1x16xf32, #tpu.memory_space<vmem>>, vector<1x16xf32>
    %95 = vector.broadcast %94 : vector<1x16xf32> to vector<196x16xf32>
    %96 = arith.addf %93, %95 : vector<196x16xf32>
    %c0_54 = arith.constant 0 : index
    %c0_55 = arith.constant 0 : index
    %97 = vector.load %arg15[%c0_54, %c0_55] : memref<196x16xf32, #tpu.memory_space<vmem>>, vector<196x16xf32>
    tpu.vector_store %arg15[%c0_54, %c0_55], %96 {strides = array<i32>} : memref<196x16xf32, #tpu.memory_space<vmem>>, vector<196x16xf32>,
    return
  }
}

module attributes {stable_mosaic.version = 11 : i64} {
  func.func @_block2_kernel(%arg0: memref<16x144xf32, #tpu.memory_space<vmem>>, %arg1: memref<16x144xf32, #tpu.memory_space<vmem>>, %arg2: memref<16x144xf32, #tpu.memory_space<vmem>>, %arg3: memref<16x144xf32, #tpu.memory_space<vmem>>, %arg4: memref<144x64xf32, #tpu.memory_space<vmem>>, %arg5: memref<1x64xf32, #tpu.memory_space<vmem>>, %arg6: memref<1x64xf32, #tpu.memory_space<vmem>>, %arg7: memref<1x64xf32, #tpu.memory_space<vmem>>, %arg8: memref<16x64xf32, #tpu.memory_space<vmem>>) attributes {dimension_semantics = [], scalar_prefetch = 0 : i64, scratch_operands = 0 : i64, tpu.core_type = #tpu.core_type<tc>} {
    %c0 = arith.constant 0 : index
    %c0_0 = arith.constant 0 : index
    %0 = vector.load %arg4[%c0, %c0_0] : memref<144x64xf32, #tpu.memory_space<vmem>>, vector<144x64xf32>
    %c0_1 = arith.constant 0 : index
    %c0_2 = arith.constant 0 : index
    %1 = vector.load %arg0[%c0_1, %c0_2] : memref<16x144xf32, #tpu.memory_space<vmem>>, vector<16x144xf32>
    %cst = arith.constant dense<0.000000e+00> : vector<16x64xf32>
    %2 = tpu.matmul %1, %0, %cst {dimension_numbers = #tpu.dot_dimension_numbers<[1], [0], [0], [1], [0, 0, 1, 1], [], []>} : vector<16x144xf32>, vector<144x64xf32>, vector<16x64xf32> -> vector<16x64xf32>
    %c0_3 = arith.constant 0 : index
    %c0_4 = arith.constant 0 : index
    %3 = vector.load %arg1[%c0_3, %c0_4] : memref<16x144xf32, #tpu.memory_space<vmem>>, vector<16x144xf32>
    %cst_5 = arith.constant dense<0.000000e+00> : vector<16x64xf32>
    %4 = tpu.matmul %3, %0, %cst_5 {dimension_numbers = #tpu.dot_dimension_numbers<[1], [0], [0], [1], [0, 0, 1, 1], [], []>} : vector<16x144xf32>, vector<144x64xf32>, vector<16x64xf32> -> vector<16x64xf32>
    %c0_6 = arith.constant 0 : index
    %c0_7 = arith.constant 0 : index
    %5 = vector.load %arg2[%c0_6, %c0_7] : memref<16x144xf32, #tpu.memory_space<vmem>>, vector<16x144xf32>
    %cst_8 = arith.constant dense<0.000000e+00> : vector<16x64xf32>
    %6 = tpu.matmul %5, %0, %cst_8 {dimension_numbers = #tpu.dot_dimension_numbers<[1], [0], [0], [1], [0, 0, 1, 1], [], []>} : vector<16x144xf32>, vector<144x64xf32>, vector<16x64xf32> -> vector<16x64xf32>
    %c0_9 = arith.constant 0 : index
    %c0_10 = arith.constant 0 : index
    %7 = vector.load %arg3[%c0_9, %c0_10] : memref<16x144xf32, #tpu.memory_space<vmem>>, vector<16x144xf32>
    %cst_11 = arith.constant dense<0.000000e+00> : vector<16x64xf32>
    %8 = tpu.matmul %7, %0, %cst_11 {dimension_numbers = #tpu.dot_dimension_numbers<[1], [0], [0], [1], [0, 0, 1, 1], [], []>} : vector<16x144xf32>, vector<144x64xf32>, vector<16x64xf32> -> vector<16x64xf32>
    %9 = arith.maximumf %2, %4 : vector<16x64xf32>
    %10 = arith.maximumf %6, %8 : vector<16x64xf32>
    %11 = arith.maximumf %9, %10 : vector<16x64xf32>
    %c0_12 = arith.constant 0 : index
    %c0_13 = arith.constant 0 : index
    %12 = vector.load %arg5[%c0_12, %c0_13] : memref<1x64xf32, #tpu.memory_space<vmem>>, vector<1x64xf32>
    %13 = vector.broadcast %12 : vector<1x64xf32> to vector<16x64xf32>
    %14 = arith.addf %11, %13 : vector<16x64xf32>
    %cst_14 = arith.constant 0.000000e+00 : f32
    %15 = vector.broadcast %cst_14 : f32 to vector<16x64xf32>
    %16 = arith.maximumf %14, %15 : vector<16x64xf32>
    %c0_15 = arith.constant 0 : index
    %c0_16 = arith.constant 0 : index
    %17 = vector.load %arg6[%c0_15, %c0_16] : memref<1x64xf32, #tpu.memory_space<vmem>>, vector<1x64xf32>
    %18 = vector.broadcast %17 : vector<1x64xf32> to vector<16x64xf32>
    %19 = arith.mulf %16, %18 : vector<16x64xf32>
    %c0_17 = arith.constant 0 : index
    %c0_18 = arith.constant 0 : index
    %20 = vector.load %arg7[%c0_17, %c0_18] : memref<1x64xf32, #tpu.memory_space<vmem>>, vector<1x64xf32>
    %21 = vector.broadcast %20 : vector<1x64xf32> to vector<16x64xf32>
    %22 = arith.addf %19, %21 : vector<16x64xf32>
    %c0_19 = arith.constant 0 : index
    %c0_20 = arith.constant 0 : index
    %23 = vector.load %arg8[%c0_19, %c0_20] : memref<16x64xf32, #tpu.memory_space<vmem>>, vector<16x64xf32>
    tpu.vector_store %arg8[%c0_19, %c0_20], %22 {strides = array<i32>} : memref<16x64xf32, #tpu.memory_space<vmem>>, vector<16x64xf32>,
    return
  }
}

module attributes {stable_mosaic.version = 11 : i64} {
  func.func @_heads_kernel(%arg0: memref<4x256xf32, #tpu.memory_space<vmem>>, %arg1: memref<256x170xf32, #tpu.memory_space<vmem>>, %arg2: memref<1x170xf32, #tpu.memory_space<vmem>>, %arg3: memref<1x170xf32, #tpu.memory_space<vmem>>, %arg4: memref<1x170xf32, #tpu.memory_space<vmem>>, %arg5: memref<170x90xf32, #tpu.memory_space<vmem>>, %arg6: memref<1x90xf32, #tpu.memory_space<vmem>>, %arg7: memref<1x90xf32, #tpu.memory_space<vmem>>, %arg8: memref<1x90xf32, #tpu.memory_space<vmem>>, %arg9: memref<90x10xf32, #tpu.memory_space<vmem>>, %arg10: memref<1x10xf32, #tpu.memory_space<vmem>>, %arg11: memref<10x25xf32, #tpu.memory_space<vmem>>, %arg12: memref<10x25xf32, #tpu.memory_space<vmem>>, %arg13: memref<1x25xf32, #tpu.memory_space<vmem>>, %arg14: memref<1x25xf32, #tpu.memory_space<vmem>>, %arg15: memref<1x25xf32, #tpu.memory_space<vmem>>, %arg16: memref<25x10xf32, #tpu.memory_space<vmem>>, %arg17: memref<1x10xf32, #tpu.memory_space<vmem>>, %arg18: memref<1x10xf32, #tpu.memory_space<vmem>>, %arg19: memref<1x10xf32, #tpu.memory_space<vmem>>, %arg20: memref<10x2xf32, #tpu.memory_space<vmem>>, %arg21: memref<1x2xf32, #tpu.memory_space<vmem>>, %arg22: memref<2x2xf32, #tpu.memory_space<vmem>>, %arg23: memref<2x10xf32, #tpu.memory_space<vmem>>, %arg24: memref<2x10xf32, #tpu.memory_space<vmem>>) attributes {dimension_semantics = [], scalar_prefetch = 0 : i64, scratch_operands = 0 : i64, tpu.core_type = #tpu.core_type<tc>} {
    %c0 = arith.constant 0 : index
    %c0_0 = arith.constant 0 : index
    %0 = vector.load %arg0[%c0, %c0_0] : memref<4x256xf32, #tpu.memory_space<vmem>>, vector<4x256xf32>
    %c0_1 = arith.constant 0 : index
    %c0_2 = arith.constant 0 : index
    %1 = vector.load %arg1[%c0_1, %c0_2] : memref<256x170xf32, #tpu.memory_space<vmem>>, vector<256x170xf32>
    %cst = arith.constant dense<0.000000e+00> : vector<4x170xf32>
    %2 = tpu.matmul %0, %1, %cst {dimension_numbers = #tpu.dot_dimension_numbers<[1], [0], [0], [1], [0, 0, 1, 1], [], []>} : vector<4x256xf32>, vector<256x170xf32>, vector<4x170xf32> -> vector<4x170xf32>
    %c0_3 = arith.constant 0 : index
    %c0_4 = arith.constant 0 : index
    %3 = vector.load %arg2[%c0_3, %c0_4] : memref<1x170xf32, #tpu.memory_space<vmem>>, vector<1x170xf32>
    %4 = vector.broadcast %3 : vector<1x170xf32> to vector<4x170xf32>
    %5 = arith.addf %2, %4 : vector<4x170xf32>
    %cst_5 = arith.constant 0.000000e+00 : f32
    %6 = vector.broadcast %cst_5 : f32 to vector<4x170xf32>
    %7 = arith.maximumf %5, %6 : vector<4x170xf32>
    %c0_6 = arith.constant 0 : index
    %c0_7 = arith.constant 0 : index
    %8 = vector.load %arg3[%c0_6, %c0_7] : memref<1x170xf32, #tpu.memory_space<vmem>>, vector<1x170xf32>
    %9 = vector.broadcast %8 : vector<1x170xf32> to vector<4x170xf32>
    %10 = arith.mulf %7, %9 : vector<4x170xf32>
    %c0_8 = arith.constant 0 : index
    %c0_9 = arith.constant 0 : index
    %11 = vector.load %arg4[%c0_8, %c0_9] : memref<1x170xf32, #tpu.memory_space<vmem>>, vector<1x170xf32>
    %12 = vector.broadcast %11 : vector<1x170xf32> to vector<4x170xf32>
    %13 = arith.addf %10, %12 : vector<4x170xf32>
    %c0_10 = arith.constant 0 : index
    %c0_11 = arith.constant 0 : index
    %14 = vector.load %arg5[%c0_10, %c0_11] : memref<170x90xf32, #tpu.memory_space<vmem>>, vector<170x90xf32>
    %cst_12 = arith.constant dense<0.000000e+00> : vector<4x90xf32>
    %15 = tpu.matmul %13, %14, %cst_12 {dimension_numbers = #tpu.dot_dimension_numbers<[1], [0], [0], [1], [0, 0, 1, 1], [], []>} : vector<4x170xf32>, vector<170x90xf32>, vector<4x90xf32> -> vector<4x90xf32>
    %c0_13 = arith.constant 0 : index
    %c0_14 = arith.constant 0 : index
    %16 = vector.load %arg6[%c0_13, %c0_14] : memref<1x90xf32, #tpu.memory_space<vmem>>, vector<1x90xf32>
    %17 = vector.broadcast %16 : vector<1x90xf32> to vector<4x90xf32>
    %18 = arith.addf %15, %17 : vector<4x90xf32>
    %cst_15 = arith.constant 0.000000e+00 : f32
    %19 = vector.broadcast %cst_15 : f32 to vector<4x90xf32>
    %20 = arith.maximumf %18, %19 : vector<4x90xf32>
    %c0_16 = arith.constant 0 : index
    %c0_17 = arith.constant 0 : index
    %21 = vector.load %arg7[%c0_16, %c0_17] : memref<1x90xf32, #tpu.memory_space<vmem>>, vector<1x90xf32>
    %22 = vector.broadcast %21 : vector<1x90xf32> to vector<4x90xf32>
    %23 = arith.mulf %20, %22 : vector<4x90xf32>
    %c0_18 = arith.constant 0 : index
    %c0_19 = arith.constant 0 : index
    %24 = vector.load %arg8[%c0_18, %c0_19] : memref<1x90xf32, #tpu.memory_space<vmem>>, vector<1x90xf32>
    %25 = vector.broadcast %24 : vector<1x90xf32> to vector<4x90xf32>
    %26 = arith.addf %23, %25 : vector<4x90xf32>
    %c0_20 = arith.constant 0 : index
    %c0_21 = arith.constant 0 : index
    %27 = vector.load %arg9[%c0_20, %c0_21] : memref<90x10xf32, #tpu.memory_space<vmem>>, vector<90x10xf32>
    %cst_22 = arith.constant dense<0.000000e+00> : vector<4x10xf32>
    %28 = tpu.matmul %26, %27, %cst_22 {dimension_numbers = #tpu.dot_dimension_numbers<[1], [0], [0], [1], [0, 0, 1, 1], [], []>} : vector<4x90xf32>, vector<90x10xf32>, vector<4x10xf32> -> vector<4x10xf32>
    %c0_23 = arith.constant 0 : index
    %c0_24 = arith.constant 0 : index
    %29 = vector.load %arg10[%c0_23, %c0_24] : memref<1x10xf32, #tpu.memory_space<vmem>>, vector<1x10xf32>
    %30 = vector.broadcast %29 : vector<1x10xf32> to vector<4x10xf32>
    %31 = arith.addf %28, %30 : vector<4x10xf32>
    %cst_25 = arith.constant dense<0xFF800000> : vector<4xf32>
    %32 = vector.multi_reduction <maximumf>, %31, %cst_25 [1] : vector<4x10xf32> to vector<4xf32>
    %33 = vector.shape_cast %32 : vector<4xf32> to vector<4x1xf32>
    %34 = vector.broadcast %33 : vector<4x1xf32> to vector<4x10xf32>
    %35 = arith.subf %31, %34 : vector<4x10xf32>
    %36 = math.exp %35 : vector<4x10xf32>
    %cst_26 = arith.constant dense<0.000000e+00> : vector<4xf32>
    %37 = vector.multi_reduction <add>, %36, %cst_26 [1] : vector<4x10xf32> to vector<4xf32>
    %38 = vector.shape_cast %37 : vector<4xf32> to vector<4x1xf32>
    %39 = tpu.reciprocal %38 {approx = true} : vector<4x1xf32> -> vector<4x1xf32>
    %40 = vector.broadcast %39 : vector<4x1xf32> to vector<4x10xf32>
    %41 = arith.mulf %36, %40 : vector<4x10xf32>
    %42 = vector.extract_strided_slice %41 {offsets = [0, 0], sizes = [2, 10], strides = [1, 1]} : vector<4x10xf32> to vector<2x10xf32>
    %43 = vector.extract_strided_slice %41 {offsets = [2, 0], sizes = [2, 10], strides = [1, 1]} : vector<4x10xf32> to vector<2x10xf32>
    %c0_27 = arith.constant 0 : index
    %c0_28 = arith.constant 0 : index
    %44 = vector.load %arg23[%c0_27, %c0_28] : memref<2x10xf32, #tpu.memory_space<vmem>>, vector<2x10xf32>
    tpu.vector_store %arg23[%c0_27, %c0_28], %42 {strides = array<i32>} : memref<2x10xf32, #tpu.memory_space<vmem>>, vector<2x10xf32>,
    %c0_29 = arith.constant 0 : index
    %c0_30 = arith.constant 0 : index
    %45 = vector.load %arg24[%c0_29, %c0_30] : memref<2x10xf32, #tpu.memory_space<vmem>>, vector<2x10xf32>
    tpu.vector_store %arg24[%c0_29, %c0_30], %43 {strides = array<i32>} : memref<2x10xf32, #tpu.memory_space<vmem>>, vector<2x10xf32>,
    %c0_31 = arith.constant 0 : index
    %c0_32 = arith.constant 0 : index
    %46 = vector.load %arg11[%c0_31, %c0_32] : memref<10x25xf32, #tpu.memory_space<vmem>>, vector<10x25xf32>
    %cst_33 = arith.constant dense<0.000000e+00> : vector<2x25xf32>
    %47 = tpu.matmul %42, %46, %cst_33 {dimension_numbers = #tpu.dot_dimension_numbers<[1], [0], [0], [1], [0, 0, 1, 1], [], []>} : vector<2x10xf32>, vector<10x25xf32>, vector<2x25xf32> -> vector<2x25xf32>
    %c0_34 = arith.constant 0 : index
    %c0_35 = arith.constant 0 : index
    %48 = vector.load %arg12[%c0_34, %c0_35] : memref<10x25xf32, #tpu.memory_space<vmem>>, vector<10x25xf32>
    %cst_36 = arith.constant dense<0.000000e+00> : vector<2x25xf32>
    %49 = tpu.matmul %43, %48, %cst_36 {dimension_numbers = #tpu.dot_dimension_numbers<[1], [0], [0], [1], [0, 0, 1, 1], [], []>} : vector<2x10xf32>, vector<10x25xf32>, vector<2x25xf32> -> vector<2x25xf32>
    %50 = arith.addf %47, %49 : vector<2x25xf32>
    %c0_37 = arith.constant 0 : index
    %c0_38 = arith.constant 0 : index
    %51 = vector.load %arg13[%c0_37, %c0_38] : memref<1x25xf32, #tpu.memory_space<vmem>>, vector<1x25xf32>
    %52 = vector.broadcast %51 : vector<1x25xf32> to vector<2x25xf32>
    %53 = arith.addf %50, %52 : vector<2x25xf32>
    %cst_39 = arith.constant 0.000000e+00 : f32
    %54 = vector.broadcast %cst_39 : f32 to vector<2x25xf32>
    %55 = arith.maximumf %53, %54 : vector<2x25xf32>
    %c0_40 = arith.constant 0 : index
    %c0_41 = arith.constant 0 : index
    %56 = vector.load %arg14[%c0_40, %c0_41] : memref<1x25xf32, #tpu.memory_space<vmem>>, vector<1x25xf32>
    %57 = vector.broadcast %56 : vector<1x25xf32> to vector<2x25xf32>
    %58 = arith.mulf %55, %57 : vector<2x25xf32>
    %c0_42 = arith.constant 0 : index
    %c0_43 = arith.constant 0 : index
    %59 = vector.load %arg15[%c0_42, %c0_43] : memref<1x25xf32, #tpu.memory_space<vmem>>, vector<1x25xf32>
    %60 = vector.broadcast %59 : vector<1x25xf32> to vector<2x25xf32>
    %61 = arith.addf %58, %60 : vector<2x25xf32>
    %c0_44 = arith.constant 0 : index
    %c0_45 = arith.constant 0 : index
    %62 = vector.load %arg16[%c0_44, %c0_45] : memref<25x10xf32, #tpu.memory_space<vmem>>, vector<25x10xf32>
    %cst_46 = arith.constant dense<0.000000e+00> : vector<2x10xf32>
    %63 = tpu.matmul %61, %62, %cst_46 {dimension_numbers = #tpu.dot_dimension_numbers<[1], [0], [0], [1], [0, 0, 1, 1], [], []>} : vector<2x25xf32>, vector<25x10xf32>, vector<2x10xf32> -> vector<2x10xf32>
    %c0_47 = arith.constant 0 : index
    %c0_48 = arith.constant 0 : index
    %64 = vector.load %arg17[%c0_47, %c0_48] : memref<1x10xf32, #tpu.memory_space<vmem>>, vector<1x10xf32>
    %65 = vector.broadcast %64 : vector<1x10xf32> to vector<2x10xf32>
    %66 = arith.addf %63, %65 : vector<2x10xf32>
    %cst_49 = arith.constant 0.000000e+00 : f32
    %67 = vector.broadcast %cst_49 : f32 to vector<2x10xf32>
    %68 = arith.maximumf %66, %67 : vector<2x10xf32>
    %c0_50 = arith.constant 0 : index
    %c0_51 = arith.constant 0 : index
    %69 = vector.load %arg18[%c0_50, %c0_51] : memref<1x10xf32, #tpu.memory_space<vmem>>, vector<1x10xf32>
    %70 = vector.broadcast %69 : vector<1x10xf32> to vector<2x10xf32>
    %71 = arith.mulf %68, %70 : vector<2x10xf32>
    %c0_52 = arith.constant 0 : index
    %c0_53 = arith.constant 0 : index
    %72 = vector.load %arg19[%c0_52, %c0_53] : memref<1x10xf32, #tpu.memory_space<vmem>>, vector<1x10xf32>
    %73 = vector.broadcast %72 : vector<1x10xf32> to vector<2x10xf32>
    %74 = arith.addf %71, %73 : vector<2x10xf32>
    %c0_54 = arith.constant 0 : index
    %c0_55 = arith.constant 0 : index
    %75 = vector.load %arg20[%c0_54, %c0_55] : memref<10x2xf32, #tpu.memory_space<vmem>>, vector<10x2xf32>
    %cst_56 = arith.constant dense<0.000000e+00> : vector<2x2xf32>
    %76 = tpu.matmul %74, %75, %cst_56 {dimension_numbers = #tpu.dot_dimension_numbers<[1], [0], [0], [1], [0, 0, 1, 1], [], []>} : vector<2x10xf32>, vector<10x2xf32>, vector<2x2xf32> -> vector<2x2xf32>
    %c0_57 = arith.constant 0 : index
    %c0_58 = arith.constant 0 : index
    %77 = vector.load %arg21[%c0_57, %c0_58] : memref<1x2xf32, #tpu.memory_space<vmem>>, vector<1x2xf32>
    %78 = vector.broadcast %77 : vector<1x2xf32> to vector<2x2xf32>
    %79 = arith.addf %76, %78 : vector<2x2xf32>
    %cst_59 = arith.constant dense<0xFF800000> : vector<2xf32>
    %80 = vector.multi_reduction <maximumf>, %79, %cst_59 [1] : vector<2x2xf32> to vector<2xf32>
    %81 = vector.shape_cast %80 : vector<2xf32> to vector<2x1xf32>
    %82 = vector.broadcast %81 : vector<2x1xf32> to vector<2x2xf32>
    %83 = arith.subf %79, %82 : vector<2x2xf32>
    %84 = math.exp %83 : vector<2x2xf32>
    %cst_60 = arith.constant dense<0.000000e+00> : vector<2xf32>
    %85 = vector.multi_reduction <add>, %84, %cst_60 [1] : vector<2x2xf32> to vector<2xf32>
    %86 = vector.shape_cast %85 : vector<2xf32> to vector<2x1xf32>
    %87 = tpu.reciprocal %86 {approx = true} : vector<2x1xf32> -> vector<2x1xf32>
    %88 = vector.broadcast %87 : vector<2x1xf32> to vector<2x2xf32>
    %89 = arith.mulf %84, %88 : vector<2x2xf32>
    %c0_61 = arith.constant 0 : index
    %c0_62 = arith.constant 0 : index
    %90 = vector.load %arg22[%c0_61, %c0_62] : memref<2x2xf32, #tpu.memory_space<vmem>>, vector<2x2xf32>
    tpu.vector_store %arg22[%c0_61, %c0_62], %89 {strides = array<i32>} : memref<2x2xf32, #tpu.memory_space<vmem>>, vector<2x2xf32>,
    return
  }
}

</mosaic_0001>

<bundles_post_ra>
// kernel: siamese_share_forward.4
= control target key start
LH: loop header
LB: loop body
LE: loop exit
PB: predicated region body
PF: predicated region fallthrough
CT: control target
= control target key end

     0   :  { %vm51_vm0 = vcmask 130048   ;;  %vm298_vm1 = vcmask 523264   ;;  %s506_s4 = inlined_call_operand.vmem [shape: f32[144,64], index: 4, kind: input, shape index: {}]   ;;  %s507_s1 = inlined_call_operand.vmem [shape: f32[16,144], index: 1, kind: input, shape index: {}]   ;;  %s508_s0 = inlined_call_operand.vmem [shape: f32[16,144], index: 0, kind: input, shape index: {}]   ;;  %s509_s2 = inlined_call_operand.vmem [shape: f32[16,144], index: 2, kind: input, shape index: {}]   ;;  %s510_s3 = inlined_call_operand.vmem [shape: f32[16,144], index: 3, kind: input, shape index: {}]   ;;  %s511_s5 = inlined_call_operand.vmem [shape: f32[1,64], index: 5, kind: input, shape index: {}]   ;;  %s512_s6 = inlined_call_operand.vmem [shape: f32[1,64], index: 6, kind: input, shape index: {}]   ;;  %s513_s7 = inlined_call_operand.vmem [shape: f32[1,64], index: 7, kind: input, shape index: {}]   ;;  %s514_s8 = inlined_call_operand.vmem [shape: f32[16,64], index: 8, kind: output, shape index: {}]  }
   0x1   :  { %v44_v0 = vld [vmem:[%s506_s4 + $0x78] sm:$0xff]  ;;  %v371_v1 = vld [vmem:[%s506_s4 + $0x88] sm:$0xff]  ;;  %v43_v2 = vld [vmem:[%s506_s4 + $0x70] sm:$0xff] }
   0x2   :  { %58 = vmatpush.msra.mxu0 %v44_v0  ;;  %95 = vmatpush.msra.mxu1 %v371_v1  ;;  %v380_v3 = vld [vmem:[%s506_s4 + $0x80] sm:$0xff]  ;;  %v42_v4 = vld [vmem:[%s506_s4 + $0x68] sm:$0xff]  ;;  %v107_v6 = vld [vmem:[%s507_s1 + $0x18] sm:$0xff] }
   0x3   :  { %114 = vmatpush.msra.mxu2 %v44_v0  ;;  %313 = vmatpush.msra.mxu3 %v371_v1  ;;  %v41_v5 = vld [vmem:[%s506_s4 + $0x60] sm:$0xff]  ;;  %v40_v7 = vld [vmem:[%s506_s4 + $0x58] sm:$0xff]  ;;  %v39_v8 = vld [vmem:[%s506_s4 + $0x50] sm:$0xff] }
   0x4   :  { %59 = vmatpush.msra.mxu0 %v43_v2  ;;  %96 = vmatpush.msra.mxu1 %v380_v3  ;;  %v38_v9 = vld [vmem:[%s506_s4 + $0x48] sm:$0xff]  ;;  %v37_v10 = vld [vmem:[%s506_s4 + $0x40] sm:$0xff]  ;;  %v36_v11 = vld [vmem:[%s506_s4 + $0x38] sm:$0xff] }
   0x5   :  { %115 = vmatpush.msra.mxu2 %v43_v2  ;;  %314 = vmatpush.msra.mxu3 %v380_v3  ;;  %v35_v12 = vld [vmem:[%s506_s4 + $0x30] sm:$0xff]  ;;  %v48_v13 = vld [vmem:[%s508_s0 + $0x8] sm:$0xff]  ;;  %v33_v16 = vld [vmem:[%s506_s4 + $0x20] sm:$0xff] }
   0x6   :  { %170 = vmatpush.msrb.mxu1 %v44_v0  ;;  %60 = vmatpush.msra.mxu0 %v42_v4  ;;  %v34_v14 = vld [vmem:[%s506_s4 + $0x28] sm:$0xff]  ;;  %v32_v17 = vld [vmem:[%s506_s4 + $0x18] sm:$0xff]  ;;  %v31_v18 = vld [vmem:[%s506_s4 + $0x10] sm:$0xff] }
   0x7   :  { %207 = vmatpush.msrb.mxu3 %v371_v1  ;;  %116 = vmatpush.msra.mxu2 %v42_v4  ;;  %v161_v15 = vld [vmem:[%s509_s2 + $0x8] sm:$0xff]  ;;  %v50_v19 = vld [vmem:[%s508_s0 + $0x18] sm:$0xff]  ;;  %v29_v22 = vld [vmem:[%s506_s4] sm:$0xff] }
   0x8   :  { %171 = vmatpush.msrb.mxu1 %v43_v2  ;;  %61 = vmatpush.msra.mxu0 %v41_v5  ;;  %v30_v20 = vld [vmem:[%s506_s4 + $0x8] sm:$0xff]  ;;  %v163_v21 = vld [vmem:[%s509_s2 + $0x18] sm:$0xff]  ;;  %v47_v23 = vld [vmem:[%s508_s0] sm:$0xff] }
   0x9   :  { %208 = vmatpush.msrb.mxu3 %v380_v3  ;;  %117 = vmatpush.msra.mxu2 %v41_v5  ;;  %v104_v24 = vld [vmem:[%s507_s1] sm:$0xff]  ;;  %v49_v27 = vld [vmem:[%s508_s0 + $0x10] sm:$0xff]  ;;  %v105_v31 = vld [vmem:[%s507_s1 + $0x8] sm:$0xff] }
   0xa   :  { %308 = vmatmul.msk.f32.vlgmr.msra.gmra.mxu3 %vm51_vm0, %v107_v6  ;;  %172 = vmatpush.msrb.mxu1 %v42_v4  ;;  %v160_v25 = vld [vmem:[%s509_s2] sm:$0xff]  ;;  %v106_v28 = vld [vmem:[%s507_s1 + $0x10] sm:$0xff]  ;;  %v217_v32 = vld [vmem:[%s510_s3 + $0x8] sm:$0xff] }
   0xb   :  { %226 = vmatpush.msra.mxu3 %v44_v0  ;;  %62 = vmatpush.msra.mxu0 %v40_v7  ;;  %v216_v26 = vld [vmem:[%s510_s3] sm:$0xff]  ;;  %v162_v29 = vld [vmem:[%s509_s2 + $0x10] sm:$0xff]  ;;  %v219_v33 = vld [vmem:[%s510_s3 + $0x18] sm:$0xff] }
   0xc   :  { %118 = vmatpush.msra.mxu2 %v40_v7  ;;  %173 = vmatpush.msrb.mxu1 %v41_v5  ;;  %v218_v30 = vld [vmem:[%s510_s3 + $0x10] sm:$0xff]  ;;  %v317_v60 = vld [vmem:[%s511_s5] ss:$0 sm:$0xff] }
   0xd   :  { %227 = vmatpush.msra.mxu3 %v43_v2  ;;  %63 = vmatpush.msra.mxu0 %v39_v8  ;;  %v318_v2 = vld [vmem:[%s512_s6] ss:$0 sm:$0xff] }
   0xe   :  { %119 = vmatpush.msra.mxu2 %v39_v8  ;;  %174 = vmatpush.msrb.mxu1 %v40_v7 }
   0xf   :  { %228 = vmatpush.msra.mxu3 %v42_v4  ;;  %64 = vmatpush.msra.mxu0 %v38_v9 }
  0x10   :  { %120 = vmatpush.msra.mxu2 %v38_v9  ;;  %175 = vmatpush.msrb.mxu1 %v39_v8 }
  0x11   :  { %229 = vmatpush.msra.mxu3 %v41_v5  ;;  %65 = vmatpush.msra.mxu0 %v37_v10  ;;  %v319_v5 = vld [vmem:[%s513_s7] ss:$0 sm:$0xff] }
  0x12   :  { %121 = vmatpush.msra.mxu2 %v37_v10  ;;  %176 = vmatpush.msrb.mxu1 %v38_v9 }
  0x13   :  { %230 = vmatpush.msra.mxu3 %v40_v7  ;;  %66 = vmatpush.msra.mxu0 %v36_v11 }
  0x14   :  { %122 = vmatpush.msra.mxu2 %v36_v11  ;;  %177 = vmatpush.msrb.mxu1 %v37_v10 }
  0x15   :  { %231 = vmatpush.msra.mxu3 %v39_v8  ;;  %67 = vmatpush.msra.mxu0 %v35_v12 }
  0x16   :  { %305 = vmatmul.msk.f32.vlgmr.msra.gmra.mxu1 %vm51_vm0, %v48_v13  ;;  %123 = vmatpush.msra.mxu2 %v35_v12 }
  0x17   :  { %232 = vmatpush.msra.mxu3 %v38_v9  ;;  %178 = vmatpush.msrb.mxu1 %v36_v11 }
  0x18   :  { %68 = vmatpush.msra.mxu0 %v34_v14  ;;  %124 = vmatpush.msra.mxu2 %v34_v14 }
  0x19   :  { %233 = vmatpush.msra.mxu3 %v37_v10  ;;  %179 = vmatpush.msrb.mxu1 %v35_v12 }
  0x1a   :  { %309 = vmatmul.msk.f32.vlgmr.msrb.gmra.mxu3 %vm51_vm0, %v161_v15  ;;  %69 = vmatpush.msra.mxu0 %v33_v16 }
  0x1b   :  { %125 = vmatpush.msra.mxu2 %v33_v16  ;;  %234 = vmatpush.msra.mxu3 %v36_v11 }
  0x1c   :  { %180 = vmatpush.msrb.mxu1 %v34_v14  ;;  %70 = vmatpush.msra.mxu0 %v32_v17 }
  0x1d   :  { %126 = vmatpush.msra.mxu2 %v32_v17  ;;  %235 = vmatpush.msra.mxu3 %v35_v12 }
  0x1e   :  { %181 = vmatpush.msrb.mxu1 %v33_v16  ;;  %71 = vmatpush.msra.mxu0 %v31_v18 }
  0x1f   :  { %306 = vmatmul.msk.f32.gmra.mxu1 %vm51_vm0, %v50_v19  ;;  %127 = vmatpush.msra.mxu2 %v31_v18 }
  0x20   :  { %236 = vmatpush.msra.mxu3 %v34_v14  ;;  %182 = vmatpush.msrb.mxu1 %v32_v17 }
  0x21   :  { %72 = vmatpush.msra.mxu0 %v30_v20  ;;  %128 = vmatpush.msra.mxu2 %v30_v20 }
  0x22   :  { %237 = vmatpush.msra.mxu3 %v33_v16  ;;  %183 = vmatpush.msrb.mxu1 %v31_v18 }
  0x23   :  { %310 = vmatmul.msk.f32.gmra.mxu3 %vm51_vm0, %v163_v21  ;;  %73 = vmatpush.msra.mxu0 %v29_v22 }
  0x24   :  { %129 = vmatpush.msra.mxu2 %v29_v22  ;;  %238 = vmatpush.msra.mxu3 %v32_v17 }
  0x25   :  { %74 = vmatmul.f32.vlgmr.msra.gmra.mxu0 %v47_v23  ;;  %130 = vmatmul.f32.vlgmr.msra.gmra.mxu2 %v104_v24 }
  0x26   :  { %151 = vmatpush.msrb.mxu2 %v371_v1  ;;  %184 = vmatpush.msrb.mxu1 %v30_v20 }
  0x27   :  { %239 = vmatpush.msra.mxu3 %v31_v18  ;;  %263 = vmatpush.msrb.mxu0 %v371_v1 }
  0x28   :  { %185 = vmatpush.msrb.mxu1 %v29_v22  ;;  %152 = vmatpush.msrb.mxu2 %v380_v3 }
  0x29   :  { %186 = vmatmul.f32.vlgmr.msrb.gmra.mxu1 %v160_v25  ;;  %240 = vmatpush.msra.mxu3 %v30_v20 }
  0x2a   :  { %315 = vmatpush.msra.mxu1 %v371_v1  ;;  %264 = vmatpush.msrb.mxu0 %v380_v3 }
  0x2b   :  { %241 = vmatpush.msra.mxu3 %v29_v22 }
  0x2c   :  { %242 = vmatmul.f32.vlgmr.msra.gmra.mxu3 %v216_v26  ;;  %316 = vmatpush.msra.mxu1 %v380_v3 }
  0x2d   :  { %77 = vmatmul.f32.gmra.mxu0 %v49_v27  ;;  %133 = vmatmul.f32.gmra.mxu2 %v106_v28 }
  0x31   :  { %189 = vmatmul.f32.gmra.mxu1 %v162_v29 }
  0x34   :  { %245 = vmatmul.f32.gmra.mxu3 %v218_v30 }
  0x35   :  { %307 = vmatmul.msk.f32.vlgmr.msrb.gmra.mxu2 %vm51_vm0, %v105_v31  ;;  %311 = vmatmul.msk.f32.vlgmr.msrb.gmra.mxu0 %vm51_vm0, %v217_v32 }
  0x39   :  { %312 = vmatmul.msk.f32.vlgmr.msra.gmra.mxu1 %vm51_vm0, %v219_v33 }
  0x8d   :  { %v157_v35 = vpop.f32.mrf.mxu3 }
  0x93   :  { %v98_v34 = vpop.f32.mrf.mxu1 }
  0x9c   :  { %v101_v36 = vpop.f32.mrf.mxu1 }
  0x9d   :  { %v210_v37 = vpop.f32.mrf.mxu3 }
  0xa2   :  { %v75_v38 = vpop.f32.mrf.mxu0 }
  0xa3   :  { %v99_v55 = vadd.f32 %v98_v34, %v75_v38 }
  0xa6   :  { %v187_v39 = vpop.f32.mrf.mxu1  ;;  %v213_v40 = vpop.f32.mrf.mxu3 }
  0xa7   :  { %v211_v56 = vadd.f32 %v210_v37, %v187_v39 }
  0xa8   :  { %v131_v41 = vpop.f32.mrf.mxu2 }
  0xaa   :  { %v78_v42 = vpop.f32.mrf.mxu0 }
  0xab   :  { %v102_v51 = vadd.f32 %v101_v36, %v78_v42 }
  0xae   :  { %v190_v43 = vpop.f32.mrf.mxu1 }
  0xaf   :  { %v243_v44 = vpop.f32.mrf.mxu3  ;;  %v214_v52 = vadd.f32 %v213_v40, %v190_v43 }
  0xb0   :  { %v134_v45 = vpop.f32.mrf.mxu2 }
  0xb1   :  { %v158_v47 = vadd.f32 %v157_v35, %v134_v45 }
  0xb2   :  { %v266_v46 = vpop.f32.mrf.mxu0 }
  0xb3   :  { %v267_v49 = vadd.f32 %v266_v46, %v243_v44  ;;  %v273_v58 = vmax.f32 %v102_v51, %v158_v47 }
  0xb5   :  { %v274_v61 = vmax.f32 %v211_v56, %v267_v49 }
  0xb6   :  { %v269_v48 = vpop.f32.mrf.mxu1 }
  0xb7   :  { %v246_v50 = vpop.f32.mrf.mxu3 }
  0xb8   :  { %v270_v53 = vadd.f32 %v269_v48, %v246_v50  ;;  %v154_v54 = vpop.f32.mrf.mxu2 }
  0xb9   :  { %v155_v57 = vadd.f32 %v154_v54, %v131_v41 }
  0xba   :  { %v275_v59 = vmax.f32 %v214_v52, %v270_v53 }
  0xbb   :  { %v272_v62 = vmax.f32 %v99_v55, %v155_v57 }
  0xbc   :  { %v277_v63 = vmax.f32 %v273_v58, %v275_v59 }
  0xbd   :  { %v276_v0 = vmax.f32 %v272_v62, %v274_v61 }
  0xbe   :  { %v283_v1 = vadd.f32 %v317_v60, %v277_v63 }
  0xbf   :  { %v282_v3 = vadd.f32 %v317_v60, %v276_v0 }
  0xc0   :  { %v285_v4 = vmax.f32 %v283_v1, 0.0 }
  0xc1   :  { %v284_v6 = vmax.f32 %v282_v3, 0.0 }
  0xc2   :  { %v291_v7 = vmul.f32 %v318_v2, %v285_v4 }
  0xc3   :  { %v290_v8 = vmul.f32 %v318_v2, %v284_v6 }
  0xc4   :  { %v297_v9 = vadd.f32 %v319_v5, %v291_v7 }
  0xc5   :  { %v296_v10 = vadd.f32 %v319_v5, %v290_v8 }
  0xc6   :  { %300 = vst.msk [vmem:[%s514_s8 + $0x8] sm:$0xff] %vm298_vm1, %v297_v9 }
  0xc7   :  { %299 = vst.msk [vmem:[%s514_s8] sm:$0xff] %vm298_vm1, %v296_v10 }

// kernel: siamese_share_forward.3
= control target key start
LH: loop header
LB: loop body
LE: loop exit
PB: predicated region body
PF: predicated region fallthrough
CT: control target
= control target key end

     0   :  { %vm158_vm0 = vcmask 1043456   ;;  %vm82_vm1 = vcmask 31744   ;;  %vm4336_vm2 = vcmask 130048   ;;  %vm4361_vm3 = vcmask 125952   ;;  %s8444_s9 = inlined_call_operand.vmem [shape: f32[4,4], index: 9, kind: input, shape index: {}]   ;;  %s8445_s0 = inlined_call_operand.vmem [shape: f32[196,4], index: 0, kind: input, shape index: {}]   ;;  %s8446_s10 = inlined_call_operand.vmem [shape: f32[1,4], index: 10, kind: input, shape index: {}]   ;;  %s8447_s3 = inlined_call_operand.vmem [shape: f32[196,4], index: 3, kind: input, shape index: {}]   ;;  %s8448_s1 = inlined_call_operand.vmem [shape: f32[196,4], index: 1, kind: input, shape index: {}]   ;;  %s8449_s4 = inlined_call_operand.vmem [shape: f32[196,4], index: 4, kind: input, shape index: {}]   ;;  %s8450_s2 = inlined_call_operand.vmem [shape: f32[196,4], index: 2, kind: input, shape index: {}]   ;;  %s8451_s11 = inlined_call_operand.vmem [shape: f32[16,16], index: 11, kind: input, shape index: {}]   ;;  %s8452_s7 = inlined_call_operand.vmem [shape: f32[196,4], index: 7, kind: input, shape index: {}]   ;;  %s8453_s5 = inlined_call_operand.vmem [shape: f32[196,4], index: 5, kind: input, shape index: {}]   ;;  %s8454_s8 = inlined_call_operand.vmem [shape: f32[196,4], index: 8, kind: input, shape index: {}]   ;;  %s8455_s6 = inlined_call_operand.vmem [shape: f32[196,4], index: 6, kind: input, shape index: {}]   ;;  %s8456_s12 = inlined_call_operand.vmem [shape: f32[1,16], index: 12, kind: input, shape index: {}]   ;;  %s8457_s13 = inlined_call_operand.vmem [shape: f32[1,16], index: 13, kind: input, shape index: {}]   ;;  %s8458_s14 = inlined_call_operand.vmem [shape: f32[1,16], index: 14, kind: input, shape index: {}]   ;;  %s8459_s15 = inlined_call_operand.vmem [shape: f32[196,16], index: 15, kind: output, shape index: {}]  }
   0x1   :  { %v50_v0 = vld [vmem:[%s8444_s9] sm:$0xf]  ;;  %v61_v2 = vld [vmem:[%s8445_s0 + $0x38] sm:$0xff]  ;;  %v68_v3 = vld [vmem:[%s8445_s0 + $0x70] sm:$0xff] }
   0x2   :  { %v54_v1 = vld [vmem:[%s8445_s0] sm:$0xff]  ;;  %4367 = vmatpush.msk.msra.mxu0 %vm158_vm0, %v50_v0  ;;  %5017 = vmatpush.msk.msra.mxu1 %vm158_vm0, %v50_v0  ;;  %v75_v4 = vld [vmem:[%s8445_s0 + $0xa8] sm:$0xff]  ;;  %v69_v7 = vld [vmem:[%s8445_s0 + $0x78] sm:$0xff] }
   0x3   :  { %5018 = vmatpush.msk.msra.mxu2 %vm158_vm0, %v50_v0  ;;  %5019 = vmatpush.msk.msra.mxu3 %vm158_vm0, %v50_v0  ;;  %v55_v5 = vld [vmem:[%s8445_s0 + $0x8] sm:$0xff]  ;;  %v62_v6 = vld [vmem:[%s8445_s0 + $0x40] sm:$0xff]  ;;  %v76_v8 = vld [vmem:[%s8445_s0 + $0xb0] sm:$0xff] }
   0x4   :  { %4368 = vmatmul.msk.f32.vlgmr.msra.gmra.mxu0 %vm82_vm1, %v54_v1  ;;  %4375 = vmatmul.msk.f32.vlgmr.msra.gmra.mxu1 %vm82_vm1, %v61_v2  ;;  %v56_v9 = vld [vmem:[%s8445_s0 + $0x10] sm:$0xff]  ;;  %v63_v10 = vld [vmem:[%s8445_s0 + $0x48] sm:$0xff]  ;;  %v70_v11 = vld [vmem:[%s8445_s0 + $0x80] sm:$0xff] }
   0x5   :  { %4382 = vmatmul.msk.f32.vlgmr.msra.gmra.mxu2 %vm82_vm1, %v68_v3  ;;  %4389 = vmatmul.msk.f32.vlgmr.msra.gmra.mxu3 %vm82_vm1, %v75_v4  ;;  %v77_v12 = vld [vmem:[%s8445_s0 + $0xb8] sm:$0xff]  ;;  %v64_v14 = vld [vmem:[%s8445_s0 + $0x50] sm:$0xff]  ;;  %v71_v15 = vld [vmem:[%s8445_s0 + $0x88] sm:$0xff] }
   0x6   :  { %4419 = vmatpush.msk.msrb.mxu2 %vm158_vm0, %v50_v0  ;;  %4393 = vmatpush.msk.msrb.mxu1 %vm158_vm0, %v50_v0  ;;  %v57_v13 = vld [vmem:[%s8445_s0 + $0x18] sm:$0xff]  ;;  %v78_v16 = vld [vmem:[%s8445_s0 + $0xc0] sm:$0xf]  ;;  %v72_v19 = vld [vmem:[%s8445_s0 + $0x90] sm:$0xff] }
   0x7   :  { %4471 = vmatpush.msk.msrb.mxu0 %vm158_vm0, %v50_v0  ;;  %4445 = vmatpush.msk.msrb.mxu3 %vm158_vm0, %v50_v0  ;;  %v58_v17 = vld [vmem:[%s8445_s0 + $0x20] sm:$0xff]  ;;  %v65_v18 = vld [vmem:[%s8445_s0 + $0x58] sm:$0xff]  ;;  %v59_v21 = vld [vmem:[%s8445_s0 + $0x28] sm:$0xff] }
   0x8   :  { %4523 = vmatpush.msk.msra.mxu2 %vm158_vm0, %v50_v0  ;;  %4497 = vmatpush.msk.msra.mxu1 %vm158_vm0, %v50_v0  ;;  %v638_v20 = vld [vmem:[%s8447_s3] sm:$0xff]  ;;  %v73_v23 = vld [vmem:[%s8445_s0 + $0x98] sm:$0xff]  ;;  %v639_v24 = vld [vmem:[%s8447_s3 + $0x8] sm:$0xff] }
   0x9   :  { %4549 = vmatpush.msk.msra.mxu3 %vm158_vm0, %v50_v0  ;;  %4575 = vmatpush.msk.msra.mxu0 %vm158_vm0, %v50_v0  ;;  %v66_v22 = vld [vmem:[%s8445_s0 + $0x60] sm:$0xff]  ;;  %v60_v25 = vld [vmem:[%s8445_s0 + $0x30] sm:$0xff]  ;;  %v67_v26 = vld [vmem:[%s8445_s0 + $0x68] sm:$0xff] }
   0xa   :  { %v74_v27 = vld [vmem:[%s8445_s0 + $0xa0] sm:$0xff]  ;;  %v640_v28 = vld [vmem:[%s8447_s3 + $0x10] sm:$0xff]  ;;  %v641_v32 = vld [vmem:[%s8447_s3 + $0x18] sm:$0xff] }
   0xb   :  { %v254_v29 = vld [vmem:[%s8448_s1] sm:$0xff]  ;;  %v255_v33 = vld [vmem:[%s8448_s1 + $0x8] sm:$0xff]  ;;  %v256_v37 = vld [vmem:[%s8448_s1 + $0x10] sm:$0xff] }
   0xc   :  { %4369 = vmatmul.msk.f32.gmra.mxu0 %vm82_vm1, %v55_v5  ;;  %4376 = vmatmul.msk.f32.gmra.mxu1 %vm82_vm1, %v62_v6  ;;  %v830_v30 = vld [vmem:[%s8449_s4] sm:$0xff]  ;;  %v831_v34 = vld [vmem:[%s8449_s4 + $0x8] sm:$0xff]  ;;  %v832_v38 = vld [vmem:[%s8449_s4 + $0x10] sm:$0xff] }
   0xd   :  { %4383 = vmatmul.msk.f32.gmra.mxu2 %vm82_vm1, %v69_v7  ;;  %4390 = vmatmul.msk.f32.gmra.mxu3 %vm82_vm1, %v76_v8  ;;  %v446_v31 = vld [vmem:[%s8450_s2] sm:$0xff]  ;;  %v447_v35 = vld [vmem:[%s8450_s2 + $0x8] sm:$0xff]  ;;  %v448_v39 = vld [vmem:[%s8450_s2 + $0x10] sm:$0xff] }
   0xe   :  { %v642_v36 = vld [vmem:[%s8447_s3 + $0x20] sm:$0xff]  ;;  %v643_v40 = vld [vmem:[%s8447_s3 + $0x28] sm:$0xff]  ;;  %v257_v41 = vld [vmem:[%s8448_s1 + $0x18] sm:$0xff] }
   0xf   :  { %v833_v42 = vld [vmem:[%s8449_s4 + $0x18] sm:$0xff]  ;;  %v644_v44 = vld [vmem:[%s8447_s3 + $0x30] sm:$0xff]  ;;  %v258_v45 = vld [vmem:[%s8448_s1 + $0x20] sm:$0xff] }
  0x10   :  { %v449_v43 = vld [vmem:[%s8450_s2 + $0x18] sm:$0xff]  ;;  %v834_v46 = vld [vmem:[%s8449_s4 + $0x20] sm:$0xff]  ;;  %v259_v49 = vld [vmem:[%s8448_s1 + $0x28] sm:$0xff] }
  0x11   :  { %v450_v47 = vld [vmem:[%s8450_s2 + $0x20] sm:$0xff]  ;;  %v645_v48 = vld [vmem:[%s8447_s3 + $0x38] sm:$0xff]  ;;  %v835_v50 = vld [vmem:[%s8449_s4 + $0x28] sm:$0xff] }
  0x12   :  { %v451_v51 = vld [vmem:[%s8450_s2 + $0x28] sm:$0xff]  ;;  %v646_v52 = vld [vmem:[%s8447_s3 + $0x40] sm:$0xff]  ;;  %v260_v53 = vld [vmem:[%s8448_s1 + $0x30] sm:$0xff] }
  0x13   :  { %v836_v54 = vld [vmem:[%s8449_s4 + $0x30] sm:$0xff]  ;;  %v647_v56 = vld [vmem:[%s8447_s3 + $0x48] sm:$0xff]  ;;  %v261_v57 = vld [vmem:[%s8448_s1 + $0x38] sm:$0xff] }
  0x14   :  { %4370 = vmatmul.msk.f32.gmra.mxu0 %vm82_vm1, %v56_v9  ;;  %4377 = vmatmul.msk.f32.gmra.mxu1 %vm82_vm1, %v63_v10  ;;  %v452_v55 = vld [vmem:[%s8450_s2 + $0x30] sm:$0xff]  ;;  %v837_v58 = vld [vmem:[%s8449_s4 + $0x38] sm:$0xff]  ;;  %v262_v61 = vld [vmem:[%s8448_s1 + $0x40] sm:$0xff] }
  0x15   :  { %4384 = vmatmul.msk.f32.gmra.mxu2 %vm82_vm1, %v70_v11  ;;  %4391 = vmatmul.msk.f32.gmra.mxu3 %vm82_vm1, %v77_v12  ;;  %v453_v59 = vld [vmem:[%s8450_s2 + $0x38] sm:$0xff]  ;;  %v648_v60 = vld [vmem:[%s8447_s3 + $0x50] sm:$0xff]  ;;  %v838_v62 = vld [vmem:[%s8449_s4 + $0x40] sm:$0xff] }
  0x16   :  { %v454_v63 = vld [vmem:[%s8450_s2 + $0x40] sm:$0xff]  ;;  %v649_v0 = vld [vmem:[%s8447_s3 + $0x58] sm:$0xff]  ;;  %v263_v3 = vld [vmem:[%s8448_s1 + $0x48] sm:$0xff] }
  0x17   :  { %v839_v4 = vld [vmem:[%s8449_s4 + $0x48] sm:$0xff]  ;;  %v650_v6 = vld [vmem:[%s8447_s3 + $0x60] sm:$0xff]  ;;  %v264_v11 = vld [vmem:[%s8448_s1 + $0x50] sm:$0xff] }
  0x18   :  { %v455_v5 = vld [vmem:[%s8450_s2 + $0x48] sm:$0xff]  ;;  %v840_v12 = vld [vmem:[%s8449_s4 + $0x50] sm:$0xff] }
  0x1c   :  { %4371 = vmatmul.msk.f32.gmra.mxu0 %vm82_vm1, %v57_v13  ;;  %4378 = vmatmul.msk.f32.gmra.mxu1 %vm82_vm1, %v64_v14  ;;  %v456_v13 = vld [vmem:[%s8450_s2 + $0x50] sm:$0xff]  ;;  %v651_v14 = vld [vmem:[%s8447_s3 + $0x68] sm:$0xff] }
  0x1d   :  { %4385 = vmatmul.msk.f32.gmra.mxu2 %vm82_vm1, %v71_v15  ;;  %4392 = vmatmul.msk.f32.gmra.mxu3 %vm82_vm1, %v78_v16 }
  0x24   :  { %4372 = vmatmul.msk.f32.gmra.mxu0 %vm82_vm1, %v58_v17  ;;  %4379 = vmatmul.msk.f32.gmra.mxu1 %vm82_vm1, %v65_v18 }
  0x25   :  { %4386 = vmatmul.msk.f32.gmra.mxu2 %vm82_vm1, %v72_v19  ;;  %4446 = vmatmul.msk.f32.vlgmr.msrb.gmra.mxu3 %vm82_vm1, %v638_v20  ;;  %v265_v19 = vld [vmem:[%s8448_s1 + $0x58] sm:$0xff] }
  0x26   :  { %v841_v20 = vld [vmem:[%s8449_s4 + $0x58] sm:$0xff] }
  0x2c   :  { %4373 = vmatmul.msk.f32.gmra.mxu0 %vm82_vm1, %v59_v21  ;;  %4380 = vmatmul.msk.f32.gmra.mxu1 %vm82_vm1, %v66_v22  ;;  %v457_v21 = vld [vmem:[%s8450_s2 + $0x58] sm:$0xff]  ;;  %v652_v22 = vld [vmem:[%s8447_s3 + $0x70] sm:$0xff] }
  0x2d   :  { %4387 = vmatmul.msk.f32.gmra.mxu2 %vm82_vm1, %v73_v23  ;;  %4447 = vmatmul.msk.f32.gmra.mxu3 %vm82_vm1, %v639_v24 }
  0x34   :  { %4374 = vmatmul.msk.f32.gmra.mxu0 %vm82_vm1, %v60_v25  ;;  %4381 = vmatmul.msk.f32.gmra.mxu1 %vm82_vm1, %v67_v26 }
  0x35   :  { %4388 = vmatmul.msk.f32.gmra.mxu2 %vm82_vm1, %v74_v27  ;;  %4448 = vmatmul.msk.f32.gmra.mxu3 %vm82_vm1, %v640_v28  ;;  %v266_v27 = vld [vmem:[%s8448_s1 + $0x60] sm:$0xff] }
  0x36   :  { %v842_v28 = vld [vmem:[%s8449_s4 + $0x60] sm:$0xff] }
  0x3c   :  { %4394 = vmatmul.msk.f32.vlgmr.msrb.gmra.mxu1 %vm82_vm1, %v254_v29  ;;  %4472 = vmatmul.msk.f32.vlgmr.msrb.gmra.mxu0 %vm82_vm1, %v830_v30  ;;  %v458_v29 = vld [vmem:[%s8450_s2 + $0x60] sm:$0xff]  ;;  %v653_v30 = vld [vmem:[%s8447_s3 + $0x78] sm:$0xff] }
  0x3d   :  { %4420 = vmatmul.msk.f32.vlgmr.msrb.gmra.mxu2 %vm82_vm1, %v446_v31  ;;  %4449 = vmatmul.msk.f32.gmra.mxu3 %vm82_vm1, %v641_v32 }
  0x44   :  { %4395 = vmatmul.msk.f32.gmra.mxu1 %vm82_vm1, %v255_v33  ;;  %4473 = vmatmul.msk.f32.gmra.mxu0 %vm82_vm1, %v831_v34 }
  0x45   :  { %4421 = vmatmul.msk.f32.gmra.mxu2 %vm82_vm1, %v447_v35  ;;  %4450 = vmatmul.msk.f32.gmra.mxu3 %vm82_vm1, %v642_v36  ;;  %v267_v35 = vld [vmem:[%s8448_s1 + $0x68] sm:$0xff] }
  0x46   :  { %v843_v36 = vld [vmem:[%s8449_s4 + $0x68] sm:$0xff] }
  0x4c   :  { %4396 = vmatmul.msk.f32.gmra.mxu1 %vm82_vm1, %v256_v37  ;;  %4474 = vmatmul.msk.f32.gmra.mxu0 %vm82_vm1, %v832_v38  ;;  %v459_v37 = vld [vmem:[%s8450_s2 + $0x68] sm:$0xff]  ;;  %v654_v38 = vld [vmem:[%s8447_s3 + $0x80] sm:$0xff] }
  0x4d   :  { %4422 = vmatmul.msk.f32.gmra.mxu2 %vm82_vm1, %v448_v39  ;;  %4451 = vmatmul.msk.f32.gmra.mxu3 %vm82_vm1, %v643_v40 }
  0x54   :  { %4397 = vmatmul.msk.f32.gmra.mxu1 %vm82_vm1, %v257_v41  ;;  %4475 = vmatmul.msk.f32.gmra.mxu0 %vm82_vm1, %v833_v42 }
  0x55   :  { %4423 = vmatmul.msk.f32.gmra.mxu2 %vm82_vm1, %v449_v43  ;;  %4452 = vmatmul.msk.f32.gmra.mxu3 %vm82_vm1, %v644_v44  ;;  %v268_v43 = vld [vmem:[%s8448_s1 + $0x70] sm:$0xff] }
  0x56   :  { %v844_v44 = vld [vmem:[%s8449_s4 + $0x70] sm:$0xff] }
  0x5c   :  { %4398 = vmatmul.msk.f32.gmra.mxu1 %vm82_vm1, %v258_v45  ;;  %4476 = vmatmul.msk.f32.gmra.mxu0 %vm82_vm1, %v834_v46  ;;  %v460_v45 = vld [vmem:[%s8450_s2 + $0x70] sm:$0xff]  ;;  %v655_v46 = vld [vmem:[%s8447_s3 + $0x88] sm:$0xff] }
  0x5d   :  { %4424 = vmatmul.msk.f32.gmra.mxu2 %vm82_vm1, %v450_v47  ;;  %4453 = vmatmul.msk.f32.gmra.mxu3 %vm82_vm1, %v645_v48 }
  0x64   :  { %4399 = vmatmul.msk.f32.gmra.mxu1 %vm82_vm1, %v259_v49  ;;  %4477 = vmatmul.msk.f32.gmra.mxu0 %vm82_vm1, %v835_v50 }
  0x65   :  { %4425 = vmatmul.msk.f32.gmra.mxu2 %vm82_vm1, %v451_v51  ;;  %4454 = vmatmul.msk.f32.gmra.mxu3 %vm82_vm1, %v646_v52  ;;  %v269_v51 = vld [vmem:[%s8448_s1 + $0x78] sm:$0xff] }
  0x66   :  { %v845_v52 = vld [vmem:[%s8449_s4 + $0x78] sm:$0xff] }
  0x6c   :  { %4400 = vmatmul.msk.f32.gmra.mxu1 %vm82_vm1, %v260_v53  ;;  %4478 = vmatmul.msk.f32.gmra.mxu0 %vm82_vm1, %v836_v54  ;;  %v461_v53 = vld [vmem:[%s8450_s2 + $0x78] sm:$0xff]  ;;  %v656_v54 = vld [vmem:[%s8447_s3 + $0x90] sm:$0xff] }
  0x6d   :  { %4426 = vmatmul.msk.f32.gmra.mxu2 %vm82_vm1, %v452_v55  ;;  %4455 = vmatmul.msk.f32.gmra.mxu3 %vm82_vm1, %v647_v56 }
  0x74   :  { %4401 = vmatmul.msk.f32.gmra.mxu1 %vm82_vm1, %v261_v57  ;;  %4479 = vmatmul.msk.f32.gmra.mxu0 %vm82_vm1, %v837_v58 }
  0x75   :  { %4427 = vmatmul.msk.f32.gmra.mxu2 %vm82_vm1, %v453_v59  ;;  %4456 = vmatmul.msk.f32.gmra.mxu3 %vm82_vm1, %v648_v60  ;;  %v270_v59 = vld [vmem:[%s8448_s1 + $0x80] sm:$0xff] }
  0x76   :  { %v846_v60 = vld [vmem:[%s8449_s4 + $0x80] sm:$0xff] }
  0x7c   :  { %4402 = vmatmul.msk.f32.gmra.mxu1 %vm82_vm1, %v262_v61  ;;  %4480 = vmatmul.msk.f32.gmra.mxu0 %vm82_vm1, %v838_v62  ;;  %v462_v61 = vld [vmem:[%s8450_s2 + $0x80] sm:$0xff]  ;;  %v657_v62 = vld [vmem:[%s8447_s3 + $0x98] sm:$0xff] }
  0x7d   :  { %4428 = vmatmul.msk.f32.gmra.mxu2 %vm82_vm1, %v454_v63  ;;  %4457 = vmatmul.msk.f32.gmra.mxu3 %vm82_vm1, %v649_v0 }
  0x81   :  { %v5379_v1 = vpop.f32.mrf.mxu0  ;;  %v5381_v2 = vpop.f32.mrf.mxu1 }
  0x84   :  { %4403 = vmatmul.msk.f32.gmra.mxu1 %vm82_vm1, %v263_v3  ;;  %4481 = vmatmul.msk.f32.gmra.mxu0 %vm82_vm1, %v839_v4 }
  0x85   :  { %4429 = vmatmul.msk.f32.gmra.mxu2 %vm82_vm1, %v455_v5  ;;  %4458 = vmatmul.msk.f32.gmra.mxu3 %vm82_vm1, %v650_v6  ;;  %v271_v5 = vld [vmem:[%s8448_s1 + $0x88] sm:$0xff] }
  0x86   :  { %v847_v6 = vld [vmem:[%s8449_s4 + $0x88] sm:$0xff] }
  0x88   :  { %v5399_v7 = vpop.f32.mrf.mxu2  ;;  %v5401_v8 = vpop.f32.mrf.mxu3 }
  0x89   :  { %8589 = vst [vmem:[#allocation2_spill] sm:$0xff] %v5399_v7  ;;  %v5403_v9 = vpop.f32.mrf.mxu0  ;;  %v5405_v10 = vpop.f32.mrf.mxu1 }
  0x8a   :  { %8590 = vst [vmem:[#allocation3_spill] sm:$0xff] %v5401_v8  ;;  %v1215_v8 = vld [vmem:[%s8455_s6 + $0x8] sm:$0xff] }
  0x8c   :  { %4404 = vmatmul.msk.f32.gmra.mxu1 %vm82_vm1, %v264_v11  ;;  %4482 = vmatmul.msk.f32.gmra.mxu0 %vm82_vm1, %v840_v12  ;;  %v463_v11 = vld [vmem:[%s8450_s2 + $0x88] sm:$0xff]  ;;  %v658_v12 = vld [vmem:[%s8447_s3 + $0xa0] sm:$0xff] }
  0x8d   :  { %4430 = vmatmul.msk.f32.gmra.mxu2 %vm82_vm1, %v456_v13  ;;  %4459 = vmatmul.msk.f32.gmra.mxu3 %vm82_vm1, %v651_v14 }
  0x90   :  { %v5423_v15 = vpop.f32.mrf.mxu2  ;;  %v5425_v16 = vpop.f32.mrf.mxu3 }
  0x91   :  { %8591 = vst [vmem:[#allocation4_spill] sm:$0xff] %v5423_v15  ;;  %v5427_v17 = vpop.f32.mrf.mxu0  ;;  %v5429_v18 = vpop.f32.mrf.mxu1 }
  0x92   :  { %8592 = vst [vmem:[#allocation5_spill] sm:$0xff] %v5425_v16  ;;  %v1022_v16 = vld [vmem:[%s8453_s5] sm:$0xff] }
  0x94   :  { %4405 = vmatmul.msk.f32.gmra.mxu1 %vm82_vm1, %v265_v19  ;;  %4483 = vmatmul.msk.f32.gmra.mxu0 %vm82_vm1, %v841_v20 }
  0x95   :  { %4431 = vmatmul.msk.f32.gmra.mxu2 %vm82_vm1, %v457_v21  ;;  %4460 = vmatmul.msk.f32.gmra.mxu3 %vm82_vm1, %v652_v22  ;;  %v272_v21 = vld [vmem:[%s8448_s1 + $0x90] sm:$0xff] }
  0x96   :  { %v848_v22 = vld [vmem:[%s8449_s4 + $0x90] sm:$0xff] }
  0x98   :  { %v5447_v23 = vpop.f32.mrf.mxu2  ;;  %v5449_v24 = vpop.f32.mrf.mxu3 }
  0x99   :  { %8593 = vst [vmem:[#allocation6_spill] sm:$0xff] %v5447_v23  ;;  %v5451_v25 = vpop.f32.mrf.mxu0  ;;  %v5453_v26 = vpop.f32.mrf.mxu1  ;;  %v1024_v23 = vld [vmem:[%s8453_s5 + $0x10] sm:$0xff] }
  0x9a   :  { %8594 = vst [vmem:[#allocation7_spill] sm:$0xff] %v5449_v24 }
  0x9c   :  { %4406 = vmatmul.msk.f32.gmra.mxu1 %vm82_vm1, %v266_v27  ;;  %4484 = vmatmul.msk.f32.gmra.mxu0 %vm82_vm1, %v842_v28  ;;  %v464_v27 = vld [vmem:[%s8450_s2 + $0x90] sm:$0xff]  ;;  %v659_v28 = vld [vmem:[%s8447_s3 + $0xa8] sm:$0xff] }
  0x9d   :  { %4432 = vmatmul.msk.f32.gmra.mxu2 %vm82_vm1, %v458_v29  ;;  %4461 = vmatmul.msk.f32.gmra.mxu3 %vm82_vm1, %v653_v30 }
  0xa0   :  { %v5471_v31 = vpop.f32.mrf.mxu2  ;;  %v5473_v32 = vpop.f32.mrf.mxu3 }
  0xa1   :  { %8595 = vst [vmem:[#allocation8_spill] sm:$0xff] %v5471_v31  ;;  %v5475_v33 = vpop.f32.mrf.mxu0  ;;  %v5477_v34 = vpop.f32.mrf.mxu1 }
  0xa2   :  { %8596 = vst [vmem:[#allocation9_spill] sm:$0xff] %v5473_v32 }
  0xa4   :  { %4407 = vmatmul.msk.f32.gmra.mxu1 %vm82_vm1, %v267_v35  ;;  %4485 = vmatmul.msk.f32.gmra.mxu0 %vm82_vm1, %v843_v36 }
  0xa5   :  { %4433 = vmatmul.msk.f32.gmra.mxu2 %vm82_vm1, %v459_v37  ;;  %4462 = vmatmul.msk.f32.gmra.mxu3 %vm82_vm1, %v654_v38  ;;  %v273_v37 = vld [vmem:[%s8448_s1 + $0x98] sm:$0xff] }
  0xa6   :  { %v849_v38 = vld [vmem:[%s8449_s4 + $0x98] sm:$0xff] }
  0xa8   :  { %v5495_v39 = vpop.f32.mrf.mxu2  ;;  %v5497_v40 = vpop.f32.mrf.mxu3 }
  0xa9   :  { %8597 = vst [vmem:[#allocation10_spill] sm:$0xff] %v5495_v39  ;;  %v5499_v41 = vpop.f32.mrf.mxu0  ;;  %v5501_v42 = vpop.f32.mrf.mxu1 }
  0xaa   :  { %8598 = vst [vmem:[#allocation11_spill] sm:$0xff] %v5501_v42 }
  0xac   :  { %4408 = vmatmul.msk.f32.gmra.mxu1 %vm82_vm1, %v268_v43  ;;  %4486 = vmatmul.msk.f32.gmra.mxu0 %vm82_vm1, %v844_v44  ;;  %v465_v43 = vld [vmem:[%s8450_s2 + $0x98] sm:$0xff]  ;;  %v660_v44 = vld [vmem:[%s8447_s3 + $0xb0] sm:$0xff] }
  0xad   :  { %4434 = vmatmul.msk.f32.gmra.mxu2 %vm82_vm1, %v460_v45  ;;  %4463 = vmatmul.msk.f32.gmra.mxu3 %vm82_vm1, %v655_v46 }
  0xb0   :  { %v5519_v47 = vpop.f32.mrf.mxu2  ;;  %v5521_v48 = vpop.f32.mrf.mxu3 }
  0xb1   :  { %8599 = vst [vmem:[#allocation12_spill] sm:$0xff] %v5519_v47  ;;  %v5523_v49 = vpop.f32.mrf.mxu0  ;;  %v5525_v50 = vpop.f32.mrf.mxu1 }
  0xb2   :  { %8600 = vst [vmem:[#allocation13_spill] sm:$0xff] %v5525_v50  ;;  %v1025_v50 = vld [vmem:[%s8453_s5 + $0x18] sm:$0xff] }
  0xb4   :  { %4409 = vmatmul.msk.f32.gmra.mxu1 %vm82_vm1, %v269_v51  ;;  %4487 = vmatmul.msk.f32.gmra.mxu0 %vm82_vm1, %v845_v52 }
  0xb5   :  { %4435 = vmatmul.msk.f32.gmra.mxu2 %vm82_vm1, %v461_v53  ;;  %4464 = vmatmul.msk.f32.gmra.mxu3 %vm82_vm1, %v656_v54  ;;  %v274_v53 = vld [vmem:[%s8448_s1 + $0xa0] sm:$0xff] }
  0xb6   :  { %v850_v54 = vld [vmem:[%s8449_s4 + $0xa0] sm:$0xff] }
  0xb8   :  { %v5543_v55 = vpop.f32.mrf.mxu2  ;;  %v5545_v56 = vpop.f32.mrf.mxu3 }
  0xb9   :  { %8601 = vst [vmem:[#allocation14_spill] sm:$0xff] %v5543_v55  ;;  %v5547_v57 = vpop.f32.mrf.mxu1  ;;  %v5549_v58 = vpop.f32.mrf.mxu0 }
  0xbc   :  { %4410 = vmatmul.msk.f32.gmra.mxu1 %vm82_vm1, %v270_v59  ;;  %4488 = vmatmul.msk.f32.gmra.mxu0 %vm82_vm1, %v846_v60  ;;  %v466_v59 = vld [vmem:[%s8450_s2 + $0xa0] sm:$0xff]  ;;  %v661_v60 = vld [vmem:[%s8447_s3 + $0xb8] sm:$0xff] }
  0xbd   :  { %4436 = vmatmul.msk.f32.gmra.mxu2 %vm82_vm1, %v462_v61  ;;  %4465 = vmatmul.msk.f32.gmra.mxu3 %vm82_vm1, %v657_v62 }
  0xc0   :  { %v5567_v63 = vpop.f32.mrf.mxu2  ;;  %v5569_v0 = vpop.f32.mrf.mxu3 }
  0xc1   :  { %8602 = vst [vmem:[#allocation15_spill] sm:$0xff] %v5567_v63  ;;  %v5571_v3 = vpop.f32.mrf.mxu1  ;;  %v5573_v4 = vpop.f32.mrf.mxu0  ;;  %v278_v63 = vld [vmem:[%s8448_s1 + $0xc0] sm:$0xf] }
  0xc4   :  { %4411 = vmatmul.msk.f32.gmra.mxu1 %vm82_vm1, %v271_v5  ;;  %4489 = vmatmul.msk.f32.gmra.mxu0 %vm82_vm1, %v847_v6 }
  0xc5   :  { %4437 = vmatmul.msk.f32.gmra.mxu2 %vm82_vm1, %v463_v11  ;;  %4466 = vmatmul.msk.f32.gmra.mxu3 %vm82_vm1, %v658_v12  ;;  %v275_v11 = vld [vmem:[%s8448_s1 + $0xa8] sm:$0xff] }
  0xc6   :  { %v851_v12 = vld [vmem:[%s8449_s4 + $0xa8] sm:$0xff] }
  0xc8   :  { %v5591_v13 = vpop.f32.mrf.mxu2  ;;  %v5593_v14 = vpop.f32.mrf.mxu3 }
  0xc9   :  { %8603 = vst [vmem:[#allocation16_spill] sm:$0xff] %v5591_v13  ;;  %v5595_v19 = vpop.f32.mrf.mxu1  ;;  %v5597_v20 = vpop.f32.mrf.mxu0 }
  0xcc   :  { %4412 = vmatmul.msk.f32.gmra.mxu1 %vm82_vm1, %v272_v21  ;;  %4490 = vmatmul.msk.f32.gmra.mxu0 %vm82_vm1, %v848_v22  ;;  %v467_v21 = vld [vmem:[%s8450_s2 + $0xa8] sm:$0xff]  ;;  %v662_v22 = vld [vmem:[%s8447_s3 + $0xc0] sm:$0xf] }
  0xcd   :  { %4438 = vmatmul.msk.f32.gmra.mxu2 %vm82_vm1, %v464_v27  ;;  %4467 = vmatmul.msk.f32.gmra.mxu3 %vm82_vm1, %v659_v28  ;;  %v5690_v27 = vld [vmem:[%s8451_s11] sm:$0xff]  ;;  %v5695_v28 = vld [vmem:[%s8451_s11 + $0x8] sm:$0xff] }
  0xce   :  { %4627 = vmatpush.msk.msrb.mxu2 %vm158_vm0, %v5690_v27  ;;  %4653 = vmatpush.msk.msrb.mxu3 %vm158_vm0, %v5695_v28 }
  0xd0   :  { %v5615_v29 = vpop.f32.mrf.mxu2  ;;  %v5617_v30 = vpop.f32.mrf.mxu3 }
  0xd1   :  { %8604 = vst [vmem:[#allocation17_spill] sm:$0xff] %v5615_v29  ;;  %v5619_v35 = vpop.f32.mrf.mxu1  ;;  %v5621_v36 = vpop.f32.mrf.mxu0 }
  0xd4   :  { %4413 = vmatmul.msk.f32.gmra.mxu1 %vm82_vm1, %v273_v37  ;;  %4491 = vmatmul.msk.f32.gmra.mxu0 %vm82_vm1, %v849_v38 }
  0xd5   :  { %4439 = vmatmul.msk.f32.gmra.mxu2 %vm82_vm1, %v465_v43  ;;  %4468 = vmatmul.msk.f32.gmra.mxu3 %vm82_vm1, %v660_v44 }
  0xd8   :  { %v5639_v45 = vpop.f32.mrf.mxu2  ;;  %v5641_v46 = vpop.f32.mrf.mxu3 }
  0xd9   :  { %8605 = vst [vmem:[#allocation18_spill] sm:$0xff] %v5639_v45  ;;  %v5643_v51 = vpop.f32.mrf.mxu1  ;;  %v5645_v52 = vpop.f32.mrf.mxu0 }
  0xdc   :  { %4414 = vmatmul.msk.f32.gmra.mxu1 %vm82_vm1, %v274_v53  ;;  %4492 = vmatmul.msk.f32.gmra.mxu0 %vm82_vm1, %v850_v54  ;;  %v276_v53 = vld [vmem:[%s8448_s1 + $0xb0] sm:$0xff] }
  0xdd   :  { %4440 = vmatmul.msk.f32.gmra.mxu2 %vm82_vm1, %v466_v59  ;;  %4469 = vmatmul.msk.f32.gmra.mxu3 %vm82_vm1, %v661_v60  ;;  %v852_v54 = vld [vmem:[%s8449_s4 + $0xb0] sm:$0xff]  ;;  %v1406_v60 = vld [vmem:[%s8452_s7] sm:$0xff] }
  0xde   :  { %v468_v59 = vld [vmem:[%s8450_s2 + $0xb0] sm:$0xff] }
  0xe0   :  { %v5663_v61 = vpop.f32.mrf.mxu2  ;;  %v5665_v62 = vpop.f32.mrf.mxu3 }
  0xe1   :  { %8606 = vst [vmem:[#allocation19_spill] sm:$0xff] %v5663_v61  ;;  %v5667_v5 = vpop.f32.mrf.mxu1  ;;  %v5669_v6 = vpop.f32.mrf.mxu0 }
  0xe4   :  { %4415 = vmatmul.msk.f32.gmra.mxu1 %vm82_vm1, %v275_v11  ;;  %4493 = vmatmul.msk.f32.gmra.mxu0 %vm82_vm1, %v851_v12  ;;  %v5722_v11 = vrot.slane %v5690_v27, 4  ;;  %v5729_v12 = vrot.slane %v5695_v28, 4 }
  0xe5   :  { %4441 = vmatmul.msk.f32.gmra.mxu2 %vm82_vm1, %v467_v21  ;;  %4470 = vmatmul.msk.f32.gmra.mxu3 %vm82_vm1, %v662_v22 }
  0xe6   :  { %4601 = vmatpush.msk.msrb.mxu1 %vm158_vm0, %v5722_v11  ;;  %4679 = vmatpush.msk.msrb.mxu0 %vm158_vm0, %v5729_v12 }
  0xe8   :  { %v5701_v37 = vpop.f32.mrf.mxu2  ;;  %v5703_v38 = vpop.f32.mrf.mxu3 }
  0xe9   :  { %8607 = vst [vmem:[#allocation20_spill] sm:$0xff] %v5701_v37  ;;  %v5705_v43 = vpop.f32.mrf.mxu1  ;;  %v5707_v44 = vpop.f32.mrf.mxu0  ;;  %v469_v37 = vld [vmem:[%s8450_s2 + $0xb8] sm:$0xff] }
  0xec   :  { %4416 = vmatmul.msk.f32.gmra.mxu1 %vm82_vm1, %v276_v53  ;;  %4494 = vmatmul.msk.f32.gmra.mxu0 %vm82_vm1, %v852_v54 }
  0xed   :  { %4442 = vmatmul.msk.f32.gmra.mxu2 %vm82_vm1, %v468_v59  ;;  %4550 = vmatmul.msk.f32.vlgmr.msra.gmra.mxu3 %vm82_vm1, %v1406_v60  ;;  %v277_v59 = vld [vmem:[%s8448_s1 + $0xb8] sm:$0xff] }
  0xee   :  { %4757 = vmatpush.msk.msra.mxu3 %vm158_vm0, %v5695_v28  ;;  %v853_v60 = vld [vmem:[%s8449_s4 + $0xb8] sm:$0xff] }
  0xf0   :  { %v5737_v21 = vpop.f32.mrf.mxu2  ;;  %v5739_v22 = vpop.f32.mrf.mxu3 }
  0xf1   :  { %8608 = vst [vmem:[#allocation21_spill] sm:$0xff] %v5737_v21  ;;  %v5741_v53 = vpop.f32.mrf.mxu1  ;;  %v5743_v54 = vpop.f32.mrf.mxu0  ;;  %v1407_v21 = vld [vmem:[%s8452_s7 + $0x8] sm:$0xff] }
  0xf4   :  { %4417 = vmatmul.msk.f32.gmra.mxu1 %vm82_vm1, %v277_v59  ;;  %4495 = vmatmul.msk.f32.gmra.mxu0 %vm82_vm1, %v853_v60  ;;  %v854_v59 = vld [vmem:[%s8449_s4 + $0xc0] sm:$0xf] }
  0xf5   :  { %4443 = vmatmul.msk.f32.gmra.mxu2 %vm82_vm1, %v469_v37  ;;  %4551 = vmatmul.msk.f32.gmra.mxu3 %vm82_vm1, %v1407_v21  ;;  %v470_v37 = vld [vmem:[%s8450_s2 + $0xc0] sm:$0xf]  ;;  %v1408_v21 = vld [vmem:[%s8452_s7 + $0x10] sm:$0xff] }
  0xf8   :  { %v5761_v61 = vpop.f32.mrf.mxu2  ;;  %v5763_v45 = vpop.f32.mrf.mxu3 }
  0xf9   :  { %8609 = vst [vmem:[#allocation22_spill] sm:$0xff] %v5761_v61  ;;  %v5765_v29 = vpop.f32.mrf.mxu1  ;;  %v5767_v13 = vpop.f32.mrf.mxu0 }
  0xfc   :  { %4418 = vmatmul.msk.f32.gmra.mxu1 %vm82_vm1, %v278_v63  ;;  %4496 = vmatmul.msk.f32.gmra.mxu0 %vm82_vm1, %v854_v59  ;;  %v1598_v63 = vld [vmem:[%s8454_s8] sm:$0xff] }
  0xfd   :  { %4444 = vmatmul.msk.f32.gmra.mxu2 %vm82_vm1, %v470_v37  ;;  %4552 = vmatmul.msk.f32.gmra.mxu3 %vm82_vm1, %v1408_v21  ;;  %v1214_v59 = vld [vmem:[%s8455_s6] sm:$0xff]  ;;  %v1409_v37 = vld [vmem:[%s8452_s7 + $0x18] sm:$0xff] }
 0x100   :  { %v5785_v60 = vpop.f32.mrf.mxu2  ;;  %v5787_v61 = vpop.f32.mrf.mxu3 }
 0x101   :  { %8610 = vst [vmem:[#allocation23_spill] sm:$0xff] %v5785_v60  ;;  %v5789_v32 = vpop.f32.mrf.mxu1  ;;  %v5791_v24 = vpop.f32.mrf.mxu0 }
 0x104   :  { %4498 = vmatmul.msk.f32.vlgmr.msra.gmra.mxu1 %vm82_vm1, %v1022_v16  ;;  %4576 = vmatmul.msk.f32.vlgmr.msra.gmra.mxu0 %vm82_vm1, %v1598_v63 }
 0x105   :  { %4524 = vmatmul.msk.f32.vlgmr.msra.gmra.mxu2 %vm82_vm1, %v1214_v59  ;;  %4553 = vmatmul.msk.f32.gmra.mxu3 %vm82_vm1, %v1409_v37  ;;  %v1023_v59 = vld [vmem:[%s8453_s5 + $0x8] sm:$0xff] }
 0x106   :  { %4731 = vmatpush.msk.msra.mxu2 %vm158_vm0, %v5690_v27  ;;  %4705 = vmatpush.msk.msra.mxu1 %vm158_vm0, %v5722_v11  ;;  %v1599_v37 = vld [vmem:[%s8454_s8 + $0x8] sm:$0xff] }
 0x107   :  { %4783 = vmatpush.msk.msra.mxu0 %vm158_vm0, %v5729_v12 }
 0x108   :  { %v5815_v21 = vpop.f32.mrf.mxu2  ;;  %v5817_v60 = vpop.f32.mrf.mxu3 }
 0x109   :  { %8611 = vst [vmem:[#allocation24_spill] sm:$0xff] %v5815_v21  ;;  %v5819_v16 = vpop.f32.mrf.mxu1  ;;  %v5821_v63 = vpop.f32.mrf.mxu0  ;;  %v1410_v21 = vld [vmem:[%s8452_s7 + $0x20] sm:$0xff] }
 0x10c   :  { %4499 = vmatmul.msk.f32.gmra.mxu1 %vm82_vm1, %v1023_v59  ;;  %4577 = vmatmul.msk.f32.gmra.mxu0 %vm82_vm1, %v1599_v37  ;;  %v1600_v59 = vld [vmem:[%s8454_s8 + $0x10] sm:$0xff] }
 0x10d   :  { %4525 = vmatmul.msk.f32.gmra.mxu2 %vm82_vm1, %v1215_v8  ;;  %4554 = vmatmul.msk.f32.gmra.mxu3 %vm82_vm1, %v1410_v21  ;;  %v1216_v8 = vld [vmem:[%s8455_s6 + $0x10] sm:$0xff]  ;;  %v1411_v21 = vld [vmem:[%s8452_s7 + $0x28] sm:$0xff] }
 0x110   :  { %v5839_v55 = vpop.f32.mrf.mxu2  ;;  %v5841_v47 = vpop.f32.mrf.mxu3 }
 0x111   :  { %8612 = vst [vmem:[#allocation25_spill] sm:$0xff] %v5839_v55  ;;  %v5843_v39 = vpop.f32.mrf.mxu1  ;;  %v5845_v31 = vpop.f32.mrf.mxu0 }
 0x114   :  { %4500 = vmatmul.msk.f32.gmra.mxu1 %vm82_vm1, %v1024_v23  ;;  %4578 = vmatmul.msk.f32.gmra.mxu0 %vm82_vm1, %v1600_v59  ;;  %v1601_v23 = vld [vmem:[%s8454_s8 + $0x18] sm:$0xff] }
 0x115   :  { %4526 = vmatmul.msk.f32.gmra.mxu2 %vm82_vm1, %v1216_v8  ;;  %4555 = vmatmul.msk.f32.gmra.mxu3 %vm82_vm1, %v1411_v21  ;;  %v1217_v59 = vld [vmem:[%s8455_s6 + $0x18] sm:$0xff]  ;;  %v1412_v8 = vld [vmem:[%s8452_s7 + $0x30] sm:$0xff] }
 0x118   :  { %v5863_v37 = vpop.f32.mrf.mxu2  ;;  %v5865_v55 = vpop.f32.mrf.mxu3 }
 0x119   :  { %8613 = vst [vmem:[#allocation26_spill] sm:$0xff] %v5863_v37  ;;  %v5867_v15 = vpop.f32.mrf.mxu1  ;;  %v5869_v7 = vpop.f32.mrf.mxu0 }
 0x11a   :  { %8614 = vst [vmem:[#allocation27_spill] sm:$0xff] %v5867_v15  ;;  %v1026_v15 = vld [vmem:[%s8453_s5 + $0x20] sm:$0xff] }
 0x11b   :  { %8615 = vst [vmem:[#allocation28_spill] sm:$0xff] %v5869_v7 }
 0x11c   :  { %4501 = vmatmul.msk.f32.gmra.mxu1 %vm82_vm1, %v1025_v50  ;;  %4579 = vmatmul.msk.f32.gmra.mxu0 %vm82_vm1, %v1601_v23  ;;  %v1602_v50 = vld [vmem:[%s8454_s8 + $0x20] sm:$0xff] }
 0x11d   :  { %4527 = vmatmul.msk.f32.gmra.mxu2 %vm82_vm1, %v1217_v59  ;;  %4556 = vmatmul.msk.f32.gmra.mxu3 %vm82_vm1, %v1412_v8  ;;  %v1218_v23 = vld [vmem:[%s8455_s6 + $0x20] sm:$0xff]  ;;  %v1413_v59 = vld [vmem:[%s8452_s7 + $0x38] sm:$0xff] }
 0x120   :  { %v5887_v21 = vpop.f32.mrf.mxu2  ;;  %v5889_v37 = vpop.f32.mrf.mxu3 }
 0x121   :  { %8616 = vst [vmem:[#allocation29_spill] sm:$0xff] %v5887_v21  ;;  %v5891_v42 = vpop.f32.mrf.mxu1  ;;  %v5893_v7 = vpop.f32.mrf.mxu0 }
 0x122   :  { %8617 = vst [vmem:[#allocation30_spill] sm:$0xff] %v5889_v37  ;;  %v1027_v37 = vld [vmem:[%s8453_s5 + $0x28] sm:$0xff] }
 0x123   :  { %8618 = vst [vmem:[#allocation31_spill] sm:$0xff] %v5891_v42 }
 0x124   :  { %8619 = vst [vmem:[#allocation32_spill] sm:$0xff] %v5893_v7  ;;  %4502 = vmatmul.msk.f32.gmra.mxu1 %vm82_vm1, %v1026_v15  ;;  %4580 = vmatmul.msk.f32.gmra.mxu0 %vm82_vm1, %v1602_v50  ;;  %v1603_v15 = vld [vmem:[%s8454_s8 + $0x28] sm:$0xff] }
 0x125   :  { %4528 = vmatmul.msk.f32.gmra.mxu2 %vm82_vm1, %v1218_v23  ;;  %4557 = vmatmul.msk.f32.gmra.mxu3 %vm82_vm1, %v1413_v59  ;;  %v1219_v50 = vld [vmem:[%s8455_s6 + $0x28] sm:$0xff]  ;;  %v1414_v23 = vld [vmem:[%s8452_s7 + $0x40] sm:$0xff] }
 0x128   :  { %v5911_v8 = vpop.f32.mrf.mxu2  ;;  %v5913_v21 = vpop.f32.mrf.mxu3 }
 0x129   :  { %8620 = vst [vmem:[#allocation33_spill] sm:$0xff] %v5911_v8  ;;  %v5915_v7 = vpop.f32.mrf.mxu1  ;;  %v5917_v42 = vpop.f32.mrf.mxu0 }
 0x12a   :  { %8621 = vst [vmem:[#allocation34_spill] sm:$0xff] %v5913_v21  ;;  %v1028_v21 = vld [vmem:[%s8453_s5 + $0x30] sm:$0xff] }
 0x12b   :  { %8622 = vst [vmem:[#allocation35_spill] sm:$0xff] %v5915_v7 }
 0x12c   :  { %8623 = vst [vmem:[#allocation36_spill] sm:$0xff] %v5917_v42  ;;  %4503 = vmatmul.msk.f32.gmra.mxu1 %vm82_vm1, %v1027_v37  ;;  %4581 = vmatmul.msk.f32.gmra.mxu0 %vm82_vm1, %v1603_v15  ;;  %v1604_v37 = vld [vmem:[%s8454_s8 + $0x30] sm:$0xff] }
 0x12d   :  { %4529 = vmatmul.msk.f32.gmra.mxu2 %vm82_vm1, %v1219_v50  ;;  %4558 = vmatmul.msk.f32.gmra.mxu3 %vm82_vm1, %v1414_v23  ;;  %v1220_v15 = vld [vmem:[%s8455_s6 + $0x30] sm:$0xff]  ;;  %v1415_v50 = vld [vmem:[%s8452_s7 + $0x48] sm:$0xff] }
 0x130   :  { %v5935_v59 = vpop.f32.mrf.mxu2  ;;  %v5937_v8 = vpop.f32.mrf.mxu3 }
 0x131   :  { %8624 = vst [vmem:[#allocation37_spill] sm:$0xff] %v5935_v59  ;;  %v5939_v42 = vpop.f32.mrf.mxu1  ;;  %v5941_v7 = vpop.f32.mrf.mxu0 }
 0x132   :  { %8625 = vst [vmem:[#allocation38_spill] sm:$0xff] %v5937_v8  ;;  %v1029_v8 = vld [vmem:[%s8453_s5 + $0x38] sm:$0xff] }
 0x133   :  { %8626 = vst [vmem:[#allocation39_spill] sm:$0xff] %v5939_v42 }
 0x134   :  { %8627 = vst [vmem:[#allocation40_spill] sm:$0xff] %v5941_v7  ;;  %4504 = vmatmul.msk.f32.gmra.mxu1 %vm82_vm1, %v1028_v21  ;;  %4582 = vmatmul.msk.f32.gmra.mxu0 %vm82_vm1, %v1604_v37  ;;  %v1605_v21 = vld [vmem:[%s8454_s8 + $0x38] sm:$0xff] }
 0x135   :  { %4530 = vmatmul.msk.f32.gmra.mxu2 %vm82_vm1, %v1220_v15  ;;  %4559 = vmatmul.msk.f32.gmra.mxu3 %vm82_vm1, %v1415_v50  ;;  %v1221_v37 = vld [vmem:[%s8455_s6 + $0x38] sm:$0xff]  ;;  %v1416_v15 = vld [vmem:[%s8452_s7 + $0x50] sm:$0xff] }
 0x138   :  { %v5959_v23 = vpop.f32.mrf.mxu2  ;;  %v5961_v59 = vpop.f32.mrf.mxu3 }
 0x139   :  { %8628 = vst [vmem:[#allocation41_spill] sm:$0xff] %v5959_v23  ;;  %v5963_v7 = vpop.f32.mrf.mxu1  ;;  %v5965_v42 = vpop.f32.mrf.mxu0 }
 0x13a   :  { %8629 = vst [vmem:[#allocation42_spill] sm:$0xff] %v5961_v59  ;;  %v1030_v59 = vld [vmem:[%s8453_s5 + $0x40] sm:$0xff] }
 0x13b   :  { %8630 = vst [vmem:[#allocation43_spill] sm:$0xff] %v5963_v7 }
 0x13c   :  { %8631 = vst [vmem:[#allocation44_spill] sm:$0xff] %v5965_v42  ;;  %4505 = vmatmul.msk.f32.gmra.mxu1 %vm82_vm1, %v1029_v8  ;;  %4583 = vmatmul.msk.f32.gmra.mxu0 %vm82_vm1, %v1605_v21  ;;  %v1606_v8 = vld [vmem:[%s8454_s8 + $0x40] sm:$0xff] }
 0x13d   :  { %4531 = vmatmul.msk.f32.gmra.mxu2 %vm82_vm1, %v1221_v37  ;;  %4560 = vmatmul.msk.f32.gmra.mxu3 %vm82_vm1, %v1416_v15  ;;  %v1222_v21 = vld [vmem:[%s8455_s6 + $0x40] sm:$0xff]  ;;  %v1417_v37 = vld [vmem:[%s8452_s7 + $0x58] sm:$0xff] }
 0x140   :  { %v5983_v50 = vpop.f32.mrf.mxu2  ;;  %v5985_v23 = vpop.f32.mrf.mxu3 }
 0x141   :  { %8632 = vst [vmem:[#allocation45_spill] sm:$0xff] %v5983_v50  ;;  %v5987_v42 = vpop.f32.mrf.mxu1  ;;  %v5989_v7 = vpop.f32.mrf.mxu0 }
 0x142   :  { %8633 = vst [vmem:[#allocation46_spill] sm:$0xff] %v5985_v23  ;;  %v1031_v23 = vld [vmem:[%s8453_s5 + $0x48] sm:$0xff] }
 0x143   :  { %8634 = vst [vmem:[#allocation47_spill] sm:$0xff] %v5987_v42 }
 0x144   :  { %8635 = vst [vmem:[#allocation48_spill] sm:$0xff] %v5989_v7  ;;  %4506 = vmatmul.msk.f32.gmra.mxu1 %vm82_vm1, %v1030_v59  ;;  %4584 = vmatmul.msk.f32.gmra.mxu0 %vm82_vm1, %v1606_v8  ;;  %v1607_v59 = vld [vmem:[%s8454_s8 + $0x48] sm:$0xff] }
 0x145   :  { %4532 = vmatmul.msk.f32.gmra.mxu2 %vm82_vm1, %v1222_v21  ;;  %4561 = vmatmul.msk.f32.gmra.mxu3 %vm82_vm1, %v1417_v37  ;;  %v1223_v8 = vld [vmem:[%s8455_s6 + $0x48] sm:$0xff]  ;;  %v1418_v21 = vld [vmem:[%s8452_s7 + $0x60] sm:$0xff] }
 0x148   :  { %v6007_v15 = vpop.f32.mrf.mxu2  ;;  %v6009_v50 = vpop.f32.mrf.mxu3 }
 0x149   :  { %8636 = vst [vmem:[#allocation49_spill] sm:$0xff] %v6007_v15  ;;  %v6011_v7 = vpop.f32.mrf.mxu1  ;;  %v6013_v42 = vpop.f32.mrf.mxu0 }
 0x14a   :  { %8637 = vst [vmem:[#allocation50_spill] sm:$0xff] %v6009_v50  ;;  %v1032_v50 = vld [vmem:[%s8453_s5 + $0x50] sm:$0xff] }
 0x14b   :  { %8638 = vst [vmem:[#allocation51_spill] sm:$0xff] %v6011_v7 }
 0x14c   :  { %8639 = vst [vmem:[#allocation52_spill] sm:$0xff] %v6013_v42  ;;  %4507 = vmatmul.msk.f32.gmra.mxu1 %vm82_vm1, %v1031_v23  ;;  %4585 = vmatmul.msk.f32.gmra.mxu0 %vm82_vm1, %v1607_v59  ;;  %v1608_v23 = vld [vmem:[%s8454_s8 + $0x50] sm:$0xff] }
 0x14d   :  { %4533 = vmatmul.msk.f32.gmra.mxu2 %vm82_vm1, %v1223_v8  ;;  %4562 = vmatmul.msk.f32.gmra.mxu3 %vm82_vm1, %v1418_v21  ;;  %v1224_v59 = vld [vmem:[%s8455_s6 + $0x50] sm:$0xff]  ;;  %v1419_v8 = vld [vmem:[%s8452_s7 + $0x68] sm:$0xff] }
 0x150   :  { %v6031_v37 = vpop.f32.mrf.mxu2  ;;  %v6033_v15 = vpop.f32.mrf.mxu3 }
 0x151   :  { %8640 = vst [vmem:[#allocation53_spill] sm:$0xff] %v6031_v37  ;;  %v6035_v42 = vpop.f32.mrf.mxu1  ;;  %v6037_v7 = vpop.f32.mrf.mxu0 }
 0x152   :  { %8641 = vst [vmem:[#allocation54_spill] sm:$0xff] %v6033_v15  ;;  %v1033_v15 = vld [vmem:[%s8453_s5 + $0x58] sm:$0xff] }
 0x153   :  { %8642 = vst [vmem:[#allocation55_spill] sm:$0xff] %v6035_v42 }
 0x154   :  { %8643 = vst [vmem:[#allocation56_spill] sm:$0xff] %v6037_v7  ;;  %4508 = vmatmul.msk.f32.gmra.mxu1 %vm82_vm1, %v1032_v50  ;;  %4586 = vmatmul.msk.f32.gmra.mxu0 %vm82_vm1, %v1608_v23  ;;  %v1609_v50 = vld [vmem:[%s8454_s8 + $0x58] sm:$0xff] }
 0x155   :  { %4534 = vmatmul.msk.f32.gmra.mxu2 %vm82_vm1, %v1224_v59  ;;  %4563 = vmatmul.msk.f32.gmra.mxu3 %vm82_vm1, %v1419_v8  ;;  %v1225_v23 = vld [vmem:[%s8455_s6 + $0x58] sm:$0xff]  ;;  %v1420_v59 = vld [vmem:[%s8452_s7 + $0x70] sm:$0xff] }
 0x158   :  { %v6055_v21 = vpop.f32.mrf.mxu2  ;;  %v6057_v37 = vpop.f32.mrf.mxu3 }
 0x159   :  { %8644 = vst [vmem:[#allocation57_spill] sm:$0xff] %v6055_v21  ;;  %v6059_v7 = vpop.f32.mrf.mxu1  ;;  %v6061_v42 = vpop.f32.mrf.mxu0 }
 0x15a   :  { %8645 = vst [vmem:[#allocation58_spill] sm:$0xff] %v6057_v37  ;;  %v1034_v37 = vld [vmem:[%s8453_s5 + $0x60] sm:$0xff] }
 0x15b   :  { %8646 = vst [vmem:[#allocation59_spill] sm:$0xff] %v6059_v7 }
 0x15c   :  { %8647 = vst [vmem:[#allocation60_spill] sm:$0xff] %v6061_v42  ;;  %4509 = vmatmul.msk.f32.gmra.mxu1 %vm82_vm1, %v1033_v15  ;;  %4587 = vmatmul.msk.f32.gmra.mxu0 %vm82_vm1, %v1609_v50  ;;  %v1610_v15 = vld [vmem:[%s8454_s8 + $0x60] sm:$0xff] }
 0x15d   :  { %4535 = vmatmul.msk.f32.gmra.mxu2 %vm82_vm1, %v1225_v23  ;;  %4564 = vmatmul.msk.f32.gmra.mxu3 %vm82_vm1, %v1420_v59  ;;  %v1226_v50 = vld [vmem:[%s8455_s6 + $0x60] sm:$0xff]  ;;  %v1421_v23 = vld [vmem:[%s8452_s7 + $0x78] sm:$0xff] }
 0x160   :  { %v6079_v8 = vpop.f32.mrf.mxu2  ;;  %v6081_v21 = vpop.f32.mrf.mxu3 }
 0x161   :  { %8648 = vst [vmem:[#allocation61_spill] sm:$0xff] %v6079_v8  ;;  %v6083_v42 = vpop.f32.mrf.mxu1  ;;  %v6085_v7 = vpop.f32.mrf.mxu0 }
 0x162   :  { %8649 = vst [vmem:[#allocation62_spill] sm:$0xff] %v6081_v21  ;;  %v1035_v21 = vld [vmem:[%s8453_s5 + $0x68] sm:$0xff] }
 0x163   :  { %8650 = vst [vmem:[#allocation63_spill] sm:$0xff] %v6083_v42 }
 0x164   :  { %8651 = vst [vmem:[#allocation64_spill] sm:$0xff] %v6085_v7  ;;  %4510 = vmatmul.msk.f32.gmra.mxu1 %vm82_vm1, %v1034_v37  ;;  %4588 = vmatmul.msk.f32.gmra.mxu0 %vm82_vm1, %v1610_v15  ;;  %v1611_v37 = vld [vmem:[%s8454_s8 + $0x68] sm:$0xff] }
 0x165   :  { %4536 = vmatmul.msk.f32.gmra.mxu2 %vm82_vm1, %v1226_v50  ;;  %4565 = vmatmul.msk.f32.gmra.mxu3 %vm82_vm1, %v1421_v23  ;;  %v1227_v15 = vld [vmem:[%s8455_s6 + $0x68] sm:$0xff]  ;;  %v1422_v50 = vld [vmem:[%s8452_s7 + $0x80] sm:$0xff] }
 0x168   :  { %v6103_v59 = vpop.f32.mrf.mxu2  ;;  %v6105_v8 = vpop.f32.mrf.mxu3 }
 0x169   :  { %8652 = vst [vmem:[#allocation65_spill] sm:$0xff] %v6103_v59  ;;  %v6107_v7 = vpop.f32.mrf.mxu1  ;;  %v6109_v42 = vpop.f32.mrf.mxu0 }
 0x16a   :  { %8653 = vst [vmem:[#allocation66_spill] sm:$0xff] %v6105_v8  ;;  %v1036_v8 = vld [vmem:[%s8453_s5 + $0x70] sm:$0xff] }
 0x16b   :  { %8654 = vst [vmem:[#allocation67_spill] sm:$0xff] %v6107_v7 }
 0x16c   :  { %8655 = vst [vmem:[#allocation68_spill] sm:$0xff] %v6109_v42  ;;  %4511 = vmatmul.msk.f32.gmra.mxu1 %vm82_vm1, %v1035_v21  ;;  %4589 = vmatmul.msk.f32.gmra.mxu0 %vm82_vm1, %v1611_v37  ;;  %v1612_v21 = vld [vmem:[%s8454_s8 + $0x70] sm:$0xff] }
 0x16d   :  { %4537 = vmatmul.msk.f32.gmra.mxu2 %vm82_vm1, %v1227_v15  ;;  %4566 = vmatmul.msk.f32.gmra.mxu3 %vm82_vm1, %v1422_v50  ;;  %v1228_v37 = vld [vmem:[%s8455_s6 + $0x70] sm:$0xff]  ;;  %v1423_v15 = vld [vmem:[%s8452_s7 + $0x88] sm:$0xff] }
 0x170   :  { %v6127_v23 = vpop.f32.mrf.mxu2  ;;  %v6129_v59 = vpop.f32.mrf.mxu3 }
 0x171   :  { %8656 = vst [vmem:[#allocation69_spill] sm:$0xff] %v6127_v23  ;;  %v6131_v42 = vpop.f32.mrf.mxu1  ;;  %v6133_v7 = vpop.f32.mrf.mxu0 }
 0x172   :  { %8657 = vst [vmem:[#allocation70_spill] sm:$0xff] %v6129_v59 }
 0x173   :  { %8658 = vst [vmem:[#allocation71_spill] sm:$0xff] %v6131_v42  ;;  %v1037_v42 = vld [vmem:[%s8453_s5 + $0x78] sm:$0xff] }
 0x174   :  { %8659 = vst [vmem:[#allocation72_spill] sm:$0xff] %v6133_v7  ;;  %4512 = vmatmul.msk.f32.gmra.mxu1 %vm82_vm1, %v1036_v8  ;;  %4590 = vmatmul.msk.f32.gmra.mxu0 %vm82_vm1, %v1612_v21  ;;  %v1613_v8 = vld [vmem:[%s8454_s8 + $0x78] sm:$0xff] }
 0x175   :  { %4538 = vmatmul.msk.f32.gmra.mxu2 %vm82_vm1, %v1228_v37  ;;  %4567 = vmatmul.msk.f32.gmra.mxu3 %vm82_vm1, %v1423_v15  ;;  %v1229_v21 = vld [vmem:[%s8455_s6 + $0x78] sm:$0xff]  ;;  %v1424_v37 = vld [vmem:[%s8452_s7 + $0x90] sm:$0xff] }
 0x178   :  { %v6151_v50 = vpop.f32.mrf.mxu2  ;;  %v6153_v59 = vpop.f32.mrf.mxu3 }
 0x179   :  { %8660 = vst [vmem:[#allocation73_spill] sm:$0xff] %v6151_v50  ;;  %v6155_v23 = vpop.f32.mrf.mxu1  ;;  %v6157_v7 = vpop.f32.mrf.mxu0 }
 0x17a   :  { %8661 = vst [vmem:[#allocation74_spill] sm:$0xff] %v6153_v59 }
 0x17b   :  { %8662 = vst [vmem:[#allocation75_spill] sm:$0xff] %v6155_v23  ;;  %v1038_v23 = vld [vmem:[%s8453_s5 + $0x80] sm:$0xff] }
 0x17c   :  { %8663 = vst [vmem:[#allocation76_spill] sm:$0xff] %v6157_v7  ;;  %4513 = vmatmul.msk.f32.gmra.mxu1 %vm82_vm1, %v1037_v42  ;;  %4591 = vmatmul.msk.f32.gmra.mxu0 %vm82_vm1, %v1613_v8  ;;  %v1614_v42 = vld [vmem:[%s8454_s8 + $0x80] sm:$0xff] }
 0x17d   :  { %4539 = vmatmul.msk.f32.gmra.mxu2 %vm82_vm1, %v1229_v21  ;;  %4568 = vmatmul.msk.f32.gmra.mxu3 %vm82_vm1, %v1424_v37  ;;  %v1230_v8 = vld [vmem:[%s8455_s6 + $0x80] sm:$0xff]  ;;  %v1425_v21 = vld [vmem:[%s8452_s7 + $0x98] sm:$0xff] }
 0x180   :  { %v6175_v15 = vpop.f32.mrf.mxu2  ;;  %v6177_v59 = vpop.f32.mrf.mxu3 }
 0x181   :  { %8664 = vst [vmem:[#allocation77_spill] sm:$0xff] %v6175_v15  ;;  %v6179_v50 = vpop.f32.mrf.mxu1  ;;  %v6181_v7 = vpop.f32.mrf.mxu0 }
 0x182   :  { %8665 = vst [vmem:[#allocation78_spill] sm:$0xff] %v6177_v59 }
 0x183   :  { %8666 = vst [vmem:[#allocation79_spill] sm:$0xff] %v6179_v50  ;;  %v1039_v50 = vld [vmem:[%s8453_s5 + $0x88] sm:$0xff] }
 0x184   :  { %8667 = vst [vmem:[#allocation80_spill] sm:$0xff] %v6181_v7  ;;  %4514 = vmatmul.msk.f32.gmra.mxu1 %vm82_vm1, %v1038_v23  ;;  %4592 = vmatmul.msk.f32.gmra.mxu0 %vm82_vm1, %v1614_v42  ;;  %v1615_v23 = vld [vmem:[%s8454_s8 + $0x88] sm:$0xff] }
 0x185   :  { %4540 = vmatmul.msk.f32.gmra.mxu2 %vm82_vm1, %v1230_v8  ;;  %4569 = vmatmul.msk.f32.gmra.mxu3 %vm82_vm1, %v1425_v21  ;;  %v1231_v42 = vld [vmem:[%s8455_s6 + $0x88] sm:$0xff]  ;;  %v1426_v8 = vld [vmem:[%s8452_s7 + $0xa0] sm:$0xff] }
 0x188   :  { %v6199_v37 = vpop.f32.mrf.mxu2  ;;  %v6201_v7 = vpop.f32.mrf.mxu3 }
 0x189   :  { %8668 = vst [vmem:[#allocation81_spill] sm:$0xff] %v6199_v37  ;;  %v6203_v59 = vpop.f32.mrf.mxu1  ;;  %v6205_v15 = vpop.f32.mrf.mxu0 }
 0x18a   :  { %8669 = vst [vmem:[#allocation82_spill] sm:$0xff] %v6201_v7 }
 0x18b   :  { %8670 = vst [vmem:[#allocation83_spill] sm:$0xff] %v6203_v59  ;;  %v1040_v59 = vld [vmem:[%s8453_s5 + $0x90] sm:$0xff] }
 0x18c   :  { %8671 = vst [vmem:[#allocation84_spill] sm:$0xff] %v6205_v15  ;;  %4515 = vmatmul.msk.f32.gmra.mxu1 %vm82_vm1, %v1039_v50  ;;  %4593 = vmatmul.msk.f32.gmra.mxu0 %vm82_vm1, %v1615_v23  ;;  %v1616_v50 = vld [vmem:[%s8454_s8 + $0x90] sm:$0xff] }
 0x18d   :  { %4541 = vmatmul.msk.f32.gmra.mxu2 %vm82_vm1, %v1231_v42  ;;  %4570 = vmatmul.msk.f32.gmra.mxu3 %vm82_vm1, %v1426_v8  ;;  %v1232_v23 = vld [vmem:[%s8455_s6 + $0x90] sm:$0xff]  ;;  %v1427_v42 = vld [vmem:[%s8452_s7 + $0xa8] sm:$0xff] }
 0x190   :  { %v6223_v21 = vpop.f32.mrf.mxu2  ;;  %v6225_v15 = vpop.f32.mrf.mxu3 }
 0x191   :  { %8672 = vst [vmem:[#allocation85_spill] sm:$0xff] %v6223_v21  ;;  %v6227_v7 = vpop.f32.mrf.mxu1  ;;  %v6229_v37 = vpop.f32.mrf.mxu0 }
 0x192   :  { %8673 = vst [vmem:[#allocation86_spill] sm:$0xff] %v6225_v15 }
 0x193   :  { %8674 = vst [vmem:[#allocation87_spill] sm:$0xff] %v6227_v7  ;;  %v1041_v7 = vld [vmem:[%s8453_s5 + $0x98] sm:$0xff] }
 0x194   :  { %8675 = vst [vmem:[#allocation88_spill] sm:$0xff] %v6229_v37  ;;  %4516 = vmatmul.msk.f32.gmra.mxu1 %vm82_vm1, %v1040_v59  ;;  %4594 = vmatmul.msk.f32.gmra.mxu0 %vm82_vm1, %v1616_v50  ;;  %v1617_v59 = vld [vmem:[%s8454_s8 + $0x98] sm:$0xff] }
 0x195   :  { %4542 = vmatmul.msk.f32.gmra.mxu2 %vm82_vm1, %v1232_v23  ;;  %4571 = vmatmul.msk.f32.gmra.mxu3 %vm82_vm1, %v1427_v42  ;;  %v1233_v50 = vld [vmem:[%s8455_s6 + $0x98] sm:$0xff]  ;;  %v1428_v23 = vld [vmem:[%s8452_s7 + $0xb0] sm:$0xff] }
 0x198   :  { %v6247_v8 = vpop.f32.mrf.mxu2  ;;  %v6249_v37 = vpop.f32.mrf.mxu3 }
 0x199   :  { %8676 = vst [vmem:[#allocation89_spill] sm:$0xff] %v6247_v8  ;;  %v6251_v15 = vpop.f32.mrf.mxu1  ;;  %v6253_v21 = vpop.f32.mrf.mxu0 }
 0x19a   :  { %8677 = vst [vmem:[#allocation90_spill] sm:$0xff] %v6249_v37 }
 0x19b   :  { %8678 = vst [vmem:[#allocation91_spill] sm:$0xff] %v6251_v15  ;;  %v1042_v15 = vld [vmem:[%s8453_s5 + $0xa0] sm:$0xff] }
 0x19c   :  { %8679 = vst [vmem:[#allocation92_spill] sm:$0xff] %v6253_v21  ;;  %4517 = vmatmul.msk.f32.gmra.mxu1 %vm82_vm1, %v1041_v7  ;;  %4595 = vmatmul.msk.f32.gmra.mxu0 %vm82_vm1, %v1617_v59  ;;  %v1618_v7 = vld [vmem:[%s8454_s8 + $0xa0] sm:$0xff] }
 0x19d   :  { %4543 = vmatmul.msk.f32.gmra.mxu2 %vm82_vm1, %v1233_v50  ;;  %4572 = vmatmul.msk.f32.gmra.mxu3 %vm82_vm1, %v1428_v23  ;;  %v1234_v59 = vld [vmem:[%s8455_s6 + $0xa0] sm:$0xff]  ;;  %v1429_v50 = vld [vmem:[%s8452_s7 + $0xb8] sm:$0xff] }
 0x1a0   :  { %v6271_v42 = vpop.f32.mrf.mxu2  ;;  %v6273_v21 = vpop.f32.mrf.mxu3 }
 0x1a1   :  { %8680 = vst [vmem:[#allocation93_spill] sm:$0xff] %v6271_v42  ;;  %v6275_v37 = vpop.f32.mrf.mxu1  ;;  %v6277_v8 = vpop.f32.mrf.mxu0 }
 0x1a2   :  { %8681 = vst [vmem:[#allocation94_spill] sm:$0xff] %v6273_v21 }
 0x1a3   :  { %8682 = vst [vmem:[#allocation95_spill] sm:$0xff] %v6275_v37  ;;  %v1043_v37 = vld [vmem:[%s8453_s5 + $0xa8] sm:$0xff] }
 0x1a4   :  { %8683 = vst [vmem:[#allocation96_spill] sm:$0xff] %v6277_v8  ;;  %4518 = vmatmul.msk.f32.gmra.mxu1 %vm82_vm1, %v1042_v15  ;;  %4596 = vmatmul.msk.f32.gmra.mxu0 %vm82_vm1, %v1618_v7  ;;  %v1619_v15 = vld [vmem:[%s8454_s8 + $0xa8] sm:$0xff] }
 0x1a5   :  { %4544 = vmatmul.msk.f32.gmra.mxu2 %vm82_vm1, %v1234_v59  ;;  %4573 = vmatmul.msk.f32.gmra.mxu3 %vm82_vm1, %v1429_v50  ;;  %v1235_v7 = vld [vmem:[%s8455_s6 + $0xa8] sm:$0xff]  ;;  %v1430_v59 = vld [vmem:[%s8452_s7 + $0xc0] sm:$0xf] }
 0x1a8   :  { %v6295_v23 = vpop.f32.mrf.mxu2  ;;  %v6297_v8 = vpop.f32.mrf.mxu3 }
 0x1a9   :  { %8684 = vst [vmem:[#allocation97_spill] sm:$0xff] %v6295_v23  ;;  %v6299_v21 = vpop.f32.mrf.mxu1  ;;  %v6301_v42 = vpop.f32.mrf.mxu0 }
 0x1aa   :  { %8685 = vst [vmem:[#allocation98_spill] sm:$0xff] %v6297_v8  ;;  %v6326_v8 = vld [vmem:[%s8446_s10] ss:$0 sm:$0xff] }
 0x1ab   :  { %8686 = vst [vmem:[#allocation99_spill] sm:$0xff] %v6299_v21 }
 0x1ac   :  { %8687 = vst [vmem:[#allocation100_spill] sm:$0xff] %v6301_v42  ;;  %4519 = vmatmul.msk.f32.gmra.mxu1 %vm82_vm1, %v1043_v37  ;;  %4597 = vmatmul.msk.f32.gmra.mxu0 %vm82_vm1, %v1619_v15  ;;  %v1044_v37 = vld [vmem:[%s8453_s5 + $0xb0] sm:$0xff] }
 0x1ad   :  { %4545 = vmatmul.msk.f32.gmra.mxu2 %vm82_vm1, %v1235_v7  ;;  %4574 = vmatmul.msk.f32.gmra.mxu3 %vm82_vm1, %v1430_v59  ;;  %v1620_v15 = vld [vmem:[%s8454_s8 + $0xb0] sm:$0xff]  ;;  %v6343_v59 = vadd.f32 %v6326_v8, %v5497_v40 }
 0x1ae   :  { %v1236_v7 = vld [vmem:[%s8455_s6 + $0xb0] sm:$0xff] }
 0x1af   :  { %8691 = vst [vmem:[#allocation104_spill] sm:$0xff] %v6343_v59 }
 0x1b0   :  { %v6319_v50 = vpop.f32.mrf.mxu2  ;;  %v6321_v42 = vpop.f32.mrf.mxu3 }
 0x1b1   :  { %8688 = vst [vmem:[#allocation101_spill] sm:$0xff] %v6319_v50  ;;  %v6328_v23 = vpop.f32.mrf.mxu1  ;;  %v6330_v21 = vpop.f32.mrf.mxu0 }
 0x1b2   :  { %8689 = vst [vmem:[#allocation102_spill] sm:$0xff] %v6321_v42 }
 0x1b3   :  { %8690 = vst [vmem:[#allocation103_spill] sm:$0xff] %v6330_v21 }
 0x1b4   :  { %4520 = vmatmul.msk.f32.gmra.mxu1 %vm82_vm1, %v1044_v37  ;;  %4598 = vmatmul.msk.f32.gmra.mxu0 %vm82_vm1, %v1620_v15  ;;  %v1045_v37 = vld [vmem:[%s8453_s5 + $0xb8] sm:$0xff] }
 0x1b5   :  { %4546 = vmatmul.msk.f32.gmra.mxu2 %vm82_vm1, %v1236_v7  ;;  %4654 = vmatmul.msk.f32.vlgmr.msrb.gmra.mxu3 %vm82_vm1, %v6343_v59  ;;  %v1621_v15 = vld [vmem:[%s8454_s8 + $0xb8] sm:$0xff]  ;;  %v6371_v7 = vadd.f32 %v6326_v8, %v5521_v48  ;;  %v1046_v48 = vld [vmem:[%s8453_s5 + $0xc0] sm:$0xf] }
 0x1b6   :  { %4861 = vmatpush.msk.msrb.mxu3 %vm158_vm0, %v5695_v28  ;;  %v1237_v28 = vld [vmem:[%s8455_s6 + $0xb8] sm:$0xff] }
 0x1b7   :  { %8695 = vst [vmem:[#allocation108_spill] sm:$0xff] %v6371_v7 }
 0x1b8   :  { %v6352_v21 = vpop.f32.mrf.mxu2  ;;  %v6354_v42 = vpop.f32.mrf.mxu3 }
 0x1b9   :  { %8692 = vst [vmem:[#allocation105_spill] sm:$0xff] %v6352_v21  ;;  %v6356_v50 = vpop.f32.mrf.mxu1  ;;  %v6358_v40 = vpop.f32.mrf.mxu0 }
 0x1ba   :  { %8693 = vst [vmem:[#allocation106_spill] sm:$0xff] %v6354_v42 }
 0x1bb   :  { %8694 = vst [vmem:[#allocation107_spill] sm:$0xff] %v6358_v40 }
 0x1bc   :  { %4521 = vmatmul.msk.f32.gmra.mxu1 %vm82_vm1, %v1045_v37  ;;  %4599 = vmatmul.msk.f32.gmra.mxu0 %vm82_vm1, %v1621_v15  ;;  %v1622_v37 = vld [vmem:[%s8454_s8 + $0xc0] sm:$0xf] }
 0x1bd   :  { %4547 = vmatmul.msk.f32.gmra.mxu2 %vm82_vm1, %v1237_v28  ;;  %4655 = vmatmul.msk.f32.gmra.mxu3 %vm82_vm1, %v6371_v7  ;;  %v1238_v15 = vld [vmem:[%s8455_s6 + $0xc0] sm:$0xf]  ;;  %v6397_v28 = vadd.f32 %v6326_v8, %v5545_v56  ;;  %v6414_v56 = vadd.f32 %v6326_v8, %v5547_v57 }
 0x1bf   :  { %8699 = vst [vmem:[#allocation112_spill] sm:$0xff] %v6397_v28 }
 0x1c0   :  { %v6378_v40 = vpop.f32.mrf.mxu2  ;;  %v6380_v42 = vpop.f32.mrf.mxu3 }
 0x1c1   :  { %8696 = vst [vmem:[#allocation109_spill] sm:$0xff] %v6378_v40  ;;  %v6382_v21 = vpop.f32.mrf.mxu1  ;;  %v6384_v59 = vpop.f32.mrf.mxu0 }
 0x1c2   :  { %8697 = vst [vmem:[#allocation110_spill] sm:$0xff] %v6380_v42 }
 0x1c3   :  { %8698 = vst [vmem:[#allocation111_spill] sm:$0xff] %v6384_v59 }
 0x1c4   :  { %4522 = vmatmul.msk.f32.gmra.mxu1 %vm82_vm1, %v1046_v48  ;;  %4600 = vmatmul.msk.f32.gmra.mxu0 %vm82_vm1, %v1622_v37  ;;  %v6418_v48 = vadd.f32 %v6326_v8, %v5549_v58  ;;  %v180_v37 = vadd.f32 %v6326_v8, %v5379_v1 }
 0x1c5   :  { %4548 = vmatmul.msk.f32.gmra.mxu2 %vm82_vm1, %v1238_v15  ;;  %4656 = vmatmul.msk.f32.gmra.mxu3 %vm82_vm1, %v6397_v28  ;;  %v6424_v15 = vadd.f32 %v6326_v8, %v5569_v0  ;;  %v8789_v28 = vld [vmem:[#allocation42_spill] sm:$0xff] }
 0x1c6   :  { %8703 = vst [vmem:[#allocation116_spill] sm:$0xff] %v6418_v48 }
 0x1c7   :  { %8704 = vst [vmem:[#allocation117_spill] sm:$0xff] %v6424_v15 }
 0x1c8   :  { %v6404_v59 = vpop.f32.mrf.mxu2  ;;  %v6406_v42 = vpop.f32.mrf.mxu3 }
 0x1c9   :  { %8700 = vst [vmem:[#allocation113_spill] sm:$0xff] %v6404_v59  ;;  %v6408_v40 = vpop.f32.mrf.mxu1  ;;  %v6410_v7 = vpop.f32.mrf.mxu0  ;;  %v8787_v59 = vld [vmem:[#allocation40_spill] sm:$0xff] }
 0x1ca   :  { %8701 = vst [vmem:[#allocation114_spill] sm:$0xff] %v6406_v42  ;;  %v6459_v42 = vadd.f32 %v6326_v8, %v5593_v14  ;;  %v6478_v14 = vadd.f32 %v6326_v8, %v5595_v19 }
 0x1cb   :  { %8702 = vst [vmem:[#allocation115_spill] sm:$0xff] %v6410_v7  ;;  %v183_v7 = vadd.f32 %v6326_v8, %v5403_v9 }
 0x1cc   :  { %4602 = vmatmul.msk.f32.vlgmr.msrb.gmra.mxu1 %vm82_vm1, %v6414_v56  ;;  %4680 = vmatmul.msk.f32.vlgmr.msrb.gmra.mxu0 %vm82_vm1, %v6418_v48  ;;  %8709 = vst [vmem:[#allocation122_spill] sm:$0xff] %v6459_v42 }
 0x1cd   :  { %4628 = vmatmul.msk.f32.vlgmr.msrb.gmra.mxu2 %vm82_vm1, %v180_v37  ;;  %4657 = vmatmul.msk.f32.gmra.mxu3 %vm82_vm1, %v6424_v15  ;;  %v6449_v37 = vadd.f32 %v6326_v8, %v5571_v3  ;;  %v8788_v15 = vld [vmem:[#allocation4_spill] sm:$0xff] }
 0x1ce   :  { %4835 = vmatpush.msk.msrb.mxu2 %vm158_vm0, %v5690_v27  ;;  %4809 = vmatpush.msk.msrb.mxu1 %vm158_vm0, %v5722_v11  ;;  %v6453_v27 = vadd.f32 %v6326_v8, %v5573_v4 }
 0x1cf   :  { %4887 = vmatpush.msk.msrb.mxu0 %vm158_vm0, %v5729_v12 }
 0x1d0   :  { %v6439_v1 = vpop.f32.mrf.mxu2  ;;  %v6441_v57 = vpop.f32.mrf.mxu3  ;;  %8708 = vst [vmem:[#allocation121_spill] sm:$0xff] %v6453_v27 }
 0x1d1   :  { %8705 = vst [vmem:[#allocation118_spill] sm:$0xff] %v6439_v1  ;;  %v6443_v58 = vpop.f32.mrf.mxu1  ;;  %v6445_v0 = vpop.f32.mrf.mxu0  ;;  %v8779_v1 = vld [vmem:[#allocation2_spill] sm:$0xff] }
 0x1d2   :  { %8706 = vst [vmem:[#allocation119_spill] sm:$0xff] %v6441_v57  ;;  %v6482_v57 = vadd.f32 %v6326_v8, %v5597_v20 }
 0x1d3   :  { %8707 = vst [vmem:[#allocation120_spill] sm:$0xff] %v6445_v0 }
 0x1d4   :  { %4603 = vmatmul.msk.f32.gmra.mxu1 %vm82_vm1, %v6449_v37  ;;  %4681 = vmatmul.msk.f32.gmra.mxu0 %vm82_vm1, %v6453_v27 }
 0x1d5   :  { %4629 = vmatmul.msk.f32.gmra.mxu2 %vm82_vm1, %v183_v7  ;;  %4658 = vmatmul.msk.f32.gmra.mxu3 %vm82_vm1, %v6459_v42  ;;  %v186_v7 = vadd.f32 %v6326_v8, %v5427_v17  ;;  %v6855_v42 = vadd.f32 %v6326_v8, %v8787_v59 }
 0x1d8   :  { %v6468_v3 = vpop.f32.mrf.mxu2  ;;  %v6470_v4 = vpop.f32.mrf.mxu3 }
 0x1d9   :  { %8710 = vst [vmem:[#allocation123_spill] sm:$0xff] %v6468_v3  ;;  %v6472_v9 = vpop.f32.mrf.mxu1  ;;  %v6474_v0 = vpop.f32.mrf.mxu0  ;;  %v6488_v3 = vadd.f32 %v6326_v8, %v5617_v30  ;;  %v6507_v30 = vadd.f32 %v6326_v8, %v5619_v35 }
 0x1da   :  { %8711 = vst [vmem:[#allocation124_spill] sm:$0xff] %v6470_v4  ;;  %v6511_v4 = vadd.f32 %v6326_v8, %v5621_v36 }
 0x1db   :  { %8712 = vst [vmem:[#allocation125_spill] sm:$0xff] %v6474_v0 }
 0x1dc   :  { %8713 = vst [vmem:[#allocation126_spill] sm:$0xff] %v6488_v3  ;;  %4604 = vmatmul.msk.f32.gmra.mxu1 %vm82_vm1, %v6478_v14  ;;  %4682 = vmatmul.msk.f32.gmra.mxu0 %vm82_vm1, %v6482_v57 }
 0x1dd   :  { %4630 = vmatmul.msk.f32.gmra.mxu2 %vm82_vm1, %v186_v7  ;;  %4659 = vmatmul.msk.f32.gmra.mxu3 %vm82_vm1, %v6488_v3  ;;  %v189_v7 = vadd.f32 %v6326_v8, %v5451_v25  ;;  %v8780_v3 = vld [vmem:[#allocation38_spill] sm:$0xff] }
 0x1e0   :  { %v6497_v19 = vpop.f32.mrf.mxu2  ;;  %v6499_v20 = vpop.f32.mrf.mxu3 }
 0x1e1   :  { %8714 = vst [vmem:[#allocation127_spill] sm:$0xff] %v6497_v19  ;;  %v6501_v17 = vpop.f32.mrf.mxu1  ;;  %v6503_v0 = vpop.f32.mrf.mxu0  ;;  %v6517_v19 = vadd.f32 %v6326_v8, %v5641_v46  ;;  %v6536_v46 = vadd.f32 %v6326_v8, %v5643_v51 }
 0x1e2   :  { %8715 = vst [vmem:[#allocation128_spill] sm:$0xff] %v6499_v20  ;;  %v6540_v20 = vadd.f32 %v6326_v8, %v5645_v52 }
 0x1e3   :  { %8716 = vst [vmem:[#allocation129_spill] sm:$0xff] %v6503_v0 }
 0x1e4   :  { %8717 = vst [vmem:[#allocation130_spill] sm:$0xff] %v6517_v19  ;;  %4605 = vmatmul.msk.f32.gmra.mxu1 %vm82_vm1, %v6507_v30  ;;  %4683 = vmatmul.msk.f32.gmra.mxu0 %vm82_vm1, %v6511_v4 }
 0x1e5   :  { %4631 = vmatmul.msk.f32.gmra.mxu2 %vm82_vm1, %v189_v7  ;;  %4660 = vmatmul.msk.f32.gmra.mxu3 %vm82_vm1, %v6517_v19  ;;  %v192_v7 = vadd.f32 %v6326_v8, %v5475_v33 }
 0x1e8   :  { %v6526_v35 = vpop.f32.mrf.mxu2  ;;  %v6528_v36 = vpop.f32.mrf.mxu3 }
 0x1e9   :  { %8718 = vst [vmem:[#allocation131_spill] sm:$0xff] %v6526_v35  ;;  %v6530_v25 = vpop.f32.mrf.mxu1  ;;  %v6532_v0 = vpop.f32.mrf.mxu0  ;;  %v6546_v35 = vadd.f32 %v6326_v8, %v5665_v62  ;;  %v6565_v62 = vadd.f32 %v6326_v8, %v5667_v5 }
 0x1ea   :  { %8719 = vst [vmem:[#allocation132_spill] sm:$0xff] %v6528_v36  ;;  %v6569_v36 = vadd.f32 %v6326_v8, %v5669_v6 }
 0x1eb   :  { %8720 = vst [vmem:[#allocation133_spill] sm:$0xff] %v6532_v0 }
 0x1ec   :  { %8721 = vst [vmem:[#allocation134_spill] sm:$0xff] %v6546_v35  ;;  %4606 = vmatmul.msk.f32.gmra.mxu1 %vm82_vm1, %v6536_v46  ;;  %4684 = vmatmul.msk.f32.gmra.mxu0 %vm82_vm1, %v6540_v20 }
 0x1ed   :  { %4632 = vmatmul.msk.f32.gmra.mxu2 %vm82_vm1, %v192_v7  ;;  %4661 = vmatmul.msk.f32.gmra.mxu3 %vm82_vm1, %v6546_v35  ;;  %v195_v7 = vadd.f32 %v6326_v8, %v5499_v41  ;;  %v8778_v35 = vld [vmem:[#allocation36_spill] sm:$0xff] }
 0x1ee   :  { %v6828_v19 = vadd.f32 %v6326_v8, %v8778_v35 }
 0x1f0   :  { %v6555_v51 = vpop.f32.mrf.mxu2  ;;  %v6557_v52 = vpop.f32.mrf.mxu3 }
 0x1f1   :  { %8722 = vst [vmem:[#allocation135_spill] sm:$0xff] %v6555_v51  ;;  %v6559_v33 = vpop.f32.mrf.mxu1  ;;  %v6561_v0 = vpop.f32.mrf.mxu0  ;;  %v6575_v51 = vadd.f32 %v6326_v8, %v5703_v38  ;;  %v6594_v38 = vadd.f32 %v6326_v8, %v5705_v43 }
 0x1f2   :  { %8723 = vst [vmem:[#allocation136_spill] sm:$0xff] %v6557_v52  ;;  %v6598_v52 = vadd.f32 %v6326_v8, %v5707_v44 }
 0x1f3   :  { %8724 = vst [vmem:[#allocation137_spill] sm:$0xff] %v6561_v0 }
 0x1f4   :  { %8725 = vst [vmem:[#allocation138_spill] sm:$0xff] %v6575_v51  ;;  %4607 = vmatmul.msk.f32.gmra.mxu1 %vm82_vm1, %v6565_v62  ;;  %4685 = vmatmul.msk.f32.gmra.mxu0 %vm82_vm1, %v6569_v36 }
 0x1f5   :  { %4633 = vmatmul.msk.f32.gmra.mxu2 %vm82_vm1, %v195_v7  ;;  %4662 = vmatmul.msk.f32.gmra.mxu3 %vm82_vm1, %v6575_v51  ;;  %v198_v7 = vadd.f32 %v6326_v8, %v5523_v49 }
 0x1f8   :  { %v6584_v5 = vpop.f32.mrf.mxu2  ;;  %v6586_v6 = vpop.f32.mrf.mxu3 }
 0x1f9   :  { %8726 = vst [vmem:[#allocation139_spill] sm:$0xff] %v6584_v5  ;;  %v6588_v41 = vpop.f32.mrf.mxu1  ;;  %v6590_v0 = vpop.f32.mrf.mxu0  ;;  %v6604_v5 = vadd.f32 %v6326_v8, %v5739_v22  ;;  %v6623_v22 = vadd.f32 %v6326_v8, %v5741_v53 }
 0x1fa   :  { %8727 = vst [vmem:[#allocation140_spill] sm:$0xff] %v6586_v6  ;;  %v6627_v6 = vadd.f32 %v6326_v8, %v5743_v54 }
 0x1fb   :  { %8728 = vst [vmem:[#allocation141_spill] sm:$0xff] %v6588_v41  ;;  %v8806_v41 = vld [vmem:[#allocation51_spill] sm:$0xff] }
 0x1fc   :  { %8729 = vst [vmem:[#allocation142_spill] sm:$0xff] %v6590_v0  ;;  %4608 = vmatmul.msk.f32.gmra.mxu1 %vm82_vm1, %v6594_v38  ;;  %4686 = vmatmul.msk.f32.gmra.mxu0 %vm82_vm1, %v6598_v52 }
 0x1fd   :  { %8730 = vst [vmem:[#allocation143_spill] sm:$0xff] %v6604_v5  ;;  %4634 = vmatmul.msk.f32.gmra.mxu2 %vm82_vm1, %v198_v7  ;;  %4663 = vmatmul.msk.f32.gmra.mxu3 %vm82_vm1, %v6604_v5  ;;  %v201_v7 = vadd.f32 %v6326_v8, %v5381_v2 }
 0x200   :  { %v6613_v43 = vpop.f32.mrf.mxu2  ;;  %v6615_v44 = vpop.f32.mrf.mxu3 }
 0x201   :  { %8731 = vst [vmem:[#allocation144_spill] sm:$0xff] %v6613_v43  ;;  %v6617_v49 = vpop.f32.mrf.mxu1  ;;  %v6619_v0 = vpop.f32.mrf.mxu0  ;;  %v6633_v43 = vadd.f32 %v6326_v8, %v5763_v45  ;;  %v6652_v45 = vadd.f32 %v6326_v8, %v5765_v29 }
 0x202   :  { %8732 = vst [vmem:[#allocation145_spill] sm:$0xff] %v6615_v44  ;;  %v6656_v44 = vadd.f32 %v6326_v8, %v5767_v13 }
 0x203   :  { %8733 = vst [vmem:[#allocation146_spill] sm:$0xff] %v6617_v49 }
 0x204   :  { %8734 = vst [vmem:[#allocation147_spill] sm:$0xff] %v6619_v0  ;;  %4609 = vmatmul.msk.f32.gmra.mxu1 %vm82_vm1, %v6623_v22  ;;  %4687 = vmatmul.msk.f32.gmra.mxu0 %vm82_vm1, %v6627_v6 }
 0x205   :  { %8735 = vst [vmem:[#allocation148_spill] sm:$0xff] %v6633_v43  ;;  %4635 = vmatmul.msk.f32.gmra.mxu2 %vm82_vm1, %v201_v7  ;;  %4664 = vmatmul.msk.f32.gmra.mxu3 %vm82_vm1, %v6633_v43  ;;  %v204_v7 = vadd.f32 %v6326_v8, %v5405_v10  ;;  %v8770_v43 = vld [vmem:[#allocation32_spill] sm:$0xff] }
 0x206   :  { %v6801_v5 = vadd.f32 %v6326_v8, %v8770_v43 }
 0x208   :  { %v6642_v53 = vpop.f32.mrf.mxu2  ;;  %v6644_v54 = vpop.f32.mrf.mxu3 }
 0x209   :  { %8736 = vst [vmem:[#allocation149_spill] sm:$0xff] %v6642_v53  ;;  %v6646_v2 = vpop.f32.mrf.mxu1  ;;  %v6648_v0 = vpop.f32.mrf.mxu0  ;;  %v6662_v53 = vadd.f32 %v6326_v8, %v5787_v61  ;;  %v6681_v61 = vadd.f32 %v6326_v8, %v5789_v32 }
 0x20a   :  { %8737 = vst [vmem:[#allocation150_spill] sm:$0xff] %v6644_v54  ;;  %v6685_v54 = vadd.f32 %v6326_v8, %v5791_v24 }
 0x20b   :  { %8738 = vst [vmem:[#allocation151_spill] sm:$0xff] %v6646_v2 }
 0x20c   :  { %8739 = vst [vmem:[#allocation152_spill] sm:$0xff] %v6648_v0  ;;  %4610 = vmatmul.msk.f32.gmra.mxu1 %vm82_vm1, %v6652_v45  ;;  %4688 = vmatmul.msk.f32.gmra.mxu0 %vm82_vm1, %v6656_v44 }
 0x20d   :  { %8740 = vst [vmem:[#allocation153_spill] sm:$0xff] %v6662_v53  ;;  %4636 = vmatmul.msk.f32.gmra.mxu2 %vm82_vm1, %v204_v7  ;;  %4665 = vmatmul.msk.f32.gmra.mxu3 %vm82_vm1, %v6662_v53  ;;  %v207_v7 = vadd.f32 %v6326_v8, %v5429_v18 }
 0x210   :  { %v6671_v13 = vpop.f32.mrf.mxu2  ;;  %v6673_v29 = vpop.f32.mrf.mxu3 }
 0x211   :  { %8741 = vst [vmem:[#allocation154_spill] sm:$0xff] %v6671_v13  ;;  %v6675_v10 = vpop.f32.mrf.mxu1  ;;  %v6677_v0 = vpop.f32.mrf.mxu0  ;;  %v6691_v13 = vadd.f32 %v6326_v8, %v5817_v60  ;;  %v6710_v60 = vadd.f32 %v6326_v8, %v5819_v16 }
 0x212   :  { %8742 = vst [vmem:[#allocation155_spill] sm:$0xff] %v6673_v29  ;;  %v6714_v29 = vadd.f32 %v6326_v8, %v5821_v63 }
 0x213   :  { %8743 = vst [vmem:[#allocation156_spill] sm:$0xff] %v6675_v10  ;;  %v8800_v10 = vld [vmem:[#allocation48_spill] sm:$0xff] }
 0x214   :  { %8744 = vst [vmem:[#allocation157_spill] sm:$0xff] %v6677_v0  ;;  %4611 = vmatmul.msk.f32.gmra.mxu1 %vm82_vm1, %v6681_v61  ;;  %4689 = vmatmul.msk.f32.gmra.mxu0 %vm82_vm1, %v6685_v54  ;;  %v6899_v2 = vadd.f32 %v6326_v8, %v8800_v10 }
 0x215   :  { %8745 = vst [vmem:[#allocation158_spill] sm:$0xff] %v6691_v13  ;;  %4637 = vmatmul.msk.f32.gmra.mxu2 %vm82_vm1, %v207_v7  ;;  %4666 = vmatmul.msk.f32.gmra.mxu3 %vm82_vm1, %v6691_v13  ;;  %v210_v7 = vadd.f32 %v6326_v8, %v5453_v26 }
 0x218   :  { %v6700_v24 = vpop.f32.mrf.mxu2  ;;  %v6702_v32 = vpop.f32.mrf.mxu3 }
 0x219   :  { %8746 = vst [vmem:[#allocation159_spill] sm:$0xff] %v6700_v24  ;;  %v6704_v18 = vpop.f32.mrf.mxu1  ;;  %v6706_v0 = vpop.f32.mrf.mxu0  ;;  %v6720_v24 = vadd.f32 %v6326_v8, %v5841_v47  ;;  %v6739_v47 = vadd.f32 %v6326_v8, %v5843_v39 }
 0x21a   :  { %8747 = vst [vmem:[#allocation160_spill] sm:$0xff] %v6702_v32  ;;  %v6743_v32 = vadd.f32 %v6326_v8, %v5845_v31 }
 0x21b   :  { %8748 = vst [vmem:[#allocation161_spill] sm:$0xff] %v6704_v18  ;;  %v8798_v18 = vld [vmem:[#allocation47_spill] sm:$0xff] }
 0x21c   :  { %8749 = vst [vmem:[#allocation162_spill] sm:$0xff] %v6706_v0  ;;  %4612 = vmatmul.msk.f32.gmra.mxu1 %vm82_vm1, %v6710_v60  ;;  %4690 = vmatmul.msk.f32.gmra.mxu0 %vm82_vm1, %v6714_v29 }
 0x21d   :  { %8750 = vst [vmem:[#allocation163_spill] sm:$0xff] %v6720_v24  ;;  %4638 = vmatmul.msk.f32.gmra.mxu2 %vm82_vm1, %v210_v7  ;;  %4667 = vmatmul.msk.f32.gmra.mxu3 %vm82_vm1, %v6720_v24  ;;  %v213_v7 = vadd.f32 %v6326_v8, %v5477_v34  ;;  %v8761_v24 = vld [vmem:[#allocation28_spill] sm:$0xff] }
 0x21e   :  { %v6772_v13 = vadd.f32 %v6326_v8, %v8761_v24 }
 0x220   :  { %v6729_v16 = vpop.f32.mrf.mxu2  ;;  %v6731_v63 = vpop.f32.mrf.mxu3 }
 0x221   :  { %8751 = vst [vmem:[#allocation164_spill] sm:$0xff] %v6729_v16  ;;  %v6733_v26 = vpop.f32.mrf.mxu1  ;;  %v6735_v0 = vpop.f32.mrf.mxu0  ;;  %v6749_v16 = vadd.f32 %v6326_v8, %v5865_v55  ;;  %v8760_v55 = vld [vmem:[#allocation27_spill] sm:$0xff] }
 0x222   :  { %8752 = vst [vmem:[#allocation165_spill] sm:$0xff] %v6731_v63  ;;  %v6768_v63 = vadd.f32 %v6326_v8, %v8760_v55 }
 0x223   :  { %8753 = vst [vmem:[#allocation166_spill] sm:$0xff] %v6733_v26 }
 0x224   :  { %8754 = vst [vmem:[#allocation167_spill] sm:$0xff] %v6735_v0  ;;  %4613 = vmatmul.msk.f32.gmra.mxu1 %vm82_vm1, %v6739_v47  ;;  %4691 = vmatmul.msk.f32.gmra.mxu0 %vm82_vm1, %v6743_v32 }
 0x225   :  { %8755 = vst [vmem:[#allocation168_spill] sm:$0xff] %v6749_v16  ;;  %4639 = vmatmul.msk.f32.gmra.mxu2 %vm82_vm1, %v213_v7  ;;  %4668 = vmatmul.msk.f32.gmra.mxu3 %vm82_vm1, %v6749_v16  ;;  %v8762_v7 = vld [vmem:[#allocation11_spill] sm:$0xff]  ;;  %v8763_v16 = vld [vmem:[#allocation30_spill] sm:$0xff] }
 0x226   :  { %v216_v53 = vadd.f32 %v6326_v8, %v8762_v7 }
 0x228   :  { %v6758_v31 = vpop.f32.mrf.mxu2  ;;  %v6760_v39 = vpop.f32.mrf.mxu3 }
 0x229   :  { %8756 = vst [vmem:[#allocation169_spill] sm:$0xff] %v6758_v31  ;;  %v6762_v34 = vpop.f32.mrf.mxu1  ;;  %v6764_v0 = vpop.f32.mrf.mxu0  ;;  %v6778_v31 = vadd.f32 %v6326_v8, %v8763_v16  ;;  %v8769_v16 = vld [vmem:[#allocation31_spill] sm:$0xff] }
 0x22a   :  { %8757 = vst [vmem:[#allocation170_spill] sm:$0xff] %v6760_v39  ;;  %v6797_v39 = vadd.f32 %v6326_v8, %v8769_v16 }
 0x22b   :  { %8758 = vst [vmem:[#allocation171_spill] sm:$0xff] %v6762_v34 }
 0x22c   :  { %8759 = vst [vmem:[#allocation172_spill] sm:$0xff] %v6764_v0  ;;  %4614 = vmatmul.msk.f32.gmra.mxu1 %vm82_vm1, %v6768_v63  ;;  %4692 = vmatmul.msk.f32.gmra.mxu0 %vm82_vm1, %v6772_v13 }
 0x22d   :  { %8764 = vst [vmem:[#allocation27_spill] sm:$0xff] %v6778_v31  ;;  %4640 = vmatmul.msk.f32.gmra.mxu2 %vm82_vm1, %v216_v53  ;;  %4669 = vmatmul.msk.f32.gmra.mxu3 %vm82_vm1, %v6778_v31  ;;  %v8771_v53 = vld [vmem:[#allocation13_spill] sm:$0xff]  ;;  %v8772_v31 = vld [vmem:[#allocation34_spill] sm:$0xff] }
 0x22e   :  { %v219_v51 = vadd.f32 %v6326_v8, %v8771_v53 }
 0x230   :  { %v6787_v24 = vpop.f32.mrf.mxu2  ;;  %v6789_v55 = vpop.f32.mrf.mxu3 }
 0x231   :  { %8765 = vst [vmem:[#allocation28_spill] sm:$0xff] %v6787_v24  ;;  %v6791_v7 = vpop.f32.mrf.mxu1  ;;  %v6793_v0 = vpop.f32.mrf.mxu0  ;;  %v6807_v24 = vadd.f32 %v6326_v8, %v8772_v31  ;;  %v8777_v31 = vld [vmem:[#allocation35_spill] sm:$0xff] }
 0x232   :  { %8766 = vst [vmem:[#allocation11_spill] sm:$0xff] %v6789_v55  ;;  %v6824_v55 = vadd.f32 %v6326_v8, %v8777_v31 }
 0x233   :  { %8767 = vst [vmem:[#allocation30_spill] sm:$0xff] %v6791_v7  ;;  %v8795_v7 = vld [vmem:[#allocation6_spill] sm:$0xff] }
 0x234   :  { %8768 = vst [vmem:[#allocation173_spill] sm:$0xff] %v6793_v0  ;;  %4615 = vmatmul.msk.f32.gmra.mxu1 %vm82_vm1, %v6797_v39  ;;  %4693 = vmatmul.msk.f32.gmra.mxu0 %vm82_vm1, %v6801_v5  ;;  %v228_v34 = vadd.f32 %v6326_v8, %v8795_v7 }
 0x235   :  { %8773 = vst [vmem:[#allocation31_spill] sm:$0xff] %v6807_v24  ;;  %4641 = vmatmul.msk.f32.gmra.mxu2 %vm82_vm1, %v219_v51  ;;  %4670 = vmatmul.msk.f32.gmra.mxu3 %vm82_vm1, %v6807_v24  ;;  %v222_v51 = vadd.f32 %v6326_v8, %v8779_v1  ;;  %v6834_v24 = vadd.f32 %v6326_v8, %v8780_v3  ;;  %v8785_v3 = vld [vmem:[#allocation39_spill] sm:$0xff] }
 0x236   :  { %8801 = vst [vmem:[#allocation6_spill] sm:$0xff] %v6899_v2 }
 0x237   :  { %8781 = vst [vmem:[#allocation35_spill] sm:$0xff] %v6834_v24 }
 0x238   :  { %v6816_v43 = vpop.f32.mrf.mxu2  ;;  %v2225_v16 = vpop.f32.mrf.mxu3 }
 0x239   :  { %8774 = vst [vmem:[#allocation32_spill] sm:$0xff] %v6816_v43  ;;  %v6818_v0 = vpop.f32.mrf.mxu1  ;;  %v6820_v53 = vpop.f32.mrf.mxu0  ;;  %v6851_v43 = vadd.f32 %v6326_v8, %v8785_v3 }
 0x23a   :  { %8775 = vst [vmem:[#allocation13_spill] sm:$0xff] %v6818_v0 }
 0x23b   :  { %8776 = vst [vmem:[#allocation34_spill] sm:$0xff] %v6820_v53 }
 0x23c   :  { %4616 = vmatmul.msk.f32.gmra.mxu1 %vm82_vm1, %v6824_v55  ;;  %4694 = vmatmul.msk.f32.gmra.mxu0 %vm82_vm1, %v6828_v19  ;;  %8786 = vst [vmem:[#allocation39_spill] sm:$0xff] %v6851_v43 }
 0x23d   :  { %4642 = vmatmul.msk.f32.gmra.mxu2 %vm82_vm1, %v222_v51  ;;  %4671 = vmatmul.msk.f32.gmra.mxu3 %vm82_vm1, %v6834_v24  ;;  %v225_v51 = vadd.f32 %v6326_v8, %v8788_v15  ;;  %v6861_v24 = vadd.f32 %v6326_v8, %v8789_v28 }
 0x23f   :  { %8790 = vst [vmem:[#allocation40_spill] sm:$0xff] %v6861_v24 }
 0x240   :  { %v6843_v35 = vpop.f32.mrf.mxu2  ;;  %v2228_v31 = vpop.f32.mrf.mxu3 }
 0x241   :  { %8782 = vst [vmem:[#allocation36_spill] sm:$0xff] %v6843_v35  ;;  %v6845_v53 = vpop.f32.mrf.mxu1  ;;  %v6847_v1 = vpop.f32.mrf.mxu0  ;;  %v8792_v35 = vld [vmem:[#allocation43_spill] sm:$0xff] }
 0x242   :  { %8783 = vst [vmem:[#allocation2_spill] sm:$0xff] %v6845_v53  ;;  %v6874_v28 = vadd.f32 %v6326_v8, %v8792_v35  ;;  %v8794_v53 = vld [vmem:[#allocation44_spill] sm:$0xff] }
 0x243   :  { %8784 = vst [vmem:[#allocation38_spill] sm:$0xff] %v6847_v1  ;;  %v6878_v0 = vadd.f32 %v6326_v8, %v8794_v53 }
 0x244   :  { %4617 = vmatmul.msk.f32.gmra.mxu1 %vm82_vm1, %v6851_v43  ;;  %4695 = vmatmul.msk.f32.gmra.mxu0 %vm82_vm1, %v6855_v42  ;;  %8793 = vst [vmem:[#allocation42_spill] sm:$0xff] %v6874_v28 }
 0x245   :  { %4643 = vmatmul.msk.f32.gmra.mxu2 %vm82_vm1, %v225_v51  ;;  %4672 = vmatmul.msk.f32.gmra.mxu3 %vm82_vm1, %v6861_v24  ;;  %v8796_v51 = vld [vmem:[#allocation46_spill] sm:$0xff] }
 0x246   :  { %v6884_v26 = vadd.f32 %v6326_v8, %v8796_v51  ;;  %v6895_v51 = vadd.f32 %v6326_v8, %v8798_v18 }
 0x248   :  { %v6870_v59 = vpop.f32.mrf.mxu2  ;;  %v2231_v3 = vpop.f32.mrf.mxu3  ;;  %8797 = vst [vmem:[#allocation43_spill] sm:$0xff] %v6884_v26 }
 0x249   :  { %8791 = vst [vmem:[#allocation4_spill] sm:$0xff] %v6870_v59  ;;  %v1886_v1 = vpop.f32.mrf.mxu1  ;;  %v2420_v15 = vpop.f32.mrf.mxu0 }
 0x24a   :  { %8799 = vst [vmem:[#allocation44_spill] sm:$0xff] %v6895_v51 }
 0x24c   :  { %4618 = vmatmul.msk.f32.gmra.mxu1 %vm82_vm1, %v6874_v28  ;;  %4696 = vmatmul.msk.f32.gmra.mxu0 %vm82_vm1, %v6878_v0  ;;  %v8802_v28 = vld [vmem:[#allocation8_spill] sm:$0xff] }
 0x24d   :  { %4644 = vmatmul.msk.f32.gmra.mxu2 %vm82_vm1, %v228_v34  ;;  %4673 = vmatmul.msk.f32.gmra.mxu3 %vm82_vm1, %v6884_v26  ;;  %v231_v49 = vadd.f32 %v6326_v8, %v8802_v28  ;;  %v8803_v34 = vld [vmem:[#allocation50_spill] sm:$0xff] }
 0x24e   :  { %v6905_v43 = vadd.f32 %v6326_v8, %v8803_v34 }
 0x250   :  { %v2055_v53 = vpop.f32.mrf.mxu2  ;;  %v2234_v35 = vpop.f32.mrf.mxu3  ;;  %8804 = vst [vmem:[#allocation46_spill] sm:$0xff] %v6905_v43 }
 0x251   :  { %v2056_v59 = vadd.f32 %v2055_v53, %v1886_v1  ;;  %v1889_v24 = vpop.f32.mrf.mxu1  ;;  %v2423_v7 = vpop.f32.mrf.mxu0 }
 0x253   :  { %v2300_v26 = vadd.f32 %v2225_v16, %v2056_v59  ;;  %v6918_v16 = vadd.f32 %v6326_v8, %v8806_v41  ;;  %v8808_v59 = vld [vmem:[#allocation52_spill] sm:$0xff] }
 0x254   :  { %4619 = vmatmul.msk.f32.gmra.mxu1 %vm82_vm1, %v6895_v51  ;;  %4697 = vmatmul.msk.f32.gmra.mxu0 %vm82_vm1, %v6899_v2  ;;  %v6922_v51 = vadd.f32 %v6326_v8, %v8808_v59  ;;  %v8814_v2 = vld [vmem:[#allocation55_spill] sm:$0xff] }
 0x255   :  { %v6911_v18 = vadd.f32 %v2420_v15, %v2300_v26  ;;  %4645 = vmatmul.msk.f32.gmra.mxu2 %vm82_vm1, %v231_v49  ;;  %4674 = vmatmul.msk.f32.gmra.mxu3 %vm82_vm1, %v6905_v43  ;;  %8807 = vst [vmem:[#allocation48_spill] sm:$0xff] %v6918_v16  ;;  %v8810_v26 = vld [vmem:[#allocation10_spill] sm:$0xff] }
 0x256   :  { %8809 = vst [vmem:[#allocation8_spill] sm:$0xff] %v6922_v51  ;;  %v234_v15 = vadd.f32 %v6326_v8, %v8810_v26  ;;  %v8811_v49 = vld [vmem:[#allocation54_spill] sm:$0xff] }
 0x257   :  { %8805 = vst [vmem:[#allocation47_spill] sm:$0xff] %v6911_v18  ;;  %v6928_v18 = vadd.f32 %v6326_v8, %v8811_v49 }
 0x258   :  { %v2058_v10 = vpop.f32.mrf.mxu2  ;;  %v2237_v1 = vpop.f32.mrf.mxu3 }
 0x259   :  { %v2059_v28 = vadd.f32 %v2058_v10, %v1889_v24  ;;  %v1892_v53 = vpop.f32.mrf.mxu1  ;;  %v2426_v34 = vpop.f32.mrf.mxu0  ;;  %8812 = vst [vmem:[#allocation50_spill] sm:$0xff] %v6928_v18 }
 0x25b   :  { %v2301_v43 = vadd.f32 %v2228_v31, %v2059_v28  ;;  %v6941_v31 = vadd.f32 %v6326_v8, %v8814_v2  ;;  %v8816_v28 = vld [vmem:[#allocation56_spill] sm:$0xff] }
 0x25c   :  { %4620 = vmatmul.msk.f32.gmra.mxu1 %vm82_vm1, %v6918_v16  ;;  %4698 = vmatmul.msk.f32.gmra.mxu0 %vm82_vm1, %v6922_v51  ;;  %v6945_v16 = vadd.f32 %v6326_v8, %v8816_v28  ;;  %v8822_v51 = vld [vmem:[#allocation59_spill] sm:$0xff] }
 0x25d   :  { %v6934_v41 = vadd.f32 %v2423_v7, %v2301_v43  ;;  %4646 = vmatmul.msk.f32.gmra.mxu2 %vm82_vm1, %v234_v15  ;;  %4675 = vmatmul.msk.f32.gmra.mxu3 %vm82_vm1, %v6928_v18  ;;  %8815 = vst [vmem:[#allocation52_spill] sm:$0xff] %v6941_v31  ;;  %v8818_v43 = vld [vmem:[#allocation12_spill] sm:$0xff]  ;;  %v8819_v15 = vld [vmem:[#allocation58_spill] sm:$0xff] }
 0x25e   :  { %8817 = vst [vmem:[#allocation10_spill] sm:$0xff] %v6945_v16  ;;  %v237_v7 = vadd.f32 %v6326_v8, %v8818_v43 }
 0x25f   :  { %8813 = vst [vmem:[#allocation51_spill] sm:$0xff] %v6934_v41  ;;  %v6951_v41 = vadd.f32 %v6326_v8, %v8819_v15 }
 0x260   :  { %v2061_v24 = vpop.f32.mrf.mxu2  ;;  %v2240_v10 = vpop.f32.mrf.mxu3 }
 0x261   :  { %v2062_v59 = vadd.f32 %v2061_v24, %v1892_v53  ;;  %v1895_v26 = vpop.f32.mrf.mxu1  ;;  %v2429_v49 = vpop.f32.mrf.mxu0  ;;  %8820 = vst [vmem:[#allocation54_spill] sm:$0xff] %v6951_v41 }
 0x263   :  { %v2302_v18 = vadd.f32 %v2231_v3, %v2062_v59  ;;  %v6964_v3 = vadd.f32 %v6326_v8, %v8822_v51  ;;  %v8824_v59 = vld [vmem:[#allocation60_spill] sm:$0xff] }
 0x264   :  { %4621 = vmatmul.msk.f32.gmra.mxu1 %vm82_vm1, %v6941_v31  ;;  %4699 = vmatmul.msk.f32.gmra.mxu0 %vm82_vm1, %v6945_v16  ;;  %v6968_v31 = vadd.f32 %v6326_v8, %v8824_v59  ;;  %v8830_v16 = vld [vmem:[#allocation63_spill] sm:$0xff] }
 0x265   :  { %v6957_v2 = vadd.f32 %v2426_v34, %v2302_v18  ;;  %4647 = vmatmul.msk.f32.gmra.mxu2 %vm82_vm1, %v237_v7  ;;  %4676 = vmatmul.msk.f32.gmra.mxu3 %vm82_vm1, %v6951_v41  ;;  %8823 = vst [vmem:[#allocation56_spill] sm:$0xff] %v6964_v3  ;;  %v8826_v18 = vld [vmem:[#allocation14_spill] sm:$0xff] }
 0x266   :  { %8825 = vst [vmem:[#allocation12_spill] sm:$0xff] %v6968_v31  ;;  %v240_v34 = vadd.f32 %v6326_v8, %v8826_v18  ;;  %v8827_v7 = vld [vmem:[#allocation62_spill] sm:$0xff] }
 0x267   :  { %8821 = vst [vmem:[#allocation55_spill] sm:$0xff] %v6957_v2  ;;  %v6974_v2 = vadd.f32 %v6326_v8, %v8827_v7 }
 0x268   :  { %v2064_v53 = vpop.f32.mrf.mxu2  ;;  %v2243_v24 = vpop.f32.mrf.mxu3 }
 0x269   :  { %v2065_v28 = vadd.f32 %v2064_v53, %v1895_v26  ;;  %v1898_v43 = vpop.f32.mrf.mxu1  ;;  %v2432_v15 = vpop.f32.mrf.mxu0  ;;  %8828 = vst [vmem:[#allocation58_spill] sm:$0xff] %v6974_v2 }
 0x26b   :  { %v2303_v41 = vadd.f32 %v2234_v35, %v2065_v28  ;;  %v6987_v35 = vadd.f32 %v6326_v8, %v8830_v16  ;;  %v8832_v28 = vld [vmem:[#allocation64_spill] sm:$0xff] }
 0x26c   :  { %4622 = vmatmul.msk.f32.gmra.mxu1 %vm82_vm1, %v6964_v3  ;;  %4700 = vmatmul.msk.f32.gmra.mxu0 %vm82_vm1, %v6968_v31  ;;  %v6991_v3 = vadd.f32 %v6326_v8, %v8832_v28  ;;  %v8837_v31 = vld [vmem:[#allocation67_spill] sm:$0xff] }
 0x26d   :  { %v6980_v51 = vadd.f32 %v2429_v49, %v2303_v41  ;;  %4648 = vmatmul.msk.f32.gmra.mxu2 %vm82_vm1, %v240_v34  ;;  %4677 = vmatmul.msk.f32.gmra.mxu3 %vm82_vm1, %v6974_v2  ;;  %8831 = vst [vmem:[#allocation60_spill] sm:$0xff] %v6987_v35  ;;  %v8833_v41 = vld [vmem:[#allocation3_spill] sm:$0xff]  ;;  %v8834_v34 = vld [vmem:[#allocation66_spill] sm:$0xff] }
 0x26e   :  { %v243_v49 = vadd.f32 %v6326_v8, %v8833_v41 }
 0x26f   :  { %8829 = vst [vmem:[#allocation59_spill] sm:$0xff] %v6980_v51  ;;  %v6997_v51 = vadd.f32 %v6326_v8, %v8834_v34 }
 0x270   :  { %v2067_v26 = vpop.f32.mrf.mxu2  ;;  %v2246_v53 = vpop.f32.mrf.mxu3 }
 0x271   :  { %v2068_v59 = vadd.f32 %v2067_v26, %v1898_v43  ;;  %v1901_v18 = vpop.f32.mrf.mxu1  ;;  %v2435_v7 = vpop.f32.mrf.mxu0  ;;  %8835 = vst [vmem:[#allocation14_spill] sm:$0xff] %v6997_v51 }
 0x273   :  { %v2304_v2 = vadd.f32 %v2237_v1, %v2068_v59  ;;  %v7010_v1 = vadd.f32 %v6326_v8, %v8837_v31  ;;  %v8839_v59 = vld [vmem:[#allocation68_spill] sm:$0xff]  ;;  %v5024_v31 = vld [vmem:[%s8451_s11 + $0x8] sm:$0xff] }
 0x274   :  { %4623 = vmatmul.msk.f32.gmra.mxu1 %vm82_vm1, %v6987_v35  ;;  %4701 = vmatmul.msk.f32.gmra.mxu0 %vm82_vm1, %v6991_v3  ;;  %v7014_v35 = vadd.f32 %v6326_v8, %v8839_v59 }
 0x275   :  { %v7003_v16 = vadd.f32 %v2432_v15, %v2304_v2  ;;  %4649 = vmatmul.msk.f32.gmra.mxu2 %vm82_vm1, %v243_v49  ;;  %4678 = vmatmul.msk.f32.gmra.mxu3 %vm82_vm1, %v6997_v51  ;;  %8838 = vst [vmem:[#allocation63_spill] sm:$0xff] %v7010_v1  ;;  %v8841_v2 = vld [vmem:[#allocation5_spill] sm:$0xff]  ;;  %v8843_v51 = vld [vmem:[#allocation71_spill] sm:$0xff] }
 0x276   :  { %8840 = vst [vmem:[#allocation64_spill] sm:$0xff] %v7014_v35  ;;  %v246_v15 = vadd.f32 %v6326_v8, %v8841_v2 }
 0x277   :  { %8836 = vst [vmem:[#allocation62_spill] sm:$0xff] %v7003_v16 }
 0x278   :  { %v2070_v43 = vpop.f32.mrf.mxu2  ;;  %v2249_v26 = vpop.f32.mrf.mxu3 }
 0x279   :  { %v2071_v28 = vadd.f32 %v2070_v43, %v1901_v18  ;;  %v1904_v41 = vpop.f32.mrf.mxu1  ;;  %v2438_v34 = vpop.f32.mrf.mxu0 }
 0x27b   :  { %v2305_v49 = vadd.f32 %v2240_v10, %v2071_v28 }
 0x27c   :  { %4624 = vmatmul.msk.f32.gmra.mxu1 %vm82_vm1, %v7010_v1  ;;  %4702 = vmatmul.msk.f32.gmra.mxu0 %vm82_vm1, %v7014_v35 }
 0x27d   :  { %v7022_v18 = vadd.f32 %v2435_v7, %v2305_v49  ;;  %4650 = vmatmul.msk.f32.gmra.mxu2 %vm82_vm1, %v246_v15  ;;  %4758 = vmatmul.msk.f32.vlgmr.msra.gmra.mxu3 %vm82_vm1, %v6418_v48  ;;  %v7033_v7 = vadd.f32 %v6326_v8, %v8843_v51  ;;  %v8845_v49 = vld [vmem:[#allocation72_spill] sm:$0xff]  ;;  %v8846_v48 = vld [vmem:[#allocation7_spill] sm:$0xff] }
 0x27e   :  { %4965 = vmatpush.msk.msra.mxu3 %vm158_vm0, %v5024_v31  ;;  %v7037_v15 = vadd.f32 %v6326_v8, %v8845_v49 }
 0x27f   :  { %8842 = vst [vmem:[#allocation3_spill] sm:$0xff] %v7022_v18  ;;  %v249_v18 = vadd.f32 %v6326_v8, %v8846_v48  ;;  %v8848_v48 = vld [vmem:[#allocation75_spill] sm:$0xff] }
 0x280   :  { %v2073_v10 = vpop.f32.mrf.mxu2  ;;  %v2252_v43 = vpop.f32.mrf.mxu3  ;;  %8844 = vst [vmem:[#allocation66_spill] sm:$0xff] %v7033_v7 }
 0x281   :  { %v2074_v28 = vadd.f32 %v2073_v10, %v1904_v41  ;;  %v1907_v59 = vpop.f32.mrf.mxu1  ;;  %v2441_v2 = vpop.f32.mrf.mxu0 }
 0x283   :  { %v2306_v1 = vadd.f32 %v2243_v24, %v2074_v28  ;;  %v7052_v24 = vadd.f32 %v6326_v8, %v8848_v48  ;;  %v8850_v28 = vld [vmem:[#allocation76_spill] sm:$0xff] }
 0x284   :  { %4625 = vmatmul.msk.f32.gmra.mxu1 %vm82_vm1, %v7033_v7  ;;  %4703 = vmatmul.msk.f32.gmra.mxu0 %vm82_vm1, %v7037_v15  ;;  %v7056_v7 = vadd.f32 %v6326_v8, %v8850_v28 }
 0x285   :  { %v7045_v41 = vadd.f32 %v2438_v34, %v2306_v1  ;;  %4651 = vmatmul.msk.f32.gmra.mxu2 %vm82_vm1, %v249_v18  ;;  %4759 = vmatmul.msk.f32.gmra.mxu3 %vm82_vm1, %v6453_v27  ;;  %8849 = vst [vmem:[#allocation68_spill] sm:$0xff] %v7052_v24  ;;  %v8852_v34 = vld [vmem:[#allocation9_spill] sm:$0xff] }
 0x286   :  { %8851 = vst [vmem:[#allocation5_spill] sm:$0xff] %v7056_v7  ;;  %v252_v1 = vadd.f32 %v6326_v8, %v8852_v34  ;;  %v8854_v34 = vld [vmem:[#allocation15_spill] sm:$0xff] }
 0x287   :  { %8847 = vst [vmem:[#allocation67_spill] sm:$0xff] %v7045_v41 }
 0x288   :  { %v2076_v51 = vpop.f32.mrf.mxu2  ;;  %v2255_v31 = vpop.f32.mrf.mxu3 }
 0x289   :  { %v2077_v10 = vadd.f32 %v2076_v51, %v1907_v59  ;;  %v1910_v49 = vpop.f32.mrf.mxu1  ;;  %v2444_v16 = vpop.f32.mrf.mxu0 }
 0x28b   :  { %v2307_v18 = vadd.f32 %v2246_v53, %v2077_v10  ;;  %v564_v53 = vadd.f32 %v6326_v8, %v8854_v34  ;;  %v8855_v10 = vld [vmem:[#allocation79_spill] sm:$0xff] }
 0x28c   :  { %4626 = vmatmul.msk.f32.gmra.mxu1 %vm82_vm1, %v7052_v24  ;;  %4704 = vmatmul.msk.f32.gmra.mxu0 %vm82_vm1, %v7056_v7  ;;  %v7073_v24 = vadd.f32 %v6326_v8, %v8855_v10 }
 0x28d   :  { %v7064_v59 = vadd.f32 %v2441_v2, %v2307_v18  ;;  %4652 = vmatmul.msk.f32.gmra.mxu2 %vm82_vm1, %v252_v1  ;;  %4760 = vmatmul.msk.f32.gmra.mxu3 %vm82_vm1, %v6482_v57  ;;  %v8857_v18 = vld [vmem:[#allocation16_spill] sm:$0xff] }
 0x28f   :  { %8853 = vst [vmem:[#allocation71_spill] sm:$0xff] %v7064_v59  ;;  %v8975_v59 = vld [vmem:[#allocation97_spill] sm:$0xff] }
 0x290   :  { %v2079_v51 = vpop.f32.mrf.mxu2  ;;  %v2258_v48 = vpop.f32.mrf.mxu3 }
 0x291   :  { %v2080_v28 = vadd.f32 %v2079_v51, %v1910_v49  ;;  %v1913_v27 = vpop.f32.mrf.mxu1  ;;  %v2447_v41 = vpop.f32.mrf.mxu0  ;;  %v5025_v49 = vld [vmem:[%s8451_s11] sm:$0xff]  ;;  %v567_v51 = vadd.f32 %v6326_v8, %v8857_v18  ;;  %v8861_v18 = vld [vmem:[#allocation17_spill] sm:$0xff] }
 0x293   :  { %v2308_v7 = vadd.f32 %v2249_v26, %v2080_v28  ;;  %v8858_v28 = vld [vmem:[#allocation83_spill] sm:$0xff] }
 0x294   :  { %4706 = vmatmul.msk.f32.vlgmr.msra.gmra.mxu1 %vm82_vm1, %v564_v53  ;;  %4784 = vmatmul.msk.f32.vlgmr.msra.gmra.mxu0 %vm82_vm1, %v7073_v24  ;;  %v7096_v34 = vadd.f32 %v6326_v8, %v8858_v28 }
 0x295   :  { %v7078_v2 = vadd.f32 %v2444_v16, %v2308_v7  ;;  %4732 = vmatmul.msk.f32.vlgmr.msra.gmra.mxu2 %vm82_vm1, %v6414_v56  ;;  %4761 = vmatmul.msk.f32.gmra.mxu3 %vm82_vm1, %v6511_v4 }
 0x296   :  { %4939 = vmatpush.msk.msra.mxu2 %vm158_vm0, %v5025_v49  ;;  %4913 = vmatpush.msk.msra.mxu1 %vm158_vm0, %v5722_v11  ;;  %8859 = vst [vmem:[#allocation7_spill] sm:$0xff] %v7096_v34 }
 0x297   :  { %8856 = vst [vmem:[#allocation72_spill] sm:$0xff] %v7078_v2  ;;  %4991 = vmatpush.msk.msra.mxu0 %vm158_vm0, %v5729_v12  ;;  %v8980_v2 = vld [vmem:[#allocation101_spill] sm:$0xff] }
 0x298   :  { %v2082_v16 = vpop.f32.mrf.mxu2  ;;  %v2261_v26 = vpop.f32.mrf.mxu3 }
 0x299   :  { %v2083_v7 = vadd.f32 %v2082_v16, %v1913_v27  ;;  %v1916_v1 = vpop.f32.mrf.mxu1  ;;  %v2450_v56 = vpop.f32.mrf.mxu0 }
 0x29b   :  { %v2309_v53 = vadd.f32 %v2252_v43, %v2083_v7  ;;  %v570_v43 = vadd.f32 %v6326_v8, %v8861_v18  ;;  %v8862_v7 = vld [vmem:[#allocation87_spill] sm:$0xff] }
 0x29c   :  { %4707 = vmatmul.msk.f32.gmra.mxu1 %vm82_vm1, %v567_v51  ;;  %4785 = vmatmul.msk.f32.gmra.mxu0 %vm82_vm1, %v7096_v34  ;;  %v7111_v51 = vadd.f32 %v6326_v8, %v8862_v7  ;;  %v8865_v7 = vld [vmem:[#allocation18_spill] sm:$0xff]  ;;  %v8957_v34 = vld [vmem:[#allocation13_spill] sm:$0xff] }
 0x29d   :  { %v7101_v11 = vadd.f32 %v2447_v41, %v2309_v53  ;;  %4733 = vmatmul.msk.f32.gmra.mxu2 %vm82_vm1, %v6449_v37  ;;  %4762 = vmatmul.msk.f32.gmra.mxu3 %vm82_vm1, %v6540_v20 }
 0x29e   :  { %8863 = vst [vmem:[#allocation76_spill] sm:$0xff] %v7111_v51 }
 0x29f   :  { %8860 = vst [vmem:[#allocation75_spill] sm:$0xff] %v7101_v11  ;;  %v8984_v11 = vld [vmem:[#allocation105_spill] sm:$0xff] }
 0x2a0   :  { %v2085_v12 = vpop.f32.mrf.mxu2  ;;  %v2264_v27 = vpop.f32.mrf.mxu3 }
 0x2a1   :  { %v2086_v10 = vadd.f32 %v2085_v12, %v1916_v1  ;;  %v1919_v49 = vpop.f32.mrf.mxu1  ;;  %v2453_v16 = vpop.f32.mrf.mxu0 }
 0x2a3   :  { %v2310_v41 = vadd.f32 %v2255_v31, %v2086_v10  ;;  %v573_v31 = vadd.f32 %v6326_v8, %v8865_v7  ;;  %v8866_v10 = vld [vmem:[#allocation91_spill] sm:$0xff] }
 0x2a4   :  { %4708 = vmatmul.msk.f32.gmra.mxu1 %vm82_vm1, %v570_v43  ;;  %4786 = vmatmul.msk.f32.gmra.mxu0 %vm82_vm1, %v7111_v51  ;;  %v7126_v43 = vadd.f32 %v6326_v8, %v8866_v10  ;;  %v8869_v51 = vld [vmem:[#allocation19_spill] sm:$0xff] }
 0x2a5   :  { %v7116_v37 = vadd.f32 %v2450_v56, %v2310_v41  ;;  %4734 = vmatmul.msk.f32.gmra.mxu2 %vm82_vm1, %v6478_v14  ;;  %4763 = vmatmul.msk.f32.gmra.mxu3 %vm82_vm1, %v6569_v36 }
 0x2a6   :  { %8867 = vst [vmem:[#allocation15_spill] sm:$0xff] %v7126_v43 }
 0x2a7   :  { %8864 = vst [vmem:[#allocation9_spill] sm:$0xff] %v7116_v37  ;;  %v8988_v37 = vld [vmem:[#allocation109_spill] sm:$0xff] }
 0x2a8   :  { %v2088_v1 = vpop.f32.mrf.mxu2  ;;  %v2267_v28 = vpop.f32.mrf.mxu3 }
 0x2a9   :  { %v2089_v53 = vadd.f32 %v2088_v1, %v1919_v49  ;;  %v1922_v12 = vpop.f32.mrf.mxu1  ;;  %v2456_v18 = vpop.f32.mrf.mxu0 }
 0x2ab   :  { %v2311_v56 = vadd.f32 %v2258_v48, %v2089_v53  ;;  %v576_v48 = vadd.f32 %v6326_v8, %v8869_v51  ;;  %v8870_v53 = vld [vmem:[#allocation95_spill] sm:$0xff] }
 0x2ac   :  { %4709 = vmatmul.msk.f32.gmra.mxu1 %vm82_vm1, %v573_v31  ;;  %4787 = vmatmul.msk.f32.gmra.mxu0 %vm82_vm1, %v7126_v43  ;;  %v7141_v31 = vadd.f32 %v6326_v8, %v8870_v53  ;;  %v8873_v43 = vld [vmem:[#allocation20_spill] sm:$0xff] }
 0x2ad   :  { %v7131_v14 = vadd.f32 %v2453_v16, %v2311_v56  ;;  %4735 = vmatmul.msk.f32.gmra.mxu2 %vm82_vm1, %v6507_v30  ;;  %4764 = vmatmul.msk.f32.gmra.mxu3 %vm82_vm1, %v6598_v52 }
 0x2ae   :  { %8871 = vst [vmem:[#allocation16_spill] sm:$0xff] %v7141_v31 }
 0x2af   :  { %8868 = vst [vmem:[#allocation79_spill] sm:$0xff] %v7131_v14  ;;  %v8992_v14 = vld [vmem:[#allocation113_spill] sm:$0xff] }
 0x2b0   :  { %v2091_v49 = vpop.f32.mrf.mxu2  ;;  %v2270_v41 = vpop.f32.mrf.mxu3 }
 0x2b1   :  { %v2092_v1 = vadd.f32 %v2091_v49, %v1922_v12  ;;  %v1925_v7 = vpop.f32.mrf.mxu1  ;;  %v2459_v10 = vpop.f32.mrf.mxu0 }
 0x2b3   :  { %v2312_v16 = vadd.f32 %v2261_v26, %v2092_v1  ;;  %v579_v26 = vadd.f32 %v6326_v8, %v8873_v43  ;;  %v8874_v1 = vld [vmem:[#allocation99_spill] sm:$0xff] }
 0x2b4   :  { %4710 = vmatmul.msk.f32.gmra.mxu1 %vm82_vm1, %v576_v48  ;;  %4788 = vmatmul.msk.f32.gmra.mxu0 %vm82_vm1, %v7141_v31  ;;  %v7156_v48 = vadd.f32 %v6326_v8, %v8874_v1  ;;  %v8877_v31 = vld [vmem:[#allocation21_spill] sm:$0xff] }
 0x2b5   :  { %v7146_v30 = vadd.f32 %v2456_v18, %v2312_v16  ;;  %4736 = vmatmul.msk.f32.gmra.mxu2 %vm82_vm1, %v6536_v46  ;;  %4765 = vmatmul.msk.f32.gmra.mxu3 %vm82_vm1, %v6627_v6 }
 0x2b6   :  { %8875 = vst [vmem:[#allocation17_spill] sm:$0xff] %v7156_v48 }
 0x2b7   :  { %8872 = vst [vmem:[#allocation83_spill] sm:$0xff] %v7146_v30  ;;  %v8996_v30 = vld [vmem:[#allocation118_spill] sm:$0xff] }
 0x2b8   :  { %v2094_v12 = vpop.f32.mrf.mxu2  ;;  %v2273_v51 = vpop.f32.mrf.mxu3 }
 0x2b9   :  { %v2095_v56 = vadd.f32 %v2094_v12, %v1925_v7  ;;  %v1928_v49 = vpop.f32.mrf.mxu1  ;;  %v2462_v53 = vpop.f32.mrf.mxu0 }
 0x2bb   :  { %v2313_v18 = vadd.f32 %v2264_v27, %v2095_v56  ;;  %v582_v27 = vadd.f32 %v6326_v8, %v8877_v31  ;;  %v7171_v56 = vadd.f32 %v6326_v8, %v6328_v23 }
 0x2bc   :  { %4711 = vmatmul.msk.f32.gmra.mxu1 %vm82_vm1, %v579_v26  ;;  %4789 = vmatmul.msk.f32.gmra.mxu0 %vm82_vm1, %v7156_v48 }
 0x2bd   :  { %v7161_v46 = vadd.f32 %v2459_v10, %v2313_v18  ;;  %4737 = vmatmul.msk.f32.gmra.mxu2 %vm82_vm1, %v6565_v62  ;;  %4766 = vmatmul.msk.f32.gmra.mxu3 %vm82_vm1, %v6656_v44  ;;  %8878 = vst [vmem:[#allocation18_spill] sm:$0xff] %v7171_v56 }
 0x2bf   :  { %8876 = vst [vmem:[#allocation87_spill] sm:$0xff] %v7161_v46  ;;  %v9000_v46 = vld [vmem:[#allocation123_spill] sm:$0xff] }
 0x2c0   :  { %v2097_v7 = vpop.f32.mrf.mxu2  ;;  %v2276_v43 = vpop.f32.mrf.mxu3 }
 0x2c1   :  { %v2098_v16 = vadd.f32 %v2097_v7, %v1928_v49  ;;  %v1931_v12 = vpop.f32.mrf.mxu1  ;;  %v2465_v1 = vpop.f32.mrf.mxu0  ;;  %v8880_v7 = vld [vmem:[#allocation22_spill] sm:$0xff] }
 0x2c3   :  { %v2314_v10 = vadd.f32 %v2267_v28, %v2098_v16  ;;  %v585_v28 = vadd.f32 %v6326_v8, %v8880_v7  ;;  %v7186_v16 = vadd.f32 %v6326_v8, %v6356_v50  ;;  %v8883_v7 = vld [vmem:[#allocation23_spill] sm:$0xff] }
 0x2c4   :  { %4712 = vmatmul.msk.f32.gmra.mxu1 %vm82_vm1, %v582_v27  ;;  %4790 = vmatmul.msk.f32.gmra.mxu0 %vm82_vm1, %v7171_v56 }
 0x2c5   :  { %v7176_v62 = vadd.f32 %v2462_v53, %v2314_v10  ;;  %4738 = vmatmul.msk.f32.gmra.mxu2 %vm82_vm1, %v6594_v38  ;;  %4767 = vmatmul.msk.f32.gmra.mxu3 %vm82_vm1, %v6685_v54  ;;  %8881 = vst [vmem:[#allocation19_spill] sm:$0xff] %v7186_v16 }
 0x2c7   :  { %8879 = vst [vmem:[#allocation91_spill] sm:$0xff] %v7176_v62  ;;  %v9004_v62 = vld [vmem:[#allocation127_spill] sm:$0xff] }
 0x2c8   :  { %v2100_v49 = vpop.f32.mrf.mxu2  ;;  %v2279_v31 = vpop.f32.mrf.mxu3 }
 0x2c9   :  { %v2101_v26 = vadd.f32 %v2100_v49, %v1931_v12  ;;  %v1934_v18 = vpop.f32.mrf.mxu1  ;;  %v2468_v23 = vpop.f32.mrf.mxu0 }
 0x2cb   :  { %v2315_v53 = vadd.f32 %v2270_v41, %v2101_v26  ;;  %v588_v41 = vadd.f32 %v6326_v8, %v8883_v7  ;;  %v7201_v26 = vadd.f32 %v6326_v8, %v6382_v21  ;;  %v8886_v7 = vld [vmem:[#allocation24_spill] sm:$0xff] }
 0x2cc   :  { %4713 = vmatmul.msk.f32.gmra.mxu1 %vm82_vm1, %v585_v28  ;;  %4791 = vmatmul.msk.f32.gmra.mxu0 %vm82_vm1, %v7186_v16 }
 0x2cd   :  { %v7191_v38 = vadd.f32 %v2465_v1, %v2315_v53  ;;  %4739 = vmatmul.msk.f32.gmra.mxu2 %vm82_vm1, %v6623_v22  ;;  %4768 = vmatmul.msk.f32.gmra.mxu3 %vm82_vm1, %v6714_v29  ;;  %8884 = vst [vmem:[#allocation20_spill] sm:$0xff] %v7201_v26 }
 0x2cf   :  { %8882 = vst [vmem:[#allocation95_spill] sm:$0xff] %v7191_v38  ;;  %v9008_v38 = vld [vmem:[#allocation131_spill] sm:$0xff] }
 0x2d0   :  { %v2103_v12 = vpop.f32.mrf.mxu2  ;;  %v2282_v27 = vpop.f32.mrf.mxu3 }
 0x2d1   :  { %v2104_v10 = vadd.f32 %v2103_v12, %v1934_v18  ;;  %v1937_v49 = vpop.f32.mrf.mxu1  ;;  %v2471_v50 = vpop.f32.mrf.mxu0 }
 0x2d3   :  { %v2316_v1 = vadd.f32 %v2273_v51, %v2104_v10  ;;  %v591_v51 = vadd.f32 %v6326_v8, %v8886_v7  ;;  %v7216_v10 = vadd.f32 %v6326_v8, %v6408_v40  ;;  %v8889_v7 = vld [vmem:[#allocation25_spill] sm:$0xff] }
 0x2d4   :  { %4714 = vmatmul.msk.f32.gmra.mxu1 %vm82_vm1, %v588_v41  ;;  %4792 = vmatmul.msk.f32.gmra.mxu0 %vm82_vm1, %v7201_v26 }
 0x2d5   :  { %v7206_v22 = vadd.f32 %v2468_v23, %v2316_v1  ;;  %4740 = vmatmul.msk.f32.gmra.mxu2 %vm82_vm1, %v6652_v45  ;;  %4769 = vmatmul.msk.f32.gmra.mxu3 %vm82_vm1, %v6743_v32  ;;  %8887 = vst [vmem:[#allocation21_spill] sm:$0xff] %v7216_v10 }
 0x2d7   :  { %8885 = vst [vmem:[#allocation99_spill] sm:$0xff] %v7206_v22  ;;  %v9012_v22 = vld [vmem:[#allocation135_spill] sm:$0xff] }
 0x2d8   :  { %v2106_v18 = vpop.f32.mrf.mxu2  ;;  %v2285_v28 = vpop.f32.mrf.mxu3 }
 0x2d9   :  { %v2107_v53 = vadd.f32 %v2106_v18, %v1937_v49  ;;  %v1940_v12 = vpop.f32.mrf.mxu1  ;;  %v2474_v21 = vpop.f32.mrf.mxu0 }
 0x2db   :  { %v2317_v23 = vadd.f32 %v2276_v43, %v2107_v53  ;;  %v594_v43 = vadd.f32 %v6326_v8, %v8889_v7  ;;  %v7231_v53 = vadd.f32 %v6326_v8, %v6443_v58  ;;  %v7245_v58 = vld [vmem:[%s8446_s10] ss:$0 sm:$0xff] }
 0x2dc   :  { %4715 = vmatmul.msk.f32.gmra.mxu1 %vm82_vm1, %v591_v51  ;;  %4793 = vmatmul.msk.f32.gmra.mxu0 %vm82_vm1, %v7216_v10  ;;  %v8917_v10 = vld [vmem:[#allocation49_spill] sm:$0xff] }
 0x2dd   :  { %v7221_v45 = vadd.f32 %v2471_v50, %v2317_v23  ;;  %4741 = vmatmul.msk.f32.gmra.mxu2 %vm82_vm1, %v6681_v61  ;;  %4770 = vmatmul.msk.f32.gmra.mxu3 %vm82_vm1, %v6772_v13  ;;  %8890 = vst [vmem:[#allocation23_spill] sm:$0xff] %v7231_v53 }
 0x2df   :  { %8888 = vst [vmem:[#allocation22_spill] sm:$0xff] %v7221_v45  ;;  %v9016_v45 = vld [vmem:[#allocation139_spill] sm:$0xff] }
 0x2e0   :  { %v2109_v49 = vpop.f32.mrf.mxu2  ;;  %v2288_v41 = vpop.f32.mrf.mxu3 }
 0x2e1   :  { %v2110_v1 = vadd.f32 %v2109_v49, %v1940_v12  ;;  %v1943_v18 = vpop.f32.mrf.mxu1  ;;  %v2477_v40 = vpop.f32.mrf.mxu0 }
 0x2e3   :  { %v2318_v50 = vadd.f32 %v2279_v31, %v2110_v1  ;;  %v8892_v31 = vld [vmem:[#allocation26_spill] sm:$0xff]  ;;  %v7251_v1 = vadd.f32 %v7245_v58, %v6472_v9 }
 0x2e4   :  { %4716 = vmatmul.msk.f32.gmra.mxu1 %vm82_vm1, %v594_v43  ;;  %4794 = vmatmul.msk.f32.gmra.mxu0 %vm82_vm1, %v7231_v53 }
 0x2e5   :  { %v7236_v61 = vadd.f32 %v2474_v21, %v2318_v50  ;;  %4742 = vmatmul.msk.f32.gmra.mxu2 %vm82_vm1, %v6710_v60  ;;  %4771 = vmatmul.msk.f32.gmra.mxu3 %vm82_vm1, %v6801_v5  ;;  %v597_v21 = vadd.f32 %v7245_v58, %v8892_v31  ;;  %8893 = vst [vmem:[#allocation25_spill] sm:$0xff] %v7251_v1  ;;  %v8895_v31 = vld [vmem:[#allocation29_spill] sm:$0xff] }
 0x2e7   :  { %8891 = vst [vmem:[#allocation24_spill] sm:$0xff] %v7236_v61  ;;  %v9020_v61 = vld [vmem:[#allocation144_spill] sm:$0xff] }
 0x2e8   :  { %v2112_v12 = vpop.f32.mrf.mxu2  ;;  %v2291_v51 = vpop.f32.mrf.mxu3 }
 0x2e9   :  { %v2113_v23 = vadd.f32 %v2112_v12, %v1943_v18  ;;  %v1946_v49 = vpop.f32.mrf.mxu1  ;;  %v2480_v8 = vpop.f32.mrf.mxu0 }
 0x2eb   :  { %v2319_v60 = vadd.f32 %v2282_v27, %v2113_v23  ;;  %v600_v27 = vadd.f32 %v7245_v58, %v8895_v31  ;;  %v7266_v23 = vadd.f32 %v7245_v58, %v6501_v17  ;;  %v8898_v31 = vld [vmem:[#allocation33_spill] sm:$0xff] }
 0x2ec   :  { %4717 = vmatmul.msk.f32.gmra.mxu1 %vm82_vm1, %v597_v21  ;;  %4795 = vmatmul.msk.f32.gmra.mxu0 %vm82_vm1, %v7251_v1  ;;  %v8911_v1 = vld [vmem:[#allocation45_spill] sm:$0xff] }
 0x2ed   :  { %v7256_v18 = vadd.f32 %v2477_v40, %v2319_v60  ;;  %4743 = vmatmul.msk.f32.gmra.mxu2 %vm82_vm1, %v6739_v47  ;;  %4772 = vmatmul.msk.f32.gmra.mxu3 %vm82_vm1, %v6828_v19  ;;  %8896 = vst [vmem:[#allocation29_spill] sm:$0xff] %v7266_v23 }
 0x2ef   :  { %8894 = vst [vmem:[#allocation26_spill] sm:$0xff] %v7256_v18  ;;  %v9024_v18 = vld [vmem:[#allocation149_spill] sm:$0xff] }
 0x2f0   :  { %v2115_v7 = vpop.f32.mrf.mxu2  ;;  %v2294_v43 = vpop.f32.mrf.mxu3 }
 0x2f1   :  { %v2116_v50 = vadd.f32 %v2115_v7, %v1946_v49  ;;  %v1949_v12 = vpop.f32.mrf.mxu1  ;;  %v2483_v9 = vpop.f32.mrf.mxu0 }
 0x2f3   :  { %v2320_v40 = vadd.f32 %v2285_v28, %v2116_v50  ;;  %v603_v28 = vadd.f32 %v7245_v58, %v8898_v31  ;;  %v7281_v50 = vadd.f32 %v7245_v58, %v6530_v25  ;;  %v8901_v31 = vld [vmem:[#allocation37_spill] sm:$0xff] }
 0x2f4   :  { %4718 = vmatmul.msk.f32.gmra.mxu1 %vm82_vm1, %v600_v27  ;;  %4796 = vmatmul.msk.f32.gmra.mxu0 %vm82_vm1, %v7266_v23 }
 0x2f5   :  { %v7271_v47 = vadd.f32 %v2480_v8, %v2320_v40  ;;  %4744 = vmatmul.msk.f32.gmra.mxu2 %vm82_vm1, %v6768_v63  ;;  %4773 = vmatmul.msk.f32.gmra.mxu3 %vm82_vm1, %v6855_v42  ;;  %8899 = vst [vmem:[#allocation33_spill] sm:$0xff] %v7281_v50 }
 0x2f7   :  { %8897 = vst [vmem:[#allocation174_spill] sm:$0xff] %v7271_v47  ;;  %v9028_v47 = vld [vmem:[#allocation154_spill] sm:$0xff] }
 0x2f8   :  { %v2118_v49 = vpop.f32.mrf.mxu2  ;;  %v2297_v21 = vpop.f32.mrf.mxu3 }
 0x2f9   :  { %v2119_v60 = vadd.f32 %v2118_v49, %v1949_v12  ;;  %v1952_v7 = vpop.f32.mrf.mxu1  ;;  %v2486_v17 = vpop.f32.mrf.mxu0 }
 0x2fb   :  { %v2321_v8 = vadd.f32 %v2288_v41, %v2119_v60  ;;  %v606_v41 = vadd.f32 %v7245_v58, %v8901_v31  ;;  %v7296_v60 = vadd.f32 %v7245_v58, %v6559_v33 }
 0x2fc   :  { %4719 = vmatmul.msk.f32.gmra.mxu1 %vm82_vm1, %v603_v28  ;;  %4797 = vmatmul.msk.f32.gmra.mxu0 %vm82_vm1, %v7281_v50  ;;  %v8905_v50 = vld [vmem:[#allocation41_spill] sm:$0xff] }
 0x2fd   :  { %v7286_v63 = vadd.f32 %v2483_v9, %v2321_v8  ;;  %4745 = vmatmul.msk.f32.gmra.mxu2 %vm82_vm1, %v6797_v39  ;;  %4774 = vmatmul.msk.f32.gmra.mxu3 %vm82_vm1, %v6878_v0  ;;  %8902 = vst [vmem:[#allocation37_spill] sm:$0xff] %v7296_v60 }
 0x2ff   :  { %8900 = vst [vmem:[#allocation175_spill] sm:$0xff] %v7286_v63  ;;  %v9032_v63 = vld [vmem:[#allocation159_spill] sm:$0xff] }
 0x300   :  { %v2121_v12 = vpop.f32.mrf.mxu2  ;;  %v2796_v27 = vpop.f32.mrf.mxu3 }
 0x301   :  { %v2122_v40 = vadd.f32 %v2121_v12, %v1952_v7  ;;  %v1955_v49 = vpop.f32.mrf.mxu1  ;;  %v2489_v25 = vpop.f32.mrf.mxu0  ;;  %v8904_v7 = vld [vmem:[#allocation6_spill] sm:$0xff] }
 0x303   :  { %v2322_v9 = vadd.f32 %v2291_v51, %v2122_v40  ;;  %v609_v51 = vadd.f32 %v7245_v58, %v8905_v50  ;;  %v8906_v40 = vld [vmem:[#allocation141_spill] sm:$0xff] }
 0x304   :  { %4720 = vmatmul.msk.f32.gmra.mxu1 %vm82_vm1, %v606_v41  ;;  %4798 = vmatmul.msk.f32.gmra.mxu0 %vm82_vm1, %v7296_v60  ;;  %v7311_v41 = vadd.f32 %v7245_v58, %v8906_v40 }
 0x305   :  { %v7301_v39 = vadd.f32 %v2486_v17, %v2322_v9  ;;  %4746 = vmatmul.msk.f32.gmra.mxu2 %vm82_vm1, %v6824_v55  ;;  %4775 = vmatmul.msk.f32.gmra.mxu3 %vm82_vm1, %v8904_v7  ;;  %v8909_v9 = vld [vmem:[#allocation39_spill] sm:$0xff] }
 0x306   :  { %8907 = vst [vmem:[#allocation41_spill] sm:$0xff] %v7311_v41 }
 0x307   :  { %8903 = vst [vmem:[#allocation176_spill] sm:$0xff] %v7301_v39  ;;  %v9036_v39 = vld [vmem:[#allocation164_spill] sm:$0xff] }
 0x308   :  { %v2124_v28 = vpop.f32.mrf.mxu2  ;;  %v2799_v8 = vpop.f32.mrf.mxu3 }
 0x309   :  { %v2125_v12 = vadd.f32 %v2124_v28, %v1955_v49  ;;  %v1958_v31 = vpop.f32.mrf.mxu1  ;;  %v2492_v33 = vpop.f32.mrf.mxu0  ;;  %v8910_v49 = vld [vmem:[#allocation8_spill] sm:$0xff] }
 0x30b   :  { %v2323_v17 = vadd.f32 %v2294_v43, %v2125_v12  ;;  %v612_v43 = vadd.f32 %v7245_v58, %v8911_v1  ;;  %v8912_v12 = vld [vmem:[#allocation146_spill] sm:$0xff] }
 0x30c   :  { %4721 = vmatmul.msk.f32.gmra.mxu1 %vm82_vm1, %v609_v51  ;;  %4799 = vmatmul.msk.f32.gmra.mxu0 %vm82_vm1, %v7311_v41  ;;  %v7326_v51 = vadd.f32 %v7245_v58, %v8912_v12 }
 0x30d   :  { %v7316_v55 = vadd.f32 %v2489_v25, %v2323_v17  ;;  %4747 = vmatmul.msk.f32.gmra.mxu2 %vm82_vm1, %v8909_v9  ;;  %4776 = vmatmul.msk.f32.gmra.mxu3 %vm82_vm1, %v8910_v49  ;;  %v8915_v9 = vld [vmem:[#allocation42_spill] sm:$0xff] }
 0x30e   :  { %8913 = vst [vmem:[#allocation39_spill] sm:$0xff] %v7326_v51 }
 0x30f   :  { %8908 = vst [vmem:[#allocation141_spill] sm:$0xff] %v7316_v55  ;;  %v9040_v55 = vld [vmem:[#allocation169_spill] sm:$0xff] }
 0x310   :  { %v2127_v28 = vpop.f32.mrf.mxu2  ;;  %v2802_v50 = vpop.f32.mrf.mxu3 }
 0x311   :  { %v2128_v60 = vadd.f32 %v2127_v28, %v1958_v31  ;;  %v2612_v23 = vpop.f32.mrf.mxu1  ;;  %v2988_v40 = vpop.f32.mrf.mxu0  ;;  %v8916_v31 = vld [vmem:[#allocation10_spill] sm:$0xff] }
 0x313   :  { %v2324_v25 = vadd.f32 %v2297_v21, %v2128_v60  ;;  %v615_v21 = vadd.f32 %v7245_v58, %v8917_v10  ;;  %v8918_v60 = vld [vmem:[#allocation151_spill] sm:$0xff] }
 0x314   :  { %4722 = vmatmul.msk.f32.gmra.mxu1 %vm82_vm1, %v612_v43  ;;  %4800 = vmatmul.msk.f32.gmra.mxu0 %vm82_vm1, %v7326_v51  ;;  %v7341_v43 = vadd.f32 %v7245_v58, %v8918_v60 }
 0x315   :  { %v7331_v17 = vadd.f32 %v2492_v33, %v2324_v25  ;;  %4748 = vmatmul.msk.f32.gmra.mxu2 %vm82_vm1, %v8915_v9  ;;  %4777 = vmatmul.msk.f32.gmra.mxu3 %vm82_vm1, %v8916_v31  ;;  %v8921_v9 = vld [vmem:[#allocation44_spill] sm:$0xff] }
 0x316   :  { %8919 = vst [vmem:[#allocation146_spill] sm:$0xff] %v7341_v43 }
 0x317   :  { %8914 = vst [vmem:[#allocation45_spill] sm:$0xff] %v7331_v17 }
 0x318   :  { %v2704_v28 = vpop.f32.mrf.mxu2  ;;  %v2805_v1 = vpop.f32.mrf.mxu3 }
 0x319   :  { %v2705_v41 = vadd.f32 %v2704_v28, %v2612_v23  ;;  %v2615_v53 = vpop.f32.mrf.mxu1  ;;  %v2991_v12 = vpop.f32.mrf.mxu0  ;;  %v8922_v23 = vld [vmem:[#allocation12_spill] sm:$0xff] }
 0x31a   :  { %v8928_v28 = vld [vmem:[#allocation48_spill] sm:$0xff] }
 0x31b   :  { %v2871_v33 = vadd.f32 %v2796_v27, %v2705_v41 }
 0x31c   :  { %4723 = vmatmul.msk.f32.gmra.mxu1 %vm82_vm1, %v615_v21  ;;  %4801 = vmatmul.msk.f32.gmra.mxu0 %vm82_vm1, %v7341_v43  ;;  %v8924_v21 = vld [vmem:[#allocation53_spill] sm:$0xff]  ;;  %v8925_v43 = vld [vmem:[#allocation156_spill] sm:$0xff] }
 0x31d   :  { %v7346_v25 = vadd.f32 %v2988_v40, %v2871_v33  ;;  %4749 = vmatmul.msk.f32.gmra.mxu2 %vm82_vm1, %v8921_v9  ;;  %4778 = vmatmul.msk.f32.gmra.mxu3 %vm82_vm1, %v8922_v23  ;;  %v618_v16 = vadd.f32 %v7245_v58, %v8924_v21  ;;  %v7358_v40 = vadd.f32 %v7245_v58, %v8925_v43 }
 0x31f   :  { %8920 = vst [vmem:[#allocation42_spill] sm:$0xff] %v7346_v25 }
 0x320   :  { %v2707_v51 = vpop.f32.mrf.mxu2  ;;  %v2808_v60 = vpop.f32.mrf.mxu3  ;;  %8926 = vst [vmem:[#allocation49_spill] sm:$0xff] %v7358_v40 }
 0x321   :  { %v2708_v26 = vadd.f32 %v2707_v51, %v2615_v53  ;;  %v2618_v27 = vpop.f32.mrf.mxu1  ;;  %v2994_v41 = vpop.f32.mrf.mxu0  ;;  %v8934_v51 = vld [vmem:[#allocation52_spill] sm:$0xff] }
 0x323   :  { %v2872_v33 = vadd.f32 %v2799_v8, %v2708_v26 }
 0x324   :  { %4724 = vmatmul.msk.f32.gmra.mxu1 %vm82_vm1, %v618_v16  ;;  %4802 = vmatmul.msk.f32.gmra.mxu0 %vm82_vm1, %v7358_v40  ;;  %v8930_v16 = vld [vmem:[#allocation57_spill] sm:$0xff] }
 0x325   :  { %v7363_v9 = vadd.f32 %v2991_v12, %v2872_v33  ;;  %4750 = vmatmul.msk.f32.gmra.mxu2 %vm82_vm1, %v8928_v28  ;;  %4779 = vmatmul.msk.f32.gmra.mxu3 %vm82_vm1, %v6991_v3  ;;  %v621_v10 = vadd.f32 %v7245_v58, %v8930_v16  ;;  %v8931_v40 = vld [vmem:[#allocation161_spill] sm:$0xff] }
 0x326   :  { %v7375_v12 = vadd.f32 %v7245_v58, %v8931_v40 }
 0x327   :  { %8927 = vst [vmem:[#allocation151_spill] sm:$0xff] %v7363_v9 }
 0x328   :  { %v2710_v21 = vpop.f32.mrf.mxu2  ;;  %v2811_v43 = vpop.f32.mrf.mxu3  ;;  %8932 = vst [vmem:[#allocation44_spill] sm:$0xff] %v7375_v12 }
 0x329   :  { %v2711_v25 = vadd.f32 %v2710_v21, %v2618_v27  ;;  %v2621_v26 = vpop.f32.mrf.mxu1  ;;  %v2997_v8 = vpop.f32.mrf.mxu0  ;;  %v8940_v21 = vld [vmem:[#allocation56_spill] sm:$0xff] }
 0x32b   :  { %v2873_v33 = vadd.f32 %v2802_v50, %v2711_v25 }
 0x32c   :  { %4725 = vmatmul.msk.f32.gmra.mxu1 %vm82_vm1, %v621_v10  ;;  %4803 = vmatmul.msk.f32.gmra.mxu0 %vm82_vm1, %v7375_v12  ;;  %v8936_v10 = vld [vmem:[#allocation61_spill] sm:$0xff]  ;;  %v8937_v12 = vld [vmem:[#allocation166_spill] sm:$0xff] }
 0x32d   :  { %v7380_v28 = vadd.f32 %v2994_v41, %v2873_v33  ;;  %4751 = vmatmul.msk.f32.gmra.mxu2 %vm82_vm1, %v8934_v51  ;;  %4780 = vmatmul.msk.f32.gmra.mxu3 %vm82_vm1, %v7014_v35  ;;  %v624_v53 = vadd.f32 %v7245_v58, %v8936_v10  ;;  %v7392_v41 = vadd.f32 %v7245_v58, %v8937_v12 }
 0x32f   :  { %8933 = vst [vmem:[#allocation53_spill] sm:$0xff] %v7380_v28 }
 0x330   :  { %v2713_v16 = vpop.f32.mrf.mxu2  ;;  %v2814_v40 = vpop.f32.mrf.mxu3  ;;  %8938 = vst [vmem:[#allocation156_spill] sm:$0xff] %v7392_v41 }
 0x331   :  { %v2714_v9 = vadd.f32 %v2713_v16, %v2621_v26  ;;  %v2624_v50 = vpop.f32.mrf.mxu1  ;;  %v3000_v25 = vpop.f32.mrf.mxu0  ;;  %v8946_v16 = vld [vmem:[#allocation60_spill] sm:$0xff] }
 0x333   :  { %v2874_v33 = vadd.f32 %v2805_v1, %v2714_v9 }
 0x334   :  { %4726 = vmatmul.msk.f32.gmra.mxu1 %vm82_vm1, %v624_v53  ;;  %4804 = vmatmul.msk.f32.gmra.mxu0 %vm82_vm1, %v7392_v41  ;;  %v8942_v53 = vld [vmem:[#allocation65_spill] sm:$0xff]  ;;  %v8943_v41 = vld [vmem:[#allocation171_spill] sm:$0xff] }
 0x335   :  { %v7397_v51 = vadd.f32 %v2997_v8, %v2874_v33  ;;  %4752 = vmatmul.msk.f32.gmra.mxu2 %vm82_vm1, %v8940_v21  ;;  %4781 = vmatmul.msk.f32.gmra.mxu3 %vm82_vm1, %v7037_v15  ;;  %v627_v27 = vadd.f32 %v7245_v58, %v8942_v53  ;;  %v7409_v8 = vadd.f32 %v7245_v58, %v8943_v41 }
 0x337   :  { %8939 = vst [vmem:[#allocation48_spill] sm:$0xff] %v7397_v51 }
 0x338   :  { %v2716_v10 = vpop.f32.mrf.mxu2  ;;  %v2817_v12 = vpop.f32.mrf.mxu3  ;;  %8944 = vst [vmem:[#allocation57_spill] sm:$0xff] %v7409_v8 }
 0x339   :  { %v2717_v28 = vadd.f32 %v2716_v10, %v2624_v50  ;;  %v2627_v1 = vpop.f32.mrf.mxu1  ;;  %v3003_v9 = vpop.f32.mrf.mxu0  ;;  %v8947_v50 = vld [vmem:[#allocation5_spill] sm:$0xff] }
 0x33b   :  { %v2875_v33 = vadd.f32 %v2808_v60, %v2717_v28 }
 0x33c   :  { %4727 = vmatmul.msk.f32.gmra.mxu1 %vm82_vm1, %v627_v27  ;;  %4805 = vmatmul.msk.f32.gmra.mxu0 %vm82_vm1, %v7409_v8  ;;  %v8949_v27 = vld [vmem:[#allocation69_spill] sm:$0xff]  ;;  %v8950_v8 = vld [vmem:[#allocation30_spill] sm:$0xff] }
 0x33d   :  { %v7414_v21 = vadd.f32 %v3000_v25, %v2875_v33  ;;  %4753 = vmatmul.msk.f32.gmra.mxu2 %vm82_vm1, %v8946_v16  ;;  %4782 = vmatmul.msk.f32.gmra.mxu3 %vm82_vm1, %v8947_v50  ;;  %v630_v56 = vadd.f32 %v7245_v58, %v8949_v27  ;;  %v7426_v25 = vadd.f32 %v7245_v58, %v8950_v8  ;;  %v8952_v33 = vld [vmem:[#allocation81_spill] sm:$0xff] }
 0x33e   :  { %v1332_v16 = vadd.f32 %v7245_v58, %v8952_v33 }
 0x33f   :  { %8945 = vst [vmem:[#allocation161_spill] sm:$0xff] %v7414_v21 }
 0x340   :  { %v2719_v51 = vpop.f32.mrf.mxu2  ;;  %v2820_v41 = vpop.f32.mrf.mxu3  ;;  %8951 = vst [vmem:[#allocation52_spill] sm:$0xff] %v7426_v25 }
 0x341   :  { %v2720_v26 = vadd.f32 %v2719_v51, %v2627_v1  ;;  %v2630_v60 = vpop.f32.mrf.mxu1  ;;  %v3006_v28 = vpop.f32.mrf.mxu0  ;;  %v8954_v51 = vld [vmem:[#allocation63_spill] sm:$0xff]  ;;  %v8964_v1 = vld [vmem:[#allocation2_spill] sm:$0xff] }
 0x343   :  { %v2876_v48 = vadd.f32 %v2811_v43, %v2720_v26  ;;  %v8956_v26 = vld [vmem:[#allocation73_spill] sm:$0xff] }
 0x344   :  { %4728 = vmatmul.msk.f32.gmra.mxu1 %vm82_vm1, %v630_v56  ;;  %4806 = vmatmul.msk.f32.gmra.mxu0 %vm82_vm1, %v7426_v25  ;;  %v633_v56 = vadd.f32 %v7245_v58, %v8956_v26 }
 0x345   :  { %v7433_v53 = vadd.f32 %v3003_v9, %v2876_v48  ;;  %4754 = vmatmul.msk.f32.gmra.mxu2 %vm82_vm1, %v8954_v51  ;;  %4862 = vmatmul.msk.f32.vlgmr.msrb.gmra.mxu3 %vm82_vm1, %v1332_v16  ;;  %v7444_v48 = vadd.f32 %v7245_v58, %v8957_v34  ;;  %v8959_v9 = vld [vmem:[#allocation85_spill] sm:$0xff] }
 0x346   :  { %v1335_v51 = vadd.f32 %v7245_v58, %v8959_v9 }
 0x347   :  { %8953 = vst [vmem:[#allocation61_spill] sm:$0xff] %v7433_v53 }
 0x348   :  { %v2722_v27 = vpop.f32.mrf.mxu2  ;;  %v2823_v21 = vpop.f32.mrf.mxu3  ;;  %8958 = vst [vmem:[#allocation166_spill] sm:$0xff] %v7444_v48 }
 0x349   :  { %v2723_v10 = vadd.f32 %v2722_v27, %v2630_v60  ;;  %v2633_v33 = vpop.f32.mrf.mxu1  ;;  %v3009_v43 = vpop.f32.mrf.mxu0  ;;  %v8961_v60 = vld [vmem:[#allocation66_spill] sm:$0xff]  ;;  %v8976_v27 = vld [vmem:[#allocation121_spill] sm:$0xff] }
 0x34b   :  { %v2877_v25 = vadd.f32 %v2814_v40, %v2723_v10  ;;  %v8963_v10 = vld [vmem:[#allocation77_spill] sm:$0xff] }
 0x34c   :  { %4729 = vmatmul.msk.f32.gmra.mxu1 %vm82_vm1, %v633_v56  ;;  %4807 = vmatmul.msk.f32.gmra.mxu0 %vm82_vm1, %v7444_v48  ;;  %v636_v56 = vadd.f32 %v7245_v58, %v8963_v10 }
 0x34d   :  { %v7451_v16 = vadd.f32 %v3006_v28, %v2877_v25  ;;  %4755 = vmatmul.msk.f32.gmra.mxu2 %vm82_vm1, %v8961_v60  ;;  %4863 = vmatmul.msk.f32.gmra.mxu3 %vm82_vm1, %v1335_v51  ;;  %v7462_v28 = vadd.f32 %v7245_v58, %v8964_v1  ;;  %v8966_v25 = vld [vmem:[#allocation89_spill] sm:$0xff]  ;;  %v8974_v1 = vld [vmem:[#allocation74_spill] sm:$0xff] }
 0x34e   :  { %v1338_v60 = vadd.f32 %v7245_v58, %v8966_v25 }
 0x34f   :  { %8960 = vst [vmem:[#allocation56_spill] sm:$0xff] %v7451_v16  ;;  %v8971_v16 = vld [vmem:[#allocation116_spill] sm:$0xff] }
 0x350   :  { %v2725_v26 = vpop.f32.mrf.mxu2  ;;  %v2826_v8 = vpop.f32.mrf.mxu3  ;;  %8965 = vst [vmem:[#allocation65_spill] sm:$0xff] %v7462_v28 }
 0x351   :  { %v2726_v53 = vadd.f32 %v2725_v26, %v2633_v33  ;;  %v2636_v9 = vpop.f32.mrf.mxu1  ;;  %v3012_v40 = vpop.f32.mrf.mxu0  ;;  %v8968_v33 = vld [vmem:[#allocation68_spill] sm:$0xff] }
 0x353   :  { %v2878_v48 = vadd.f32 %v2817_v12, %v2726_v53  ;;  %v8969_v53 = vld [vmem:[#allocation70_spill] sm:$0xff] }
 0x354   :  { %4730 = vmatmul.msk.f32.gmra.mxu1 %vm82_vm1, %v636_v56  ;;  %4808 = vmatmul.msk.f32.gmra.mxu0 %vm82_vm1, %v7462_v28  ;;  %v7478_v56 = vadd.f32 %v7245_v58, %v8969_v53  ;;  %v8970_v28 = vld [vmem:[#allocation93_spill] sm:$0xff] }
 0x355   :  { %v7469_v51 = vadd.f32 %v3009_v43, %v2878_v48  ;;  %4756 = vmatmul.msk.f32.gmra.mxu2 %vm82_vm1, %v8968_v33  ;;  %4864 = vmatmul.msk.f32.gmra.mxu3 %vm82_vm1, %v1338_v60  ;;  %v1341_v43 = vadd.f32 %v7245_v58, %v8970_v28  ;;  %v8973_v33 = vld [vmem:[#allocation104_spill] sm:$0xff] }
 0x357   :  { %8967 = vst [vmem:[#allocation171_spill] sm:$0xff] %v7469_v51  ;;  %v7495_v51 = vadd.f32 %v7245_v58, %v8974_v1  ;;  %v8983_v1 = vld [vmem:[#allocation82_spill] sm:$0xff] }
 0x358   :  { %v2728_v26 = vpop.f32.mrf.mxu2  ;;  %v2829_v10 = vpop.f32.mrf.mxu3 }
 0x359   :  { %v2729_v34 = vadd.f32 %v2728_v26, %v2636_v9  ;;  %v2639_v25 = vpop.f32.mrf.mxu1  ;;  %v3015_v12 = vpop.f32.mrf.mxu0  ;;  %v8979_v9 = vld [vmem:[#allocation78_spill] sm:$0xff] }
 0x35b   :  { %v2879_v48 = vadd.f32 %v2820_v41, %v2729_v34 }
 0x35c   :  { %4810 = vmatmul.msk.f32.vlgmr.msrb.gmra.mxu1 %vm82_vm1, %v8971_v16  ;;  %4888 = vmatmul.msk.f32.vlgmr.msrb.gmra.mxu0 %vm82_vm1, %v7478_v56 }
 0x35d   :  { %v7486_v60 = vadd.f32 %v3012_v40, %v2879_v48  ;;  %4836 = vmatmul.msk.f32.vlgmr.msrb.gmra.mxu2 %vm82_vm1, %v8973_v33  ;;  %4865 = vmatmul.msk.f32.gmra.mxu3 %vm82_vm1, %v1341_v43  ;;  %v1344_v40 = vadd.f32 %v7245_v58, %v8975_v59  ;;  %v8978_v33 = vld [vmem:[#allocation108_spill] sm:$0xff] }
 0x35f   :  { %8972 = vst [vmem:[#allocation60_spill] sm:$0xff] %v7486_v60  ;;  %v7512_v60 = vadd.f32 %v7245_v58, %v8979_v9  ;;  %v8987_v9 = vld [vmem:[#allocation86_spill] sm:$0xff] }
 0x360   :  { %v2731_v26 = vpop.f32.mrf.mxu2  ;;  %v2832_v53 = vpop.f32.mrf.mxu3 }
 0x361   :  { %v2732_v28 = vadd.f32 %v2731_v26, %v2639_v25  ;;  %v2642_v41 = vpop.f32.mrf.mxu1  ;;  %v3018_v34 = vpop.f32.mrf.mxu0 }
 0x363   :  { %v2880_v48 = vadd.f32 %v2823_v21, %v2732_v28 }
 0x364   :  { %4811 = vmatmul.msk.f32.gmra.mxu1 %vm82_vm1, %v8976_v27  ;;  %4889 = vmatmul.msk.f32.gmra.mxu0 %vm82_vm1, %v7495_v51 }
 0x365   :  { %v7503_v43 = vadd.f32 %v3015_v12, %v2880_v48  ;;  %4837 = vmatmul.msk.f32.gmra.mxu2 %vm82_vm1, %v8978_v33  ;;  %4866 = vmatmul.msk.f32.gmra.mxu3 %vm82_vm1, %v1344_v40  ;;  %v1347_v12 = vadd.f32 %v7245_v58, %v8980_v2  ;;  %v8982_v33 = vld [vmem:[#allocation112_spill] sm:$0xff] }
 0x367   :  { %8977 = vst [vmem:[#allocation69_spill] sm:$0xff] %v7503_v43  ;;  %v7529_v43 = vadd.f32 %v7245_v58, %v8983_v1  ;;  %v8991_v1 = vld [vmem:[#allocation90_spill] sm:$0xff] }
 0x368   :  { %v2734_v25 = vpop.f32.mrf.mxu2  ;;  %v2835_v26 = vpop.f32.mrf.mxu3 }
 0x369   :  { %v2735_v59 = vadd.f32 %v2734_v25, %v2642_v41  ;;  %v2645_v21 = vpop.f32.mrf.mxu1  ;;  %v3021_v28 = vpop.f32.mrf.mxu0 }
 0x36b   :  { %v2881_v48 = vadd.f32 %v2826_v8, %v2735_v59 }
 0x36c   :  { %4812 = vmatmul.msk.f32.gmra.mxu1 %vm82_vm1, %v6482_v57  ;;  %4890 = vmatmul.msk.f32.gmra.mxu0 %vm82_vm1, %v7512_v60 }
 0x36d   :  { %v7520_v40 = vadd.f32 %v3018_v34, %v2881_v48  ;;  %4838 = vmatmul.msk.f32.gmra.mxu2 %vm82_vm1, %v8982_v33  ;;  %4867 = vmatmul.msk.f32.gmra.mxu3 %vm82_vm1, %v1347_v12  ;;  %v1350_v34 = vadd.f32 %v7245_v58, %v8984_v11  ;;  %v8986_v33 = vld [vmem:[#allocation117_spill] sm:$0xff] }
 0x36f   :  { %8981 = vst [vmem:[#allocation30_spill] sm:$0xff] %v7520_v40  ;;  %v7546_v40 = vadd.f32 %v7245_v58, %v8987_v9  ;;  %v8995_v9 = vld [vmem:[#allocation94_spill] sm:$0xff] }
 0x370   :  { %v2737_v41 = vpop.f32.mrf.mxu2  ;;  %v2838_v25 = vpop.f32.mrf.mxu3 }
 0x371   :  { %v2738_v2 = vadd.f32 %v2737_v41, %v2645_v21  ;;  %v2648_v8 = vpop.f32.mrf.mxu1  ;;  %v3024_v59 = vpop.f32.mrf.mxu0 }
 0x373   :  { %v2882_v48 = vadd.f32 %v2829_v10, %v2738_v2 }
 0x374   :  { %4813 = vmatmul.msk.f32.gmra.mxu1 %vm82_vm1, %v6511_v4  ;;  %4891 = vmatmul.msk.f32.gmra.mxu0 %vm82_vm1, %v7529_v43 }
 0x375   :  { %v7537_v12 = vadd.f32 %v3021_v28, %v2882_v48  ;;  %4839 = vmatmul.msk.f32.gmra.mxu2 %vm82_vm1, %v8986_v33  ;;  %4868 = vmatmul.msk.f32.gmra.mxu3 %vm82_vm1, %v1350_v34  ;;  %v1353_v28 = vadd.f32 %v7245_v58, %v8988_v37  ;;  %v8990_v33 = vld [vmem:[#allocation122_spill] sm:$0xff] }
 0x377   :  { %8985 = vst [vmem:[#allocation81_spill] sm:$0xff] %v7537_v12  ;;  %v7563_v12 = vadd.f32 %v7245_v58, %v8991_v1  ;;  %v8999_v1 = vld [vmem:[#allocation98_spill] sm:$0xff] }
 0x378   :  { %v2740_v21 = vpop.f32.mrf.mxu2  ;;  %v2841_v41 = vpop.f32.mrf.mxu3 }
 0x379   :  { %v2741_v11 = vadd.f32 %v2740_v21, %v2648_v8  ;;  %v2651_v10 = vpop.f32.mrf.mxu1  ;;  %v3027_v2 = vpop.f32.mrf.mxu0 }
 0x37b   :  { %v2883_v48 = vadd.f32 %v2832_v53, %v2741_v11 }
 0x37c   :  { %4814 = vmatmul.msk.f32.gmra.mxu1 %vm82_vm1, %v6540_v20  ;;  %4892 = vmatmul.msk.f32.gmra.mxu0 %vm82_vm1, %v7546_v40 }
 0x37d   :  { %v7554_v34 = vadd.f32 %v3024_v59, %v2883_v48  ;;  %4840 = vmatmul.msk.f32.gmra.mxu2 %vm82_vm1, %v8990_v33  ;;  %4869 = vmatmul.msk.f32.gmra.mxu3 %vm82_vm1, %v1353_v28  ;;  %v1356_v59 = vadd.f32 %v7245_v58, %v8992_v14  ;;  %v8994_v33 = vld [vmem:[#allocation126_spill] sm:$0xff] }
 0x37f   :  { %8989 = vst [vmem:[#allocation63_spill] sm:$0xff] %v7554_v34  ;;  %v7580_v34 = vadd.f32 %v7245_v58, %v8995_v9  ;;  %v9003_v9 = vld [vmem:[#allocation102_spill] sm:$0xff] }
 0x380   :  { %v2743_v8 = vpop.f32.mrf.mxu2  ;;  %v2844_v21 = vpop.f32.mrf.mxu3 }
 0x381   :  { %v2744_v37 = vadd.f32 %v2743_v8, %v2651_v10  ;;  %v2654_v53 = vpop.f32.mrf.mxu1  ;;  %v3030_v11 = vpop.f32.mrf.mxu0 }
 0x383   :  { %v2884_v48 = vadd.f32 %v2835_v26, %v2744_v37 }
 0x384   :  { %4815 = vmatmul.msk.f32.gmra.mxu1 %vm82_vm1, %v6569_v36  ;;  %4893 = vmatmul.msk.f32.gmra.mxu0 %vm82_vm1, %v7563_v12 }
 0x385   :  { %v7571_v28 = vadd.f32 %v3027_v2, %v2884_v48  ;;  %4841 = vmatmul.msk.f32.gmra.mxu2 %vm82_vm1, %v8994_v33  ;;  %4870 = vmatmul.msk.f32.gmra.mxu3 %vm82_vm1, %v1356_v59  ;;  %v1359_v2 = vadd.f32 %v7245_v58, %v8996_v30  ;;  %v8998_v33 = vld [vmem:[#allocation130_spill] sm:$0xff] }
 0x387   :  { %8993 = vst [vmem:[#allocation73_spill] sm:$0xff] %v7571_v28  ;;  %v7597_v28 = vadd.f32 %v7245_v58, %v8999_v1  ;;  %v9007_v1 = vld [vmem:[#allocation106_spill] sm:$0xff] }
 0x388   :  { %v2746_v10 = vpop.f32.mrf.mxu2  ;;  %v2847_v8 = vpop.f32.mrf.mxu3 }
 0x389   :  { %v2747_v14 = vadd.f32 %v2746_v10, %v2654_v53  ;;  %v2657_v26 = vpop.f32.mrf.mxu1  ;;  %v3033_v37 = vpop.f32.mrf.mxu0 }
 0x38b   :  { %v2885_v48 = vadd.f32 %v2838_v25, %v2747_v14 }
 0x38c   :  { %4816 = vmatmul.msk.f32.gmra.mxu1 %vm82_vm1, %v6598_v52  ;;  %4894 = vmatmul.msk.f32.gmra.mxu0 %vm82_vm1, %v7580_v34 }
 0x38d   :  { %v7588_v59 = vadd.f32 %v3030_v11, %v2885_v48  ;;  %4842 = vmatmul.msk.f32.gmra.mxu2 %vm82_vm1, %v8998_v33  ;;  %4871 = vmatmul.msk.f32.gmra.mxu3 %vm82_vm1, %v1359_v2  ;;  %v1362_v11 = vadd.f32 %v7245_v58, %v9000_v46  ;;  %v9002_v33 = vld [vmem:[#allocation134_spill] sm:$0xff] }
 0x38f   :  { %8997 = vst [vmem:[#allocation13_spill] sm:$0xff] %v7588_v59  ;;  %v7614_v59 = vadd.f32 %v7245_v58, %v9003_v9  ;;  %v9011_v9 = vld [vmem:[#allocation110_spill] sm:$0xff] }
 0x390   :  { %v2749_v53 = vpop.f32.mrf.mxu2  ;;  %v2850_v10 = vpop.f32.mrf.mxu3 }
 0x391   :  { %v2750_v30 = vadd.f32 %v2749_v53, %v2657_v26  ;;  %v2660_v25 = vpop.f32.mrf.mxu1  ;;  %v3036_v14 = vpop.f32.mrf.mxu0 }
 0x393   :  { %v2886_v48 = vadd.f32 %v2841_v41, %v2750_v30 }
 0x394   :  { %4817 = vmatmul.msk.f32.gmra.mxu1 %vm82_vm1, %v6627_v6  ;;  %4895 = vmatmul.msk.f32.gmra.mxu0 %vm82_vm1, %v7597_v28 }
 0x395   :  { %v7605_v2 = vadd.f32 %v3033_v37, %v2886_v48  ;;  %4843 = vmatmul.msk.f32.gmra.mxu2 %vm82_vm1, %v9002_v33  ;;  %4872 = vmatmul.msk.f32.gmra.mxu3 %vm82_vm1, %v1362_v11  ;;  %v1365_v37 = vadd.f32 %v7245_v58, %v9004_v62  ;;  %v9006_v33 = vld [vmem:[#allocation138_spill] sm:$0xff] }
 0x397   :  { %9001 = vst [vmem:[#allocation85_spill] sm:$0xff] %v7605_v2  ;;  %v7631_v2 = vadd.f32 %v7245_v58, %v9007_v1  ;;  %v9015_v1 = vld [vmem:[#allocation114_spill] sm:$0xff] }
 0x398   :  { %v2752_v26 = vpop.f32.mrf.mxu2  ;;  %v2853_v53 = vpop.f32.mrf.mxu3 }
 0x399   :  { %v2753_v46 = vadd.f32 %v2752_v26, %v2660_v25  ;;  %v2663_v41 = vpop.f32.mrf.mxu1  ;;  %v3039_v30 = vpop.f32.mrf.mxu0 }
 0x39b   :  { %v2887_v48 = vadd.f32 %v2844_v21, %v2753_v46 }
 0x39c   :  { %4818 = vmatmul.msk.f32.gmra.mxu1 %vm82_vm1, %v6656_v44  ;;  %4896 = vmatmul.msk.f32.gmra.mxu0 %vm82_vm1, %v7614_v59 }
 0x39d   :  { %v7622_v11 = vadd.f32 %v3036_v14, %v2887_v48  ;;  %4844 = vmatmul.msk.f32.gmra.mxu2 %vm82_vm1, %v9006_v33  ;;  %4873 = vmatmul.msk.f32.gmra.mxu3 %vm82_vm1, %v1365_v37  ;;  %v1368_v14 = vadd.f32 %v7245_v58, %v9008_v38  ;;  %v9010_v33 = vld [vmem:[#allocation143_spill] sm:$0xff] }
 0x39f   :  { %9005 = vst [vmem:[#allocation66_spill] sm:$0xff] %v7622_v11  ;;  %v7648_v11 = vadd.f32 %v7245_v58, %v9011_v9  ;;  %v9019_v9 = vld [vmem:[#allocation119_spill] sm:$0xff] }
 0x3a0   :  { %v2755_v25 = vpop.f32.mrf.mxu2  ;;  %v2856_v26 = vpop.f32.mrf.mxu3 }
 0x3a1   :  { %v2756_v62 = vadd.f32 %v2755_v25, %v2663_v41  ;;  %v2666_v21 = vpop.f32.mrf.mxu1  ;;  %v3042_v46 = vpop.f32.mrf.mxu0 }
 0x3a3   :  { %v2888_v48 = vadd.f32 %v2847_v8, %v2756_v62 }
 0x3a4   :  { %4819 = vmatmul.msk.f32.gmra.mxu1 %vm82_vm1, %v6685_v54  ;;  %4897 = vmatmul.msk.f32.gmra.mxu0 %vm82_vm1, %v7631_v2 }
 0x3a5   :  { %v7639_v37 = vadd.f32 %v3039_v30, %v2888_v48  ;;  %4845 = vmatmul.msk.f32.gmra.mxu2 %vm82_vm1, %v9010_v33  ;;  %4874 = vmatmul.msk.f32.gmra.mxu3 %vm82_vm1, %v1368_v14  ;;  %v1371_v30 = vadd.f32 %v7245_v58, %v9012_v22  ;;  %v9014_v33 = vld [vmem:[#allocation148_spill] sm:$0xff] }
 0x3a7   :  { %9009 = vst [vmem:[#allocation77_spill] sm:$0xff] %v7639_v37  ;;  %v7665_v37 = vadd.f32 %v7245_v58, %v9015_v1  ;;  %v9023_v1 = vld [vmem:[#allocation124_spill] sm:$0xff] }
 0x3a8   :  { %v2758_v41 = vpop.f32.mrf.mxu2  ;;  %v2859_v25 = vpop.f32.mrf.mxu3 }
 0x3a9   :  { %v2759_v38 = vadd.f32 %v2758_v41, %v2666_v21  ;;  %v2669_v8 = vpop.f32.mrf.mxu1  ;;  %v3045_v62 = vpop.f32.mrf.mxu0 }
 0x3ab   :  { %v2889_v48 = vadd.f32 %v2850_v10, %v2759_v38 }
 0x3ac   :  { %4820 = vmatmul.msk.f32.gmra.mxu1 %vm82_vm1, %v6714_v29  ;;  %4898 = vmatmul.msk.f32.gmra.mxu0 %vm82_vm1, %v7648_v11 }
 0x3ad   :  { %v7656_v14 = vadd.f32 %v3042_v46, %v2889_v48  ;;  %4846 = vmatmul.msk.f32.gmra.mxu2 %vm82_vm1, %v9014_v33  ;;  %4875 = vmatmul.msk.f32.gmra.mxu3 %vm82_vm1, %v1371_v30  ;;  %v1374_v46 = vadd.f32 %v7245_v58, %v9016_v45  ;;  %v9018_v33 = vld [vmem:[#allocation153_spill] sm:$0xff] }
 0x3af   :  { %9013 = vst [vmem:[#allocation2_spill] sm:$0xff] %v7656_v14  ;;  %v7682_v14 = vadd.f32 %v7245_v58, %v9019_v9  ;;  %v9027_v9 = vld [vmem:[#allocation128_spill] sm:$0xff] }
 0x3b0   :  { %v2761_v21 = vpop.f32.mrf.mxu2  ;;  %v2862_v41 = vpop.f32.mrf.mxu3 }
 0x3b1   :  { %v2762_v22 = vadd.f32 %v2761_v21, %v2669_v8  ;;  %v2672_v10 = vpop.f32.mrf.mxu1  ;;  %v3048_v38 = vpop.f32.mrf.mxu0 }
 0x3b3   :  { %v2890_v48 = vadd.f32 %v2853_v53, %v2762_v22 }
 0x3b4   :  { %4821 = vmatmul.msk.f32.gmra.mxu1 %vm82_vm1, %v6743_v32  ;;  %4899 = vmatmul.msk.f32.gmra.mxu0 %vm82_vm1, %v7665_v37 }
 0x3b5   :  { %v7673_v30 = vadd.f32 %v3045_v62, %v2890_v48  ;;  %4847 = vmatmul.msk.f32.gmra.mxu2 %vm82_vm1, %v9018_v33  ;;  %4876 = vmatmul.msk.f32.gmra.mxu3 %vm82_vm1, %v1374_v46  ;;  %v1377_v62 = vadd.f32 %v7245_v58, %v9020_v61  ;;  %v9022_v33 = vld [vmem:[#allocation158_spill] sm:$0xff] }
 0x3b7   :  { %9017 = vst [vmem:[#allocation89_spill] sm:$0xff] %v7673_v30  ;;  %v7699_v30 = vadd.f32 %v7245_v58, %v9023_v1  ;;  %v9031_v1 = vld [vmem:[#allocation132_spill] sm:$0xff] }
 0x3b8   :  { %v2764_v8 = vpop.f32.mrf.mxu2  ;;  %v2865_v21 = vpop.f32.mrf.mxu3 }
 0x3b9   :  { %v2765_v45 = vadd.f32 %v2764_v8, %v2672_v10  ;;  %v2675_v53 = vpop.f32.mrf.mxu1  ;;  %v3051_v22 = vpop.f32.mrf.mxu0 }
 0x3bb   :  { %v2891_v48 = vadd.f32 %v2856_v26, %v2765_v45 }
 0x3bc   :  { %4822 = vmatmul.msk.f32.gmra.mxu1 %vm82_vm1, %v6772_v13  ;;  %4900 = vmatmul.msk.f32.gmra.mxu0 %vm82_vm1, %v7682_v14 }
 0x3bd   :  { %v7690_v46 = vadd.f32 %v3048_v38, %v2891_v48  ;;  %4848 = vmatmul.msk.f32.gmra.mxu2 %vm82_vm1, %v9022_v33  ;;  %4877 = vmatmul.msk.f32.gmra.mxu3 %vm82_vm1, %v1377_v62  ;;  %v1380_v38 = vadd.f32 %v7245_v58, %v9024_v18  ;;  %v9026_v33 = vld [vmem:[#allocation163_spill] sm:$0xff] }
 0x3bf   :  { %9021 = vst [vmem:[#allocation68_spill] sm:$0xff] %v7690_v46  ;;  %v7716_v46 = vadd.f32 %v7245_v58, %v9027_v9  ;;  %v9035_v9 = vld [vmem:[#allocation136_spill] sm:$0xff] }
 0x3c0   :  { %v2767_v10 = vpop.f32.mrf.mxu2  ;;  %v2868_v8 = vpop.f32.mrf.mxu3 }
 0x3c1   :  { %v2768_v61 = vadd.f32 %v2767_v10, %v2675_v53  ;;  %v2678_v26 = vpop.f32.mrf.mxu1  ;;  %v3054_v45 = vpop.f32.mrf.mxu0 }
 0x3c3   :  { %v2892_v48 = vadd.f32 %v2859_v25, %v2768_v61 }
 0x3c4   :  { %4823 = vmatmul.msk.f32.gmra.mxu1 %vm82_vm1, %v6801_v5  ;;  %4901 = vmatmul.msk.f32.gmra.mxu0 %vm82_vm1, %v7699_v30 }
 0x3c5   :  { %v7707_v62 = vadd.f32 %v3051_v22, %v2892_v48  ;;  %4849 = vmatmul.msk.f32.gmra.mxu2 %vm82_vm1, %v9026_v33  ;;  %4878 = vmatmul.msk.f32.gmra.mxu3 %vm82_vm1, %v1380_v38  ;;  %v1383_v22 = vadd.f32 %v7245_v58, %v9028_v47  ;;  %v9030_v33 = vld [vmem:[#allocation168_spill] sm:$0xff] }
 0x3c7   :  { %9025 = vst [vmem:[#allocation70_spill] sm:$0xff] %v7707_v62  ;;  %v7733_v62 = vadd.f32 %v7245_v58, %v9031_v1  ;;  %v9039_v1 = vld [vmem:[#allocation140_spill] sm:$0xff] }
 0x3c8   :  { %v2770_v53 = vpop.f32.mrf.mxu2  ;;  %v3364_v10 = vpop.f32.mrf.mxu3 }
 0x3c9   :  { %v2771_v18 = vadd.f32 %v2770_v53, %v2678_v26  ;;  %v2681_v25 = vpop.f32.mrf.mxu1  ;;  %v3057_v61 = vpop.f32.mrf.mxu0 }
 0x3cb   :  { %v2893_v48 = vadd.f32 %v2862_v41, %v2771_v18 }
 0x3cc   :  { %4824 = vmatmul.msk.f32.gmra.mxu1 %vm82_vm1, %v6828_v19  ;;  %4902 = vmatmul.msk.f32.gmra.mxu0 %vm82_vm1, %v7716_v46 }
 0x3cd   :  { %v7724_v38 = vadd.f32 %v3054_v45, %v2893_v48  ;;  %4850 = vmatmul.msk.f32.gmra.mxu2 %vm82_vm1, %v9030_v33  ;;  %4879 = vmatmul.msk.f32.gmra.mxu3 %vm82_vm1, %v1383_v22  ;;  %v1386_v45 = vadd.f32 %v7245_v58, %v9032_v63  ;;  %v9034_v33 = vld [vmem:[#allocation27_spill] sm:$0xff] }
 0x3cf   :  { %9029 = vst [vmem:[#allocation93_spill] sm:$0xff] %v7724_v38  ;;  %v7750_v38 = vadd.f32 %v7245_v58, %v9035_v9 }
 0x3d0   :  { %v2773_v26 = vpop.f32.mrf.mxu2  ;;  %v3367_v53 = vpop.f32.mrf.mxu3 }
 0x3d1   :  { %v2774_v47 = vadd.f32 %v2773_v26, %v2681_v25  ;;  %v2684_v41 = vpop.f32.mrf.mxu1  ;;  %v3060_v18 = vpop.f32.mrf.mxu0 }
 0x3d3   :  { %v2894_v48 = vadd.f32 %v2865_v21, %v2774_v47 }
 0x3d4   :  { %4825 = vmatmul.msk.f32.gmra.mxu1 %vm82_vm1, %v6855_v42  ;;  %4903 = vmatmul.msk.f32.gmra.mxu0 %vm82_vm1, %v7733_v62 }
 0x3d5   :  { %v7741_v22 = vadd.f32 %v3057_v61, %v2894_v48  ;;  %4851 = vmatmul.msk.f32.gmra.mxu2 %vm82_vm1, %v9034_v33  ;;  %4880 = vmatmul.msk.f32.gmra.mxu3 %vm82_vm1, %v1386_v45  ;;  %v1389_v61 = vadd.f32 %v7245_v58, %v9036_v39  ;;  %v9038_v33 = vld [vmem:[#allocation31_spill] sm:$0xff] }
 0x3d7   :  { %9033 = vst [vmem:[#allocation116_spill] sm:$0xff] %v7741_v22  ;;  %v7767_v22 = vadd.f32 %v7245_v58, %v9039_v1 }
 0x3d8   :  { %v2776_v25 = vpop.f32.mrf.mxu2  ;;  %v3370_v26 = vpop.f32.mrf.mxu3 }
 0x3d9   :  { %v2777_v63 = vadd.f32 %v2776_v25, %v2684_v41  ;;  %v3105_v21 = vpop.f32.mrf.mxu1  ;;  %v3556_v47 = vpop.f32.mrf.mxu0 }
 0x3db   :  { %v2895_v48 = vadd.f32 %v2868_v8, %v2777_v63 }
 0x3dc   :  { %4826 = vmatmul.msk.f32.gmra.mxu1 %vm82_vm1, %v6878_v0  ;;  %4904 = vmatmul.msk.f32.gmra.mxu0 %vm82_vm1, %v7750_v38 }
 0x3dd   :  { %v7758_v45 = vadd.f32 %v3060_v18, %v2895_v48  ;;  %4852 = vmatmul.msk.f32.gmra.mxu2 %vm82_vm1, %v9038_v33  ;;  %4881 = vmatmul.msk.f32.gmra.mxu3 %vm82_vm1, %v1389_v61  ;;  %v1392_v18 = vadd.f32 %v7245_v58, %v9040_v55  ;;  %v9042_v33 = vld [vmem:[#allocation35_spill] sm:$0xff]  ;;  %v9043_v55 = vld [vmem:[#allocation145_spill] sm:$0xff] }
 0x3df   :  { %9037 = vst [vmem:[#allocation104_spill] sm:$0xff] %v7758_v45 }
 0x3e0   :  { %v3197_v41 = vpop.f32.mrf.mxu2  ;;  %v3373_v25 = vpop.f32.mrf.mxu3 }
 0x3e1   :  { %v3198_v39 = vadd.f32 %v3197_v41, %v3105_v21  ;;  %v3108_v8 = vpop.f32.mrf.mxu1  ;;  %v3559_v63 = vpop.f32.mrf.mxu0 }
 0x3e3   :  { %v3439_v48 = vadd.f32 %v3364_v10, %v3198_v39  ;;  %v7782_v10 = vadd.f32 %v7245_v58, %v9043_v55  ;;  %v9044_v39 = vld [vmem:[#allocation28_spill] sm:$0xff] }
 0x3e4   :  { %4827 = vmatmul.msk.f32.gmra.mxu1 %vm82_vm1, %v8904_v7  ;;  %4905 = vmatmul.msk.f32.gmra.mxu0 %vm82_vm1, %v7767_v22  ;;  %v1395_v17 = vadd.f32 %v7245_v58, %v9044_v39  ;;  %v9047_v39 = vld [vmem:[#allocation150_spill] sm:$0xff] }
 0x3e5   :  { %v7775_v61 = vadd.f32 %v3556_v47, %v3439_v48  ;;  %4853 = vmatmul.msk.f32.gmra.mxu2 %vm82_vm1, %v9042_v33  ;;  %4882 = vmatmul.msk.f32.gmra.mxu3 %vm82_vm1, %v1392_v18  ;;  %v9046_v18 = vld [vmem:[#allocation40_spill] sm:$0xff] }
 0x3e7   :  { %9041 = vst [vmem:[#allocation74_spill] sm:$0xff] %v7775_v61 }
 0x3e8   :  { %v3200_v21 = vpop.f32.mrf.mxu2  ;;  %v3376_v1 = vpop.f32.mrf.mxu3 }
 0x3e9   :  { %v3201_v41 = vadd.f32 %v3200_v21, %v3108_v8  ;;  %v3111_v9 = vpop.f32.mrf.mxu1  ;;  %v3562_v45 = vpop.f32.mrf.mxu0 }
 0x3eb   :  { %v3440_v7 = vadd.f32 %v3367_v53, %v3201_v41  ;;  %v7797_v53 = vadd.f32 %v7245_v58, %v9047_v39  ;;  %v9048_v41 = vld [vmem:[#allocation32_spill] sm:$0xff] }
 0x3ec   :  { %4828 = vmatmul.msk.f32.gmra.mxu1 %vm82_vm1, %v8910_v49  ;;  %4906 = vmatmul.msk.f32.gmra.mxu0 %vm82_vm1, %v7782_v10  ;;  %v1398_v49 = vadd.f32 %v7245_v58, %v9048_v41  ;;  %v9051_v41 = vld [vmem:[#allocation155_spill] sm:$0xff] }
 0x3ed   :  { %v7790_v47 = vadd.f32 %v3559_v63, %v3440_v7  ;;  %4854 = vmatmul.msk.f32.gmra.mxu2 %vm82_vm1, %v9046_v18  ;;  %4883 = vmatmul.msk.f32.gmra.mxu3 %vm82_vm1, %v1395_v17  ;;  %v9050_v17 = vld [vmem:[#allocation43_spill] sm:$0xff] }
 0x3ef   :  { %9045 = vst [vmem:[#allocation97_spill] sm:$0xff] %v7790_v47 }
 0x3f0   :  { %v3203_v8 = vpop.f32.mrf.mxu2  ;;  %v3379_v48 = vpop.f32.mrf.mxu3 }
 0x3f1   :  { %v3204_v33 = vadd.f32 %v3203_v8, %v3111_v9  ;;  %v3114_v21 = vpop.f32.mrf.mxu1  ;;  %v3565_v55 = vpop.f32.mrf.mxu0 }
 0x3f3   :  { %v3441_v61 = vadd.f32 %v3370_v26, %v3204_v33  ;;  %v7812_v26 = vadd.f32 %v7245_v58, %v9051_v41  ;;  %v9052_v33 = vld [vmem:[#allocation36_spill] sm:$0xff] }
 0x3f4   :  { %4829 = vmatmul.msk.f32.gmra.mxu1 %vm82_vm1, %v8916_v31  ;;  %4907 = vmatmul.msk.f32.gmra.mxu0 %vm82_vm1, %v7797_v53  ;;  %v1401_v31 = vadd.f32 %v7245_v58, %v9052_v33  ;;  %v9054_v33 = vld [vmem:[#allocation160_spill] sm:$0xff] }
 0x3f5   :  { %v7805_v7 = vadd.f32 %v3562_v45, %v3441_v61  ;;  %4855 = vmatmul.msk.f32.gmra.mxu2 %vm82_vm1, %v9050_v17  ;;  %4884 = vmatmul.msk.f32.gmra.mxu3 %vm82_vm1, %v1398_v49  ;;  %v9053_v45 = vld [vmem:[#allocation46_spill] sm:$0xff] }
 0x3f7   :  { %9049 = vst [vmem:[#allocation121_spill] sm:$0xff] %v7805_v7 }
 0x3f8   :  { %v3206_v9 = vpop.f32.mrf.mxu2  ;;  %v3382_v63 = vpop.f32.mrf.mxu3 }
 0x3f9   :  { %v3207_v18 = vadd.f32 %v3206_v9, %v3114_v21  ;;  %v3117_v8 = vpop.f32.mrf.mxu1  ;;  %v3568_v39 = vpop.f32.mrf.mxu0 }
 0x3fb   :  { %v3442_v47 = vadd.f32 %v3373_v25, %v3207_v18  ;;  %v7827_v25 = vadd.f32 %v7245_v58, %v9054_v33  ;;  %v9055_v18 = vld [vmem:[#allocation4_spill] sm:$0xff] }
 0x3fc   :  { %4830 = vmatmul.msk.f32.gmra.mxu1 %vm82_vm1, %v8922_v23  ;;  %4908 = vmatmul.msk.f32.gmra.mxu0 %vm82_vm1, %v7812_v26  ;;  %v1404_v23 = vadd.f32 %v7245_v58, %v9055_v18  ;;  %v9057_v18 = vld [vmem:[#allocation165_spill] sm:$0xff] }
 0x3fd   :  { %v7820_v49 = vadd.f32 %v3565_v55, %v3442_v47  ;;  %4856 = vmatmul.msk.f32.gmra.mxu2 %vm82_vm1, %v9053_v45  ;;  %4885 = vmatmul.msk.f32.gmra.mxu3 %vm82_vm1, %v1401_v31  ;;  %v9056_v47 = vld [vmem:[#allocation50_spill] sm:$0xff] }
 0x400   :  { %v3209_v61 = vpop.f32.mrf.mxu2  ;;  %v3385_v21 = vpop.f32.mrf.mxu3 }
 0x401   :  { %v3210_v17 = vadd.f32 %v3209_v61, %v3117_v8  ;;  %v3120_v9 = vpop.f32.mrf.mxu1  ;;  %v3571_v41 = vpop.f32.mrf.mxu0 }
 0x403   :  { %v3443_v7 = vadd.f32 %v3376_v1, %v3210_v17  ;;  %v7842_v1 = vadd.f32 %v7245_v58, %v9057_v18 }
 0x404   :  { %4831 = vmatmul.msk.f32.gmra.mxu1 %vm82_vm1, %v6991_v3  ;;  %4909 = vmatmul.msk.f32.gmra.mxu0 %vm82_vm1, %v7827_v25 }
 0x405   :  { %v7835_v31 = vadd.f32 %v3568_v39, %v3443_v7  ;;  %4857 = vmatmul.msk.f32.gmra.mxu2 %vm82_vm1, %v9056_v47  ;;  %4886 = vmatmul.msk.f32.gmra.mxu3 %vm82_vm1, %v1404_v23  ;;  %v9058_v39 = vld [vmem:[#allocation54_spill] sm:$0xff] }
 0x408   :  { %v3212_v55 = vpop.f32.mrf.mxu2  ;;  %v3388_v8 = vpop.f32.mrf.mxu3 }
 0x409   :  { %v3213_v45 = vadd.f32 %v3212_v55, %v3120_v9  ;;  %v3123_v61 = vpop.f32.mrf.mxu1  ;;  %v3574_v33 = vpop.f32.mrf.mxu0 }
 0x40b   :  { %v3444_v17 = vadd.f32 %v3379_v48, %v3213_v45  ;;  %v9059_v48 = vld [vmem:[#allocation170_spill] sm:$0xff] }
 0x40c   :  { %4832 = vmatmul.msk.f32.gmra.mxu1 %vm82_vm1, %v7014_v35  ;;  %4910 = vmatmul.msk.f32.gmra.mxu0 %vm82_vm1, %v7842_v1  ;;  %v7856_v45 = vadd.f32 %v7245_v58, %v9059_v48 }
 0x40d   :  { %v7848_v7 = vadd.f32 %v3571_v41, %v3444_v17  ;;  %4858 = vmatmul.msk.f32.gmra.mxu2 %vm82_vm1, %v9058_v39  ;;  %4966 = vmatmul.msk.f32.vlgmr.msra.gmra.mxu3 %vm82_vm1, %v7478_v56  ;;  %v9061_v17 = vld [vmem:[#allocation58_spill] sm:$0xff] }
 0x410   :  { %v3215_v23 = vpop.f32.mrf.mxu2  ;;  %v3391_v9 = vpop.f32.mrf.mxu3 }
 0x411   :  { %v3216_v47 = vadd.f32 %v3215_v23, %v3123_v61  ;;  %v3126_v55 = vpop.f32.mrf.mxu1  ;;  %v3577_v18 = vpop.f32.mrf.mxu0 }
 0x413   :  { %v3445_v35 = vadd.f32 %v3382_v63, %v3216_v47  ;;  %v7871_v63 = vld [vmem:[%s8446_s10] ss:$0 sm:$0xff]  ;;  %v9062_v47 = vld [vmem:[#allocation11_spill] sm:$0xff] }
 0x414   :  { %4833 = vmatmul.msk.f32.gmra.mxu1 %vm82_vm1, %v7037_v15  ;;  %4911 = vmatmul.msk.f32.gmra.mxu0 %vm82_vm1, %v7856_v45 }
 0x415   :  { %v7862_v41 = vadd.f32 %v3574_v33, %v3445_v35  ;;  %4859 = vmatmul.msk.f32.gmra.mxu2 %vm82_vm1, %v9061_v17  ;;  %4967 = vmatmul.msk.f32.gmra.mxu3 %vm82_vm1, %v7495_v51  ;;  %v7875_v35 = vadd.f32 %v7871_v63, %v9062_v47 }
 0x417   :  { %9060 = vst [vmem:[#allocation108_spill] sm:$0xff] %v7862_v41 }
 0x418   :  { %v3218_v56 = vpop.f32.mrf.mxu2  ;;  %v3394_v61 = vpop.f32.mrf.mxu3 }
 0x419   :  { %v3219_v39 = vadd.f32 %v3218_v56, %v3126_v55  ;;  %v3129_v58 = vpop.f32.mrf.mxu1  ;;  %v3580_v23 = vpop.f32.mrf.mxu0  ;;  %v9063_v55 = vld [vmem:[#allocation14_spill] sm:$0xff] }
 0x41b   :  { %v3446_v33 = vadd.f32 %v3385_v21, %v3219_v39  ;;  %v9064_v21 = vld [vmem:[#allocation80_spill] sm:$0xff] }
 0x41c   :  { %4834 = vmatmul.msk.f32.gmra.mxu1 %vm82_vm1, %v8947_v50  ;;  %4912 = vmatmul.msk.f32.gmra.mxu0 %vm82_vm1, %v7875_v35  ;;  %v1716_v39 = vadd.f32 %v7871_v63, %v9064_v21  ;;  %v9065_v21 = vld [vmem:[#allocation84_spill] sm:$0xff] }
 0x41d   :  { %v7881_v51 = vadd.f32 %v3577_v18, %v3446_v33  ;;  %4860 = vmatmul.msk.f32.gmra.mxu2 %vm82_vm1, %v9063_v55  ;;  %4968 = vmatmul.msk.f32.gmra.mxu3 %vm82_vm1, %v7512_v60 }
 0x420   :  { %v3221_v48 = vpop.f32.mrf.mxu2  ;;  %v3397_v17 = vpop.f32.mrf.mxu3 }
 0x421   :  { %v3222_v56 = vadd.f32 %v3221_v48, %v3129_v58  ;;  %v3132_v47 = vpop.f32.mrf.mxu1  ;;  %v3583_v41 = vpop.f32.mrf.mxu0 }
 0x423   :  { %v3447_v50 = vadd.f32 %v3388_v8, %v3222_v56  ;;  %v1719_v8 = vadd.f32 %v7871_v63, %v9065_v21  ;;  %v9068_v21 = vld [vmem:[#allocation76_spill] sm:$0xff] }
 0x424   :  { %4914 = vmatmul.msk.f32.vlgmr.msra.gmra.mxu1 %vm82_vm1, %v7073_v24  ;;  %4992 = vmatmul.msk.f32.vlgmr.msra.gmra.mxu0 %vm82_vm1, %v1716_v39  ;;  %v9066_v24 = vld [vmem:[#allocation7_spill] sm:$0xff] }
 0x425   :  { %v7892_v18 = vadd.f32 %v3580_v23, %v3447_v50  ;;  %4940 = vmatmul.msk.f32.vlgmr.msra.gmra.mxu2 %vm82_vm1, %v8971_v16  ;;  %4969 = vmatmul.msk.f32.gmra.mxu3 %vm82_vm1, %v7529_v43 }
 0x428   :  { %v3224_v60 = vpop.f32.mrf.mxu2  ;;  %v3400_v58 = vpop.f32.mrf.mxu3 }
 0x429   :  { %v3225_v33 = vadd.f32 %v3224_v60, %v3132_v47  ;;  %v3135_v55 = vpop.f32.mrf.mxu1  ;;  %v3586_v48 = vpop.f32.mrf.mxu0  ;;  %v9067_v60 = vld [vmem:[#allocation88_spill] sm:$0xff] }
 0x42b   :  { %v3448_v56 = vadd.f32 %v3391_v9, %v3225_v33  ;;  %v1722_v9 = vadd.f32 %v7871_v63, %v9067_v60 }
 0x42c   :  { %4915 = vmatmul.msk.f32.gmra.mxu1 %vm82_vm1, %v9066_v24  ;;  %4993 = vmatmul.msk.f32.gmra.mxu0 %vm82_vm1, %v1719_v8  ;;  %v9069_v24 = vld [vmem:[#allocation92_spill] sm:$0xff] }
 0x42d   :  { %v7903_v50 = vadd.f32 %v3583_v41, %v3448_v56  ;;  %4941 = vmatmul.msk.f32.gmra.mxu2 %vm82_vm1, %v8976_v27  ;;  %4970 = vmatmul.msk.f32.gmra.mxu3 %vm82_vm1, %v7546_v40 }
 0x430   :  { %v3227_v16 = vpop.f32.mrf.mxu2  ;;  %v3403_v43 = vpop.f32.mrf.mxu3 }
 0x431   :  { %v3228_v23 = vadd.f32 %v3227_v16, %v3135_v55  ;;  %v3138_v47 = vpop.f32.mrf.mxu1  ;;  %v3589_v39 = vpop.f32.mrf.mxu0 }
 0x433   :  { %v3449_v33 = vadd.f32 %v3394_v61, %v3228_v23  ;;  %v1725_v61 = vadd.f32 %v7871_v63, %v9069_v24  ;;  %v9070_v23 = vld [vmem:[#allocation15_spill] sm:$0xff] }
 0x434   :  { %4916 = vmatmul.msk.f32.gmra.mxu1 %vm82_vm1, %v9068_v21  ;;  %4994 = vmatmul.msk.f32.gmra.mxu0 %vm82_vm1, %v1722_v9 }
 0x435   :  { %v7914_v41 = vadd.f32 %v3586_v48, %v3449_v33  ;;  %4942 = vmatmul.msk.f32.gmra.mxu2 %vm82_vm1, %v6482_v57  ;;  %4971 = vmatmul.msk.f32.gmra.mxu3 %vm82_vm1, %v7563_v12  ;;  %v9071_v33 = vld [vmem:[#allocation96_spill] sm:$0xff] }
 0x438   :  { %v3230_v27 = vpop.f32.mrf.mxu2  ;;  %v3406_v40 = vpop.f32.mrf.mxu3 }
 0x439   :  { %v3231_v55 = vadd.f32 %v3230_v27, %v3138_v47  ;;  %v3141_v8 = vpop.f32.mrf.mxu1  ;;  %v3592_v56 = vpop.f32.mrf.mxu0  ;;  %v9072_v27 = vld [vmem:[#allocation16_spill] sm:$0xff] }
 0x43b   :  { %v3450_v16 = vadd.f32 %v3397_v17, %v3231_v55  ;;  %v1728_v17 = vadd.f32 %v7871_v63, %v9071_v33  ;;  %v9075_v33 = vld [vmem:[#allocation103_spill] sm:$0xff] }
 0x43c   :  { %4917 = vmatmul.msk.f32.gmra.mxu1 %vm82_vm1, %v9070_v23  ;;  %4995 = vmatmul.msk.f32.gmra.mxu0 %vm82_vm1, %v1725_v61  ;;  %v9073_v61 = vld [vmem:[#allocation100_spill] sm:$0xff]  ;;  %v9074_v23 = vld [vmem:[#allocation17_spill] sm:$0xff] }
 0x43d   :  { %v7925_v48 = vadd.f32 %v3589_v39, %v3450_v16  ;;  %4943 = vmatmul.msk.f32.gmra.mxu2 %vm82_vm1, %v6511_v4  ;;  %4972 = vmatmul.msk.f32.gmra.mxu3 %vm82_vm1, %v7580_v34 }
 0x440   :  { %v3233_v57 = vpop.f32.mrf.mxu2  ;;  %v3409_v12 = vpop.f32.mrf.mxu3 }
 0x441   :  { %v3234_v47 = vadd.f32 %v3233_v57, %v3141_v8  ;;  %v3144_v60 = vpop.f32.mrf.mxu1  ;;  %v3595_v9 = vpop.f32.mrf.mxu0 }
 0x443   :  { %v3451_v21 = vadd.f32 %v3400_v58, %v3234_v47  ;;  %v1731_v58 = vadd.f32 %v7871_v63, %v9073_v61 }
 0x444   :  { %4918 = vmatmul.msk.f32.gmra.mxu1 %vm82_vm1, %v9072_v27  ;;  %4996 = vmatmul.msk.f32.gmra.mxu0 %vm82_vm1, %v1728_v17 }
 0x445   :  { %v7936_v39 = vadd.f32 %v3592_v56, %v3451_v21  ;;  %4944 = vmatmul.msk.f32.gmra.mxu2 %vm82_vm1, %v6540_v20  ;;  %4973 = vmatmul.msk.f32.gmra.mxu3 %vm82_vm1, %v7597_v28  ;;  %v9076_v21 = vld [vmem:[#allocation18_spill] sm:$0xff] }
 0x448   :  { %v3236_v4 = vpop.f32.mrf.mxu2  ;;  %v3412_v34 = vpop.f32.mrf.mxu3 }
 0x449   :  { %v3237_v55 = vadd.f32 %v3236_v4, %v3144_v60  ;;  %v3147_v8 = vpop.f32.mrf.mxu1  ;;  %v3598_v24 = vpop.f32.mrf.mxu0 }
 0x44b   :  { %v3452_v16 = vadd.f32 %v3403_v43, %v3237_v55  ;;  %v1734_v43 = vadd.f32 %v7871_v63, %v9075_v33  ;;  %v9080_v33 = vld [vmem:[#allocation20_spill] sm:$0xff] }
 0x44c   :  { %4919 = vmatmul.msk.f32.gmra.mxu1 %vm82_vm1, %v9074_v23  ;;  %4997 = vmatmul.msk.f32.gmra.mxu0 %vm82_vm1, %v1731_v58  ;;  %v9078_v58 = vld [vmem:[#allocation19_spill] sm:$0xff] }
 0x44d   :  { %v7947_v56 = vadd.f32 %v3595_v9, %v3452_v16  ;;  %4945 = vmatmul.msk.f32.gmra.mxu2 %vm82_vm1, %v6569_v36  ;;  %4974 = vmatmul.msk.f32.gmra.mxu3 %vm82_vm1, %v7614_v59 }
 0x450   :  { %v3239_v20 = vpop.f32.mrf.mxu2  ;;  %v3415_v28 = vpop.f32.mrf.mxu3 }
 0x451   :  { %v3240_v57 = vadd.f32 %v3239_v20, %v3147_v8  ;;  %v3150_v47 = vpop.f32.mrf.mxu1  ;;  %v3601_v60 = vpop.f32.mrf.mxu0  ;;  %v9077_v8 = vld [vmem:[#allocation107_spill] sm:$0xff] }
 0x453   :  { %v3453_v17 = vadd.f32 %v3406_v40, %v3240_v57  ;;  %v1737_v40 = vadd.f32 %v7871_v63, %v9077_v8  ;;  %v9079_v57 = vld [vmem:[#allocation111_spill] sm:$0xff] }
 0x454   :  { %4920 = vmatmul.msk.f32.gmra.mxu1 %vm82_vm1, %v9076_v21  ;;  %4998 = vmatmul.msk.f32.gmra.mxu0 %vm82_vm1, %v1734_v43 }
 0x455   :  { %v7958_v9 = vadd.f32 %v3598_v24, %v3453_v17  ;;  %4946 = vmatmul.msk.f32.gmra.mxu2 %vm82_vm1, %v6598_v52  ;;  %4975 = vmatmul.msk.f32.gmra.mxu3 %vm82_vm1, %v7631_v2 }
 0x458   :  { %v3242_v36 = vpop.f32.mrf.mxu2  ;;  %v3418_v59 = vpop.f32.mrf.mxu3 }
 0x459   :  { %v3243_v27 = vadd.f32 %v3242_v36, %v3150_v47  ;;  %v3153_v4 = vpop.f32.mrf.mxu1  ;;  %v3604_v55 = vpop.f32.mrf.mxu0  ;;  %v9081_v36 = vld [vmem:[#allocation115_spill] sm:$0xff] }
 0x45b   :  { %v3454_v61 = vadd.f32 %v3409_v12, %v3243_v27  ;;  %v1740_v12 = vadd.f32 %v7871_v63, %v9079_v57 }
 0x45c   :  { %4921 = vmatmul.msk.f32.gmra.mxu1 %vm82_vm1, %v9078_v58  ;;  %4999 = vmatmul.msk.f32.gmra.mxu0 %vm82_vm1, %v1737_v40  ;;  %v9083_v58 = vld [vmem:[#allocation120_spill] sm:$0xff] }
 0x45d   :  { %v7969_v24 = vadd.f32 %v3601_v60, %v3454_v61  ;;  %4947 = vmatmul.msk.f32.gmra.mxu2 %vm82_vm1, %v6627_v6  ;;  %4976 = vmatmul.msk.f32.gmra.mxu3 %vm82_vm1, %v7648_v11 }
 0x460   :  { %v3245_v52 = vpop.f32.mrf.mxu2  ;;  %v3421_v2 = vpop.f32.mrf.mxu3 }
 0x461   :  { %v3246_v16 = vadd.f32 %v3245_v52, %v3153_v4  ;;  %v3156_v23 = vpop.f32.mrf.mxu1  ;;  %v3607_v20 = vpop.f32.mrf.mxu0  ;;  %v9082_v4 = vld [vmem:[#allocation21_spill] sm:$0xff] }
 0x463   :  { %v3455_v47 = vadd.f32 %v3412_v34, %v3246_v16  ;;  %v1743_v34 = vadd.f32 %v7871_v63, %v9081_v36  ;;  %v9084_v16 = vld [vmem:[#allocation23_spill] sm:$0xff] }
 0x464   :  { %4922 = vmatmul.msk.f32.gmra.mxu1 %vm82_vm1, %v9080_v33  ;;  %5000 = vmatmul.msk.f32.gmra.mxu0 %vm82_vm1, %v1740_v12 }
 0x465   :  { %v7980_v60 = vadd.f32 %v3604_v55, %v3455_v47  ;;  %4948 = vmatmul.msk.f32.gmra.mxu2 %vm82_vm1, %v6656_v44  ;;  %4977 = vmatmul.msk.f32.gmra.mxu3 %vm82_vm1, %v7665_v37  ;;  %v9085_v47 = vld [vmem:[#allocation125_spill] sm:$0xff] }
 0x468   :  { %v3248_v6 = vpop.f32.mrf.mxu2  ;;  %v3424_v11 = vpop.f32.mrf.mxu3 }
 0x469   :  { %v3249_v43 = vadd.f32 %v3248_v6, %v3156_v23  ;;  %v3159_v17 = vpop.f32.mrf.mxu1  ;;  %v3610_v21 = vpop.f32.mrf.mxu0  ;;  %v9086_v6 = vld [vmem:[#allocation25_spill] sm:$0xff] }
 0x46b   :  { %v3456_v27 = vadd.f32 %v3415_v28, %v3249_v43  ;;  %v1746_v28 = vadd.f32 %v7871_v63, %v9083_v58  ;;  %v9089_v58 = vld [vmem:[#allocation133_spill] sm:$0xff] }
 0x46c   :  { %4923 = vmatmul.msk.f32.gmra.mxu1 %vm82_vm1, %v9082_v4  ;;  %5001 = vmatmul.msk.f32.gmra.mxu0 %vm82_vm1, %v1743_v34  ;;  %v9087_v34 = vld [vmem:[#allocation129_spill] sm:$0xff] }
 0x46d   :  { %v7991_v55 = vadd.f32 %v3607_v20, %v3456_v27  ;;  %4949 = vmatmul.msk.f32.gmra.mxu2 %vm82_vm1, %v6685_v54  ;;  %4978 = vmatmul.msk.f32.gmra.mxu3 %vm82_vm1, %v7682_v14  ;;  %v9088_v4 = vld [vmem:[#allocation29_spill] sm:$0xff] }
 0x470   :  { %v3251_v44 = vpop.f32.mrf.mxu2  ;;  %v3427_v37 = vpop.f32.mrf.mxu3 }
 0x471   :  { %v3252_v8 = vadd.f32 %v3251_v44, %v3159_v17  ;;  %v3162_v40 = vpop.f32.mrf.mxu1  ;;  %v3613_v61 = vpop.f32.mrf.mxu0 }
 0x473   :  { %v3457_v52 = vadd.f32 %v3418_v59, %v3252_v8  ;;  %v1749_v59 = vadd.f32 %v7871_v63, %v9085_v47 }
 0x474   :  { %4924 = vmatmul.msk.f32.gmra.mxu1 %vm82_vm1, %v9084_v16  ;;  %5002 = vmatmul.msk.f32.gmra.mxu0 %vm82_vm1, %v1746_v28 }
 0x475   :  { %v8002_v23 = vadd.f32 %v3610_v21, %v3457_v52  ;;  %4950 = vmatmul.msk.f32.gmra.mxu2 %vm82_vm1, %v6714_v29  ;;  %4979 = vmatmul.msk.f32.gmra.mxu3 %vm82_vm1, %v7699_v30  ;;  %v9090_v52 = vld [vmem:[#allocation33_spill] sm:$0xff] }
 0x478   :  { %v3254_v54 = vpop.f32.mrf.mxu2  ;;  %v3430_v14 = vpop.f32.mrf.mxu3 }
 0x479   :  { %v3255_v20 = vadd.f32 %v3254_v54, %v3162_v40  ;;  %v3165_v57 = vpop.f32.mrf.mxu1  ;;  %v3616_v12 = vpop.f32.mrf.mxu0 }
 0x47b   :  { %v3458_v33 = vadd.f32 %v3421_v2, %v3255_v20  ;;  %v1752_v2 = vadd.f32 %v7871_v63, %v9087_v34  ;;  %v9094_v34 = vld [vmem:[#allocation41_spill] sm:$0xff] }
 0x47c   :  { %4925 = vmatmul.msk.f32.gmra.mxu1 %vm82_vm1, %v9086_v6  ;;  %5003 = vmatmul.msk.f32.gmra.mxu0 %vm82_vm1, %v1749_v59  ;;  %v9092_v59 = vld [vmem:[#allocation37_spill] sm:$0xff] }
 0x47d   :  { %v8013_v43 = vadd.f32 %v3613_v61, %v3458_v33  ;;  %4951 = vmatmul.msk.f32.gmra.mxu2 %vm82_vm1, %v6743_v32  ;;  %4980 = vmatmul.msk.f32.gmra.mxu3 %vm82_vm1, %v7716_v46 }
 0x480   :  { %v3257_v29 = vpop.f32.mrf.mxu2  ;;  %v3433_v30 = vpop.f32.mrf.mxu3 }
 0x481   :  { %v3258_v17 = vadd.f32 %v3257_v29, %v3165_v57  ;;  %v3168_v21 = vpop.f32.mrf.mxu1  ;;  %v3619_v36 = vpop.f32.mrf.mxu0 }
 0x483   :  { %v3459_v27 = vadd.f32 %v3424_v11, %v3258_v17  ;;  %v1755_v11 = vadd.f32 %v7871_v63, %v9089_v58 }
 0x484   :  { %4926 = vmatmul.msk.f32.gmra.mxu1 %vm82_vm1, %v9088_v4  ;;  %5004 = vmatmul.msk.f32.gmra.mxu0 %vm82_vm1, %v1752_v2 }
 0x485   :  { %v8024_v44 = vadd.f32 %v3616_v12, %v3459_v27  ;;  %4952 = vmatmul.msk.f32.gmra.mxu2 %vm82_vm1, %v6772_v13  ;;  %4981 = vmatmul.msk.f32.gmra.mxu3 %vm82_vm1, %v7733_v62  ;;  %v9091_v12 = vld [vmem:[#allocation137_spill] sm:$0xff] }
 0x488   :  { %v3260_v32 = vpop.f32.mrf.mxu2  ;;  %v3436_v46 = vpop.f32.mrf.mxu3 }
 0x489   :  { %v3261_v8 = vadd.f32 %v3260_v32, %v3168_v21  ;;  %v3171_v40 = vpop.f32.mrf.mxu1  ;;  %v3622_v61 = vpop.f32.mrf.mxu0  ;;  %v9093_v21 = vld [vmem:[#allocation142_spill] sm:$0xff] }
 0x48b   :  { %v3460_v28 = vadd.f32 %v3427_v37, %v3261_v8  ;;  %v1758_v37 = vadd.f32 %v7871_v63, %v9091_v12  ;;  %v9095_v8 = vld [vmem:[#allocation147_spill] sm:$0xff] }
 0x48c   :  { %4927 = vmatmul.msk.f32.gmra.mxu1 %vm82_vm1, %v9090_v52  ;;  %5005 = vmatmul.msk.f32.gmra.mxu0 %vm82_vm1, %v1755_v11 }
 0x48d   :  { %v8035_v16 = vadd.f32 %v3619_v36, %v3460_v28  ;;  %4953 = vmatmul.msk.f32.gmra.mxu2 %vm82_vm1, %v6801_v5  ;;  %4982 = vmatmul.msk.f32.gmra.mxu3 %vm82_vm1, %v7750_v38 }
 0x490   :  { %v3263_v13 = vpop.f32.mrf.mxu2  ;;  %v3857_v62 = vpop.f32.mrf.mxu3 }
 0x491   :  { %v3264_v54 = vadd.f32 %v3263_v13, %v3171_v40  ;;  %v3174_v20 = vpop.f32.mrf.mxu1  ;;  %v3625_v57 = vpop.f32.mrf.mxu0 }
 0x493   :  { %v3461_v47 = vadd.f32 %v3430_v14, %v3264_v54  ;;  %v1761_v14 = vadd.f32 %v7871_v63, %v9093_v21 }
 0x494   :  { %4928 = vmatmul.msk.f32.gmra.mxu1 %vm82_vm1, %v9092_v59  ;;  %5006 = vmatmul.msk.f32.gmra.mxu0 %vm82_vm1, %v1758_v37  ;;  %v8089_v37 = vld [vmem:[%s8456_s12] ss:$0 sm:$0xff]  ;;  %v9101_v59 = vld [vmem:[#allocation47_spill] sm:$0xff] }
 0x495   :  { %v8046_v33 = vadd.f32 %v3622_v61, %v3461_v47  ;;  %4954 = vmatmul.msk.f32.gmra.mxu2 %vm82_vm1, %v6828_v19  ;;  %4983 = vmatmul.msk.f32.gmra.mxu3 %vm82_vm1, %v7767_v22  ;;  %v9096_v61 = vld [vmem:[#allocation39_spill] sm:$0xff] }
 0x498   :  { %v3266_v5 = vpop.f32.mrf.mxu2  ;;  %v3860_v38 = vpop.f32.mrf.mxu3 }
 0x499   :  { %v3267_v6 = vadd.f32 %v3266_v5, %v3174_v20  ;;  %v3177_v29 = vpop.f32.mrf.mxu1  ;;  %v3628_v17 = vpop.f32.mrf.mxu0  ;;  %v9098_v20 = vld [vmem:[#allocation146_spill] sm:$0xff] }
 0x49a   :  { %v9102_v5 = vld [vmem:[#allocation42_spill] sm:$0xff] }
 0x49b   :  { %v3462_v36 = vadd.f32 %v3433_v30, %v3267_v6  ;;  %v1764_v30 = vadd.f32 %v7871_v63, %v9095_v8  ;;  %v9103_v6 = vmax.f32 %v9101_v59, %v9102_v5  ;;  %v8110_v8 = vld [vmem:[%s8458_s14] ss:$0 sm:$0xff]  ;;  %v9112_v5 = vld [vmem:[#allocation44_spill] sm:$0xff] }
 0x49c   :  { %4929 = vmatmul.msk.f32.gmra.mxu1 %vm82_vm1, %v9094_v34  ;;  %5007 = vmatmul.msk.f32.gmra.mxu0 %vm82_vm1, %v1761_v14 }
 0x49d   :  { %v8057_v2 = vadd.f32 %v3625_v57, %v3462_v36  ;;  %4955 = vmatmul.msk.f32.gmra.mxu2 %vm82_vm1, %v6855_v42  ;;  %4984 = vmatmul.msk.f32.gmra.mxu3 %vm82_vm1, %v7782_v10  ;;  %v9104_v36 = vld [vmem:[#allocation157_spill] sm:$0xff] }
 0x4a0   :  { %v3269_v19 = vpop.f32.mrf.mxu2  ;;  %v3863_v22 = vpop.f32.mrf.mxu3 }
 0x4a1   :  { %v3270_v27 = vadd.f32 %v3269_v19, %v3177_v29  ;;  %v3673_v4 = vpop.f32.mrf.mxu1  ;;  %v4049_v32 = vpop.f32.mrf.mxu0  ;;  %v8102_v19 = vld [vmem:[%s8457_s13] ss:$0 sm:$0xff] }
 0x4a3   :  { %v3463_v40 = vadd.f32 %v3436_v46, %v3270_v27  ;;  %v9097_v46 = vld [vmem:[#allocation152_spill] sm:$0xff] }
 0x4a4   :  { %4930 = vmatmul.msk.f32.gmra.mxu1 %vm82_vm1, %v9096_v61  ;;  %5008 = vmatmul.msk.f32.gmra.mxu0 %vm82_vm1, %v1764_v30  ;;  %v1767_v13 = vadd.f32 %v7871_v63, %v9097_v46  ;;  %v9107_v61 = vld [vmem:[#allocation97_spill] sm:$0xff] }
 0x4a5   :  { %v8068_v58 = vadd.f32 %v3628_v17, %v3463_v40  ;;  %4956 = vmatmul.msk.f32.gmra.mxu2 %vm82_vm1, %v6878_v0  ;;  %4985 = vmatmul.msk.f32.gmra.mxu3 %vm82_vm1, %v7797_v53  ;;  %v9099_v0 = vld [vmem:[#allocation6_spill] sm:$0xff]  ;;  %v9106_v40 = vld [vmem:[#allocation8_spill] sm:$0xff] }
 0x4a6   :  { %v9100_v53 = vld [vmem:[#allocation74_spill] sm:$0xff] }
 0x4a8   :  { %v3765_v42 = vpop.f32.mrf.mxu2  ;;  %v8074_v10 = vpop.f32.mrf.mxu3 }
 0x4a9   :  { %v3766_v11 = vadd.f32 %v3765_v42, %v3673_v4  ;;  %v3676_v28 = vpop.f32.mrf.mxu1  ;;  %v4052_v52 = vpop.f32.mrf.mxu0  ;;  %v9105_v4 = vld [vmem:[#allocation49_spill] sm:$0xff] }
 0x4ab   :  { %v3932_v54 = vadd.f32 %v3857_v62, %v3766_v11 }
 0x4ac   :  { %4931 = vmatmul.msk.f32.gmra.mxu1 %vm82_vm1, %v9098_v20  ;;  %5009 = vmatmul.msk.f32.gmra.mxu0 %vm82_vm1, %v1767_v13  ;;  %v9108_v13 = vld [vmem:[#allocation51_spill] sm:$0xff] }
 0x4ad   :  { %v4124_v57 = vadd.f32 %v4049_v32, %v3932_v54  ;;  %4957 = vmatmul.msk.f32.gmra.mxu2 %vm82_vm1, %v9099_v0  ;;  %4986 = vmatmul.msk.f32.gmra.mxu3 %vm82_vm1, %v7812_v26  ;;  %v1770_v26 = vadd.f32 %v7871_v63, %v9104_v36  ;;  %v9109_v54 = vld [vmem:[#allocation151_spill] sm:$0xff]  ;;  %v9114_v36 = vld [vmem:[#allocation121_spill] sm:$0xff] }
 0x4ae   :  { %v9110_v20 = vmax.f32 %v9108_v13, %v9109_v54  ;;  %v9119_v13 = vld [vmem:[#allocation156_spill] sm:$0xff] }
 0x4af   :  { %v4174_v12 = vmax.f32 %v9100_v53, %v4124_v57 }
 0x4b0   :  { %v3768_v62 = vpop.f32.mrf.mxu2  ;;  %v8091_v47 = vpop.f32.mrf.mxu3 }
 0x4b1   :  { %v4199_v29 = vmax.f32 %v9103_v6, %v4174_v12  ;;  %v3769_v17 = vadd.f32 %v3768_v62, %v3676_v28  ;;  %v3679_v21 = vpop.f32.mrf.mxu1  ;;  %v4055_v14 = vpop.f32.mrf.mxu0  ;;  %v9111_v12 = vld [vmem:[#allocation162_spill] sm:$0xff] }
 0x4b3   :  { %v4228_v34 = vadd.f32 %v8089_v37, %v4199_v29  ;;  %v3933_v27 = vadd.f32 %v3860_v38, %v3769_v17  ;;  %v9113_v17 = vld [vmem:[#allocation10_spill] sm:$0xff] }
 0x4b4   :  { %4932 = vmatmul.msk.f32.gmra.mxu1 %vm82_vm1, %v9105_v4  ;;  %5010 = vmatmul.msk.f32.gmra.mxu0 %vm82_vm1, %v1770_v26  ;;  %v9115_v4 = vld [vmem:[#allocation55_spill] sm:$0xff] }
 0x4b5   :  { %v4253_v32 = vmax.f32 %v4228_v34, 0.0  ;;  %v4125_v30 = vadd.f32 %v4052_v52, %v3933_v27  ;;  %4958 = vmatmul.msk.f32.gmra.mxu2 %vm82_vm1, %v9106_v40  ;;  %4987 = vmatmul.msk.f32.gmra.mxu3 %vm82_vm1, %v7827_v25  ;;  %v1773_v25 = vadd.f32 %v7871_v63, %v9111_v12 }
 0x4b7   :  { %v4282_v38 = vmul.f32 %v8102_v19, %v4253_v32  ;;  %v4175_v42 = vmax.f32 %v9107_v61, %v4125_v30  ;;  %v9116_v32 = vld [vmem:[#allocation53_spill] sm:$0xff] }
 0x4b8   :  { %v3771_v11 = vpop.f32.mrf.mxu2  ;;  %v8118_v28 = vpop.f32.mrf.mxu3  ;;  %v9117_v30 = vmax.f32 %v9115_v4, %v9116_v32 }
 0x4b9   :  { %v4311_v46 = vadd.f32 %v8110_v8, %v4282_v38  ;;  %v4200_v52 = vmax.f32 %v9110_v20, %v4175_v42  ;;  %v3772_v57 = vadd.f32 %v3771_v11, %v3679_v21  ;;  %v3682_v0 = vpop.f32.mrf.mxu1  ;;  %v4058_v53 = vpop.f32.mrf.mxu0  ;;  %v9118_v42 = vld [vmem:[#allocation167_spill] sm:$0xff] }
 0x4ba   :  { %v1776_v11 = vadd.f32 %v7871_v63, %v9118_v42 }
 0x4bb   :  { %4337 = vst.msk [vmem:[%s8459_s15] sm:$0xff] %vm4336_vm2, %v4311_v46  ;;  %v4229_v62 = vadd.f32 %v8089_v37, %v4200_v52  ;;  %v3934_v59 = vadd.f32 %v3863_v22, %v3772_v57  ;;  %v9120_v52 = vld [vmem:[#allocation12_spill] sm:$0xff] }
 0x4bc   :  { %4933 = vmatmul.msk.f32.gmra.mxu1 %vm82_vm1, %v9112_v5  ;;  %5011 = vmatmul.msk.f32.gmra.mxu0 %vm82_vm1, %v1773_v25 }
 0x4bd   :  { %v4254_v6 = vmax.f32 %v4229_v62, 0.0  ;;  %v4126_v29 = vadd.f32 %v4055_v14, %v3934_v59  ;;  %4959 = vmatmul.msk.f32.gmra.mxu2 %vm82_vm1, %v9113_v17  ;;  %4988 = vmatmul.msk.f32.gmra.mxu3 %vm82_vm1, %v7842_v1  ;;  %v9121_v62 = vld [vmem:[#allocation59_spill] sm:$0xff]  ;;  %v9122_v59 = vld [vmem:[#allocation48_spill] sm:$0xff] }
 0x4be   :  { %v9123_v5 = vmax.f32 %v9121_v62, %v9122_v59 }
 0x4bf   :  { %v4283_v21 = vmul.f32 %v8102_v19, %v4254_v6  ;;  %v4176_v26 = vmax.f32 %v9114_v36, %v4126_v29 }
 0x4c0   :  { %v3774_v34 = vpop.f32.mrf.mxu2  ;;  %v8140_v27 = vpop.f32.mrf.mxu3 }
 0x4c1   :  { %v4312_v22 = vadd.f32 %v8110_v8, %v4283_v21  ;;  %v4201_v40 = vmax.f32 %v9117_v30, %v4176_v26  ;;  %v3775_v14 = vadd.f32 %v3774_v34, %v3682_v0  ;;  %v3685_v38 = vpop.f32.mrf.mxu1  ;;  %v4061_v61 = vpop.f32.mrf.mxu0  ;;  %v9124_v21 = vld [vmem:[#allocation172_spill] sm:$0xff]  ;;  %v9125_v26 = vld [vmem:[#allocation57_spill] sm:$0xff] }
 0x4c2   :  { %v1779_v36 = vadd.f32 %v7871_v63, %v9124_v21 }
 0x4c3   :  { %4338 = vst.msk [vmem:[%s8459_s15 + $0x8] sm:$0xff] %vm4336_vm2, %v4312_v22  ;;  %v4230_v1 = vadd.f32 %v8089_v37, %v4201_v40  ;;  %v3935_v46 = vadd.f32 %v8074_v10, %v3775_v14  ;;  %v9126_v14 = vld [vmem:[#allocation62_spill] sm:$0xff] }
 0x4c4   :  { %4934 = vmatmul.msk.f32.gmra.mxu1 %vm82_vm1, %v9119_v13  ;;  %5012 = vmatmul.msk.f32.gmra.mxu0 %vm82_vm1, %v1776_v11  ;;  %v9129_v13 = vld [vmem:[#allocation173_spill] sm:$0xff] }
 0x4c5   :  { %v4255_v54 = vmax.f32 %v4230_v1, 0.0  ;;  %v4127_v20 = vadd.f32 %v4058_v53, %v3935_v46  ;;  %4960 = vmatmul.msk.f32.gmra.mxu2 %vm82_vm1, %v9120_v52  ;;  %4989 = vmatmul.msk.f32.gmra.mxu3 %vm82_vm1, %v7856_v45 }
 0x4c7   :  { %v4284_v57 = vmul.f32 %v8102_v19, %v4255_v54  ;;  %v4177_v0 = vmax.f32 %v7820_v49, %v4127_v20  ;;  %v9130_v54 = vld [vmem:[#allocation52_spill] sm:$0xff] }
 0x4c8   :  { %v3777_v12 = vpop.f32.mrf.mxu2  ;;  %v8163_v25 = vpop.f32.mrf.mxu3 }
 0x4c9   :  { %v4313_v10 = vadd.f32 %v8110_v8, %v4284_v57  ;;  %v4202_v6 = vmax.f32 %v9123_v5, %v4177_v0  ;;  %v3778_v53 = vadd.f32 %v3777_v12, %v3685_v38  ;;  %v3688_v29 = vpop.f32.mrf.mxu1  ;;  %v4064_v17 = vpop.f32.mrf.mxu0  ;;  %v9127_v38 = vld [vmem:[#allocation161_spill] sm:$0xff]  ;;  %v9131_v57 = vld [vmem:[#allocation64_spill] sm:$0xff]  ;;  %v9132_v5 = vld [vmem:[#allocation3_spill] sm:$0xff] }
 0x4ca   :  { %v9128_v42 = vmax.f32 %v9126_v14, %v9127_v38 }
 0x4cb   :  { %4339 = vst.msk [vmem:[%s8459_s15 + $0x10] sm:$0xff] %vm4336_vm2, %v4313_v10  ;;  %v4231_v49 = vadd.f32 %v8089_v37, %v4202_v6  ;;  %v3936_v45 = vadd.f32 %v8091_v47, %v3778_v53 }
 0x4cc   :  { %4935 = vmatmul.msk.f32.gmra.mxu1 %vm82_vm1, %v9125_v26  ;;  %5013 = vmatmul.msk.f32.gmra.mxu0 %vm82_vm1, %v1779_v36  ;;  %v9136_v26 = vld [vmem:[#allocation166_spill] sm:$0xff] }
 0x4cd   :  { %v4256_v34 = vmax.f32 %v4231_v49, 0.0  ;;  %v4128_v22 = vadd.f32 %v4061_v61, %v3936_v45  ;;  %4961 = vmatmul.msk.f32.gmra.mxu2 %vm82_vm1, %v6991_v3  ;;  %4990 = vmatmul.msk.f32.gmra.mxu3 %vm82_vm1, %v7875_v35  ;;  %v1782_v3 = vadd.f32 %v7871_v63, %v9129_v13  ;;  %v9135_v49 = vld [vmem:[#allocation34_spill] sm:$0xff] }
 0x4cf   :  { %v4285_v4 = vmul.f32 %v8102_v19, %v4256_v34  ;;  %v4178_v32 = vmax.f32 %v7835_v31, %v4128_v22 }
 0x4d0   :  { %v3780_v30 = vpop.f32.mrf.mxu2  ;;  %v3881_v40 = vpop.f32.mrf.mxu3 }
 0x4d1   :  { %v4314_v47 = vadd.f32 %v8110_v8, %v4285_v4  ;;  %v4203_v11 = vmax.f32 %v9128_v42, %v4178_v32  ;;  %v3781_v1 = vadd.f32 %v3780_v30, %v3688_v29  ;;  %v3691_v61 = vpop.f32.mrf.mxu1  ;;  %v4067_v46 = vpop.f32.mrf.mxu0  ;;  %v9137_v32 = vld [vmem:[#allocation108_spill] sm:$0xff]  ;;  %v9138_v42 = vld [vmem:[#allocation67_spill] sm:$0xff] }
 0x4d3   :  { %4340 = vst.msk [vmem:[%s8459_s15 + $0x18] sm:$0xff] %vm4336_vm2, %v4314_v47  ;;  %v4232_v31 = vadd.f32 %v8089_v37, %v4203_v11  ;;  %v3937_v35 = vadd.f32 %v8118_v28, %v3781_v1  ;;  %v9133_v28 = vld [vmem:[#allocation61_spill] sm:$0xff] }
 0x4d4   :  { %4936 = vmatmul.msk.f32.gmra.mxu1 %vm82_vm1, %v9130_v54  ;;  %5014 = vmatmul.msk.f32.gmra.mxu0 %vm82_vm1, %v1782_v3  ;;  %v9134_v6 = vmax.f32 %v9132_v5, %v9133_v28  ;;  %v9142_v54 = vld [vmem:[#allocation65_spill] sm:$0xff]  ;;  %v9144_v5 = vld [vmem:[#allocation71_spill] sm:$0xff] }
 0x4d5   :  { %v4257_v20 = vmax.f32 %v4232_v31, 0.0  ;;  %v4129_v52 = vadd.f32 %v4064_v17, %v3937_v35  ;;  %4962 = vmatmul.msk.f32.gmra.mxu2 %vm82_vm1, %v9131_v57  ;;  %v1785_v17 = vadd.f32 %v7871_v63, %v9135_v49  ;;  %v9141_v31 = vld [vmem:[#allocation38_spill] sm:$0xff]  ;;  %v9143_v57 = vld [vmem:[#allocation5_spill] sm:$0xff] }
 0x4d7   :  { %v4286_v0 = vmul.f32 %v8102_v19, %v4257_v20  ;;  %v4179_v12 = vmax.f32 %v7848_v7, %v4129_v52 }
 0x4d8   :  { %v3783_v10 = vpop.f32.mrf.mxu2  ;;  %v3884_v62 = vpop.f32.mrf.mxu3 }
 0x4d9   :  { %v4315_v59 = vadd.f32 %v8110_v8, %v4286_v0  ;;  %v4204_v53 = vmax.f32 %v9134_v6, %v4179_v12  ;;  %v3784_v29 = vadd.f32 %v3783_v10, %v3691_v61  ;;  %v3694_v21 = vpop.f32.mrf.mxu1  ;;  %v4070_v36 = vpop.f32.mrf.mxu0 }
 0x4db   :  { %4341 = vst.msk [vmem:[%s8459_s15 + $0x20] sm:$0xff] %vm4336_vm2, %v4315_v59  ;;  %v4233_v7 = vadd.f32 %v8089_v37, %v4204_v53  ;;  %v3938_v45 = vadd.f32 %v8140_v27, %v3784_v29  ;;  %v9139_v27 = vld [vmem:[#allocation56_spill] sm:$0xff] }
 0x4dc   :  { %4937 = vmatmul.msk.f32.gmra.mxu1 %vm82_vm1, %v9136_v26  ;;  %5015 = vmatmul.msk.f32.gmra.mxu0 %vm82_vm1, %v1785_v17  ;;  %v9140_v11 = vmax.f32 %v9138_v42, %v9139_v27 }
 0x4dd   :  { %v4258_v34 = vmax.f32 %v4233_v7, 0.0  ;;  %v4130_v22 = vadd.f32 %v4067_v46, %v3938_v45  ;;  %4963 = vmatmul.msk.f32.gmra.mxu2 %vm82_vm1, %v7037_v15  ;;  %v1788_v46 = vadd.f32 %v7871_v63, %v9141_v31 }
 0x4df   :  { %v4287_v4 = vmul.f32 %v8102_v19, %v4258_v34  ;;  %v4180_v30 = vmax.f32 %v9137_v32, %v4130_v22  ;;  %v9147_v22 = vld [vmem:[#allocation72_spill] sm:$0xff] }
 0x4e0   :  { %v3786_v47 = vpop.f32.mrf.mxu2  ;;  %v3887_v14 = vpop.f32.mrf.mxu3 }
 0x4e1   :  { %v4316_v38 = vadd.f32 %v8110_v8, %v4287_v4  ;;  %v4205_v1 = vmax.f32 %v9140_v11, %v4180_v30  ;;  %v3787_v61 = vadd.f32 %v3786_v47, %v3694_v21  ;;  %v3697_v13 = vpop.f32.mrf.mxu1  ;;  %v4073_v3 = vpop.f32.mrf.mxu0  ;;  %v9148_v4 = vld [vmem:[#allocation60_spill] sm:$0xff] }
 0x4e2   :  { %v9149_v32 = vmax.f32 %v9147_v22, %v9148_v4 }
 0x4e3   :  { %4342 = vst.msk [vmem:[%s8459_s15 + $0x28] sm:$0xff] %vm4336_vm2, %v4316_v38  ;;  %v4234_v15 = vadd.f32 %v8089_v37, %v4205_v1  ;;  %v3939_v35 = vadd.f32 %v8163_v25, %v3787_v61  ;;  %v9145_v25 = vld [vmem:[#allocation171_spill] sm:$0xff] }
 0x4e4   :  { %4938 = vmatmul.msk.f32.gmra.mxu1 %vm82_vm1, %v9142_v54  ;;  %5016 = vmatmul.msk.f32.gmra.mxu0 %vm82_vm1, %v1788_v46  ;;  %v9146_v28 = vmax.f32 %v9144_v5, %v9145_v25  ;;  %v9150_v46 = vld [vmem:[#allocation75_spill] sm:$0xff] }
 0x4e5   :  { %v4259_v20 = vmax.f32 %v4234_v15, 0.0  ;;  %v4131_v52 = vadd.f32 %v4070_v36, %v3939_v35  ;;  %4964 = vmatmul.msk.f32.gmra.mxu2 %vm82_vm1, %v9143_v57  ;;  %v9151_v15 = vld [vmem:[#allocation69_spill] sm:$0xff] }
 0x4e6   :  { %v9152_v35 = vmax.f32 %v9150_v46, %v9151_v15  ;;  %v9159_v15 = vld [vmem:[#allocation83_spill] sm:$0xff] }
 0x4e7   :  { %v4288_v63 = vmul.f32 %v8102_v19, %v4259_v20  ;;  %v4181_v0 = vmax.f32 %v7881_v51, %v4131_v52 }
 0x4e8   :  { %v3789_v12 = vpop.f32.mrf.mxu2  ;;  %v3890_v10 = vpop.f32.mrf.mxu3 }
 0x4e9   :  { %v4317_v59 = vadd.f32 %v8110_v8, %v4288_v63  ;;  %v4206_v6 = vmax.f32 %v9146_v28, %v4181_v0  ;;  %v3790_v53 = vadd.f32 %v3789_v12, %v3697_v13  ;;  %v3700_v29 = vpop.f32.mrf.mxu1  ;;  %v4076_v21 = vpop.f32.mrf.mxu0 }
 0x4eb   :  { %4343 = vst.msk [vmem:[%s8459_s15 + $0x30] sm:$0xff] %vm4336_vm2, %v4317_v59  ;;  %v4235_v36 = vadd.f32 %v8089_v37, %v4206_v6  ;;  %v3940_v49 = vadd.f32 %v3881_v40, %v3790_v53  ;;  %v9153_v6 = vld [vmem:[#allocation9_spill] sm:$0xff]  ;;  %v9154_v53 = vld [vmem:[#allocation30_spill] sm:$0xff] }
 0x4ed   :  { %v4260_v51 = vmax.f32 %v4235_v36, 0.0  ;;  %v4132_v17 = vadd.f32 %v4073_v3, %v3940_v49 }
 0x4ef   :  { %v4289_v7 = vmul.f32 %v8102_v19, %v4260_v51  ;;  %v4182_v45 = vmax.f32 %v7892_v18, %v4132_v17 }
 0x4f0   :  { %v3792_v26 = vpop.f32.mrf.mxu2  ;;  %v3893_v27 = vpop.f32.mrf.mxu3 }
 0x4f1   :  { %v4318_v34 = vadd.f32 %v8110_v8, %v4289_v7  ;;  %v4207_v30 = vmax.f32 %v9149_v32, %v4182_v45  ;;  %v3793_v47 = vadd.f32 %v3792_v26, %v3700_v29  ;;  %v3703_v38 = vpop.f32.mrf.mxu1  ;;  %v4079_v42 = vpop.f32.mrf.mxu0  ;;  %v9155_v29 = vmax.f32 %v9153_v6, %v9154_v53  ;;  %v9156_v32 = vld [vmem:[#allocation79_spill] sm:$0xff]  ;;  %v9163_v6 = vld [vmem:[#allocation73_spill] sm:$0xff] }
 0x4f3   :  { %4344 = vst.msk [vmem:[%s8459_s15 + $0x38] sm:$0xff] %vm4336_vm2, %v4318_v34  ;;  %v4236_v40 = vadd.f32 %v8089_v37, %v4207_v30  ;;  %v3941_v11 = vadd.f32 %v3884_v62, %v3793_v47  ;;  %v9157_v30 = vld [vmem:[#allocation81_spill] sm:$0xff] }
 0x4f4   :  { %v9158_v47 = vmax.f32 %v9156_v32, %v9157_v30 }
 0x4f5   :  { %v4261_v18 = vmax.f32 %v4236_v40, 0.0  ;;  %v4133_v1 = vadd.f32 %v4076_v21, %v3941_v11 }
 0x4f7   :  { %v4290_v61 = vmul.f32 %v8102_v19, %v4261_v18  ;;  %v4183_v13 = vmax.f32 %v7903_v50, %v4133_v1 }
 0x4f8   :  { %v3795_v3 = vpop.f32.mrf.mxu2  ;;  %v3896_v0 = vpop.f32.mrf.mxu3 }
 0x4f9   :  { %v4319_v31 = vadd.f32 %v8110_v8, %v4290_v61  ;;  %v4208_v54 = vmax.f32 %v9152_v35, %v4183_v13  ;;  %v3796_v20 = vadd.f32 %v3795_v3, %v3703_v38  ;;  %v3706_v52 = vpop.f32.mrf.mxu1  ;;  %v4082_v57 = vpop.f32.mrf.mxu0  ;;  %v9160_v35 = vld [vmem:[#allocation63_spill] sm:$0xff] }
 0x4fb   :  { %4345 = vst.msk [vmem:[%s8459_s15 + $0x40] sm:$0xff] %vm4336_vm2, %v4319_v31  ;;  %v4237_v62 = vadd.f32 %v8089_v37, %v4208_v54  ;;  %v3942_v63 = vadd.f32 %v3887_v14, %v3796_v20  ;;  %v9161_v54 = vmax.f32 %v9159_v15, %v9160_v35 }
 0x4fd   :  { %v4262_v50 = vmax.f32 %v4237_v62, 0.0  ;;  %v4134_v12 = vadd.f32 %v4079_v42, %v3942_v63 }
 0x4ff   :  { %v4291_v59 = vmul.f32 %v8102_v19, %v4262_v50  ;;  %v4184_v5 = vmax.f32 %v7914_v41, %v4134_v12 }
 0x500   :  { %v3798_v25 = vpop.f32.mrf.mxu2  ;;  %v3899_v45 = vpop.f32.mrf.mxu3 }
 0x501   :  { %v4320_v28 = vadd.f32 %v8110_v8, %v4291_v59  ;;  %v4209_v21 = vmax.f32 %v9155_v29, %v4184_v5  ;;  %v3799_v36 = vadd.f32 %v3798_v25, %v3706_v52  ;;  %v3709_v49 = vpop.f32.mrf.mxu1  ;;  %v4085_v51 = vpop.f32.mrf.mxu0 }
 0x503   :  { %4346 = vst.msk [vmem:[%s8459_s15 + $0x48] sm:$0xff] %vm4336_vm2, %v4320_v28  ;;  %v4238_v14 = vadd.f32 %v8089_v37, %v4209_v21  ;;  %v3943_v17 = vadd.f32 %v3890_v10, %v3799_v36  ;;  %v9162_v28 = vld [vmem:[#allocation87_spill] sm:$0xff] }
 0x504   :  { %v9164_v53 = vmax.f32 %v9162_v28, %v9163_v6 }
 0x505   :  { %v4263_v7 = vmax.f32 %v4238_v14, 0.0  ;;  %v4135_v41 = vadd.f32 %v4082_v57, %v3943_v17 }
 0x507   :  { %v4292_v26 = vmul.f32 %v8102_v19, %v4263_v7  ;;  %v4185_v34 = vmax.f32 %v7925_v48, %v4135_v41 }
 0x508   :  { %v3801_v22 = vpop.f32.mrf.mxu2  ;;  %v3902_v3 = vpop.f32.mrf.mxu3 }
 0x509   :  { %v4321_v4 = vadd.f32 %v8110_v8, %v4292_v26  ;;  %v4210_v38 = vmax.f32 %v9158_v47, %v4185_v34  ;;  %v3802_v42 = vadd.f32 %v3801_v22, %v3709_v49  ;;  %v3712_v40 = vpop.f32.mrf.mxu1  ;;  %v4088_v11 = vpop.f32.mrf.mxu0  ;;  %v9165_v22 = vld [vmem:[#allocation91_spill] sm:$0xff] }
 0x50b   :  { %4347 = vst.msk [vmem:[%s8459_s15 + $0x50] sm:$0xff] %vm4336_vm2, %v4321_v4  ;;  %v4239_v10 = vadd.f32 %v8089_v37, %v4210_v38  ;;  %v3944_v18 = vadd.f32 %v3893_v27, %v3802_v42  ;;  %v9166_v4 = vld [vmem:[#allocation13_spill] sm:$0xff] }
 0x50c   :  { %v9167_v32 = vmax.f32 %v9165_v22, %v9166_v4 }
 0x50d   :  { %v4264_v1 = vmax.f32 %v4239_v10, 0.0  ;;  %v4136_v48 = vadd.f32 %v4085_v51, %v3944_v18 }
 0x50f   :  { %v4293_v61 = vmul.f32 %v8102_v19, %v4264_v1  ;;  %v4186_v13 = vmax.f32 %v7936_v39, %v4136_v48 }
 0x510   :  { %v3804_v31 = vpop.f32.mrf.mxu2  ;;  %v3905_v51 = vpop.f32.mrf.mxu3 }
 0x511   :  { %v4322_v46 = vadd.f32 %v8110_v8, %v4293_v61  ;;  %v4211_v20 = vmax.f32 %v9161_v54, %v4186_v13  ;;  %v3805_v52 = vadd.f32 %v3804_v31, %v3712_v40  ;;  %v3715_v57 = vpop.f32.mrf.mxu1  ;;  %v4091_v62 = vpop.f32.mrf.mxu0  ;;  %v9168_v13 = vld [vmem:[#allocation95_spill] sm:$0xff]  ;;  %v9169_v31 = vld [vmem:[#allocation85_spill] sm:$0xff] }
 0x513   :  { %4348 = vst.msk [vmem:[%s8459_s15 + $0x58] sm:$0xff] %vm4336_vm2, %v4322_v46  ;;  %v4240_v27 = vadd.f32 %v8089_v37, %v4211_v20  ;;  %v3945_v63 = vadd.f32 %v3896_v0, %v3805_v52  ;;  %v9170_v46 = vmax.f32 %v9168_v13, %v9169_v31 }
 0x515   :  { %v4265_v39 = vmax.f32 %v4240_v27, 0.0  ;;  %v4137_v50 = vadd.f32 %v4088_v11, %v3945_v63 }
 0x517   :  { %v4294_v12 = vmul.f32 %v8102_v19, %v4265_v39  ;;  %v4187_v59 = vmax.f32 %v7947_v56, %v4137_v50 }
 0x518   :  { %v3807_v5 = vpop.f32.mrf.mxu2  ;;  %v3908_v11 = vpop.f32.mrf.mxu3 }
 0x519   :  { %v4323_v25 = vadd.f32 %v8110_v8, %v4294_v12  ;;  %v4212_v29 = vmax.f32 %v9164_v53, %v4187_v59  ;;  %v3808_v21 = vadd.f32 %v3807_v5, %v3715_v57  ;;  %v3718_v36 = vpop.f32.mrf.mxu1  ;;  %v4094_v49 = vpop.f32.mrf.mxu0  ;;  %v9171_v12 = vld [vmem:[#allocation99_spill] sm:$0xff]  ;;  %v9172_v59 = vld [vmem:[#allocation66_spill] sm:$0xff] }
 0x51a   :  { %v9173_v5 = vmax.f32 %v9171_v12, %v9172_v59 }
 0x51b   :  { %4349 = vst.msk [vmem:[%s8459_s15 + $0x60] sm:$0xff] %vm4336_vm2, %v4323_v25  ;;  %v4241_v0 = vadd.f32 %v8089_v37, %v4212_v29  ;;  %v3946_v14 = vadd.f32 %v3899_v45, %v3808_v21 }
 0x51d   :  { %v4266_v56 = vmax.f32 %v4241_v0, 0.0  ;;  %v4138_v17 = vadd.f32 %v4091_v62, %v3946_v14 }
 0x51f   :  { %v4295_v7 = vmul.f32 %v8102_v19, %v4266_v56  ;;  %v4188_v41 = vmax.f32 %v7958_v9, %v4138_v17  ;;  %v9174_v17 = vld [vmem:[#allocation22_spill] sm:$0xff] }
 0x520   :  { %v3810_v26 = vpop.f32.mrf.mxu2  ;;  %v3911_v62 = vpop.f32.mrf.mxu3 }
 0x521   :  { %v4324_v34 = vadd.f32 %v8110_v8, %v4295_v7  ;;  %v4213_v30 = vmax.f32 %v9167_v32, %v4188_v41  ;;  %v3811_v47 = vadd.f32 %v3810_v26, %v3718_v36  ;;  %v3721_v38 = vpop.f32.mrf.mxu1  ;;  %v4097_v42 = vpop.f32.mrf.mxu0  ;;  %v9175_v7 = vld [vmem:[#allocation77_spill] sm:$0xff] }
 0x522   :  { %v9176_v41 = vmax.f32 %v9174_v17, %v9175_v7 }
 0x523   :  { %4350 = vst.msk [vmem:[%s8459_s15 + $0x68] sm:$0xff] %vm4336_vm2, %v4324_v34  ;;  %v4242_v45 = vadd.f32 %v8089_v37, %v4213_v30  ;;  %v3947_v40 = vadd.f32 %v3902_v3, %v3811_v47 }
 0x525   :  { %v4267_v9 = vmax.f32 %v4242_v45, 0.0  ;;  %v4139_v10 = vadd.f32 %v4094_v49, %v3947_v40 }
 0x527   :  { %v4296_v18 = vmul.f32 %v8102_v19, %v4267_v9  ;;  %v4189_v1 = vmax.f32 %v7969_v24, %v4139_v10  ;;  %v9178_v9 = vld [vmem:[#allocation2_spill] sm:$0xff] }
 0x528   :  { %v3813_v48 = vpop.f32.mrf.mxu2  ;;  %v3914_v0 = vpop.f32.mrf.mxu3 }
 0x529   :  { %v4325_v61 = vadd.f32 %v8110_v8, %v4296_v18  ;;  %v4214_v15 = vmax.f32 %v9170_v46, %v4189_v1  ;;  %v3814_v35 = vadd.f32 %v3813_v48, %v3721_v38  ;;  %v3724_v54 = vpop.f32.mrf.mxu1  ;;  %v4100_v20 = vpop.f32.mrf.mxu0 }
 0x52b   :  { %4351 = vst.msk [vmem:[%s8459_s15 + $0x70] sm:$0xff] %vm4336_vm2, %v4325_v61  ;;  %v4243_v3 = vadd.f32 %v8089_v37, %v4214_v15  ;;  %v3948_v52 = vadd.f32 %v3905_v51, %v3814_v35 }
 0x52d   :  { %v4268_v57 = vmax.f32 %v4243_v3, 0.0  ;;  %v4140_v24 = vadd.f32 %v4097_v42, %v3948_v52  ;;  %v9180_v52 = vld [vmem:[#allocation26_spill] sm:$0xff] }
 0x52f   :  { %v4297_v27 = vmul.f32 %v8102_v19, %v4268_v57  ;;  %v4190_v63 = vmax.f32 %v7980_v60, %v4140_v24  ;;  %v9181_v57 = vld [vmem:[#allocation89_spill] sm:$0xff] }
 0x530   :  { %v3816_v39 = vpop.f32.mrf.mxu2  ;;  %v3917_v61 = vpop.f32.mrf.mxu3  ;;  %v9182_v24 = vmax.f32 %v9180_v52, %v9181_v57 }
 0x531   :  { %v4326_v50 = vadd.f32 %v8110_v8, %v4297_v27  ;;  %v4215_v25 = vmax.f32 %v9173_v5, %v4190_v63  ;;  %v3817_v28 = vadd.f32 %v3816_v39, %v3724_v54  ;;  %v3727_v6 = vpop.f32.mrf.mxu1  ;;  %v4103_v53 = vpop.f32.mrf.mxu0 }
 0x533   :  { %4352 = vst.msk [vmem:[%s8459_s15 + $0x78] sm:$0xff] %vm4336_vm2, %v4326_v50  ;;  %v4244_v29 = vadd.f32 %v8089_v37, %v4215_v25  ;;  %v3949_v21 = vadd.f32 %v3908_v11, %v3817_v28  ;;  %v9177_v11 = vld [vmem:[#allocation24_spill] sm:$0xff] }
 0x534   :  { %v9179_v10 = vmax.f32 %v9177_v11, %v9178_v9 }
 0x535   :  { %v4269_v36 = vmax.f32 %v4244_v29, 0.0  ;;  %v4141_v60 = vadd.f32 %v4100_v20, %v3949_v21  ;;  %v9183_v29 = vld [vmem:[#allocation174_spill] sm:$0xff]  ;;  %v9184_v21 = vld [vmem:[#allocation68_spill] sm:$0xff] }
 0x537   :  { %v4298_v49 = vmul.f32 %v8102_v19, %v4269_v36  ;;  %v4191_v51 = vmax.f32 %v7991_v55, %v4141_v60  ;;  %v9185_v36 = vmax.f32 %v9183_v29, %v9184_v21  ;;  %v9195_v29 = vld [vmem:[#allocation45_spill] sm:$0xff]  ;;  %v9196_v21 = vld [vmem:[#allocation104_spill] sm:$0xff] }
 0x538   :  { %v3819_v14 = vpop.f32.mrf.mxu2  ;;  %v3920_v12 = vpop.f32.mrf.mxu3 }
 0x539   :  { %v4327_v56 = vadd.f32 %v8110_v8, %v4298_v49  ;;  %v4216_v26 = vmax.f32 %v9176_v41, %v4191_v51  ;;  %v3820_v34 = vadd.f32 %v3819_v14, %v3727_v6  ;;  %v3730_v22 = vpop.f32.mrf.mxu1  ;;  %v4106_v4 = vpop.f32.mrf.mxu0 }
 0x53b   :  { %4353 = vst.msk [vmem:[%s8459_s15 + $0x80] sm:$0xff] %vm4336_vm2, %v4327_v56  ;;  %v4245_v32 = vadd.f32 %v8089_v37, %v4216_v26  ;;  %v3950_v30 = vadd.f32 %v3911_v62, %v3820_v34 }
 0x53d   :  { %v4270_v55 = vmax.f32 %v4245_v32, 0.0  ;;  %v4142_v47 = vadd.f32 %v4103_v53, %v3950_v30  ;;  %v9187_v32 = vld [vmem:[#allocation70_spill] sm:$0xff] }
 0x53f   :  { %v4299_v38 = vmul.f32 %v8102_v19, %v4270_v55  ;;  %v4192_v42 = vmax.f32 %v8002_v23, %v4142_v47 }
 0x540   :  { %v3822_v45 = vpop.f32.mrf.mxu2 }
 0x541   :  { %v4328_v40 = vadd.f32 %v8110_v8, %v4299_v38  ;;  %v4217_v18 = vmax.f32 %v9179_v10, %v4192_v42  ;;  %v3823_v1 = vadd.f32 %v3822_v45, %v3730_v22  ;;  %v3733_v48 = vpop.f32.mrf.mxu1  ;;  %v4109_v46 = vpop.f32.mrf.mxu0 }
 0x543   :  { %4354 = vst.msk [vmem:[%s8459_s15 + $0x88] sm:$0xff] %vm4336_vm2, %v4328_v40  ;;  %v4246_v13 = vadd.f32 %v8089_v37, %v4217_v18  ;;  %v3951_v31 = vadd.f32 %v3914_v0, %v3823_v1 }
 0x545   :  { %v4271_v23 = vmax.f32 %v4246_v13, 0.0  ;;  %v4143_v15 = vadd.f32 %v4106_v4, %v3951_v31  ;;  %v9186_v4 = vld [vmem:[#allocation175_spill] sm:$0xff] }
 0x546   :  { %v9188_v30 = vmax.f32 %v9186_v4, %v9187_v32 }
 0x547   :  { %v4300_v35 = vmul.f32 %v8102_v19, %v4271_v23  ;;  %v4193_v54 = vmax.f32 %v8013_v43, %v4143_v15 }
 0x548   :  { %v3825_v20 = vpop.f32.mrf.mxu2 }
 0x549   :  { %v4329_v3 = vadd.f32 %v8110_v8, %v4300_v35  ;;  %v4218_v62 = vmax.f32 %v9182_v24, %v4193_v54  ;;  %v3826_v27 = vadd.f32 %v3825_v20, %v3733_v48  ;;  %v3736_v63 = vpop.f32.mrf.mxu1  ;;  %v4112_v5 = vpop.f32.mrf.mxu0  ;;  %v9189_v48 = vld [vmem:[#allocation176_spill] sm:$0xff] }
 0x54b   :  { %4355 = vst.msk [vmem:[%s8459_s15 + $0x90] sm:$0xff] %vm4336_vm2, %v4329_v3  ;;  %v4247_v39 = vadd.f32 %v8089_v37, %v4218_v62  ;;  %v3952_v50 = vadd.f32 %v3917_v61, %v3826_v27  ;;  %v9190_v61 = vld [vmem:[#allocation93_spill] sm:$0xff]  ;;  %v9193_v27 = vld [vmem:[#allocation116_spill] sm:$0xff] }
 0x54c   :  { %v9191_v13 = vmax.f32 %v9189_v48, %v9190_v61  ;;  %v9192_v62 = vld [vmem:[#allocation141_spill] sm:$0xff] }
 0x54d   :  { %v4272_v59 = vmax.f32 %v4247_v39, 0.0  ;;  %v4144_v43 = vadd.f32 %v4109_v46, %v3952_v50 }
 0x54f   :  { %v4301_v25 = vmul.f32 %v8102_v19, %v4272_v59  ;;  %v4194_v28 = vmax.f32 %v8024_v44, %v4144_v43  ;;  %v3923_v44 = vpop.f32.mrf.mxu3 }
 0x550   :  { %v3828_v6 = vpop.f32.mrf.mxu2 }
 0x551   :  { %v4330_v53 = vadd.f32 %v8110_v8, %v4301_v25  ;;  %v4219_v60 = vmax.f32 %v9185_v36, %v4194_v28  ;;  %v3829_v49 = vadd.f32 %v3828_v6, %v3736_v63  ;;  %v3739_v14 = vpop.f32.mrf.mxu1  ;;  %v4115_v26 = vpop.f32.mrf.mxu0  ;;  %v9194_v63 = vmax.f32 %v9192_v62, %v9193_v27 }
 0x552   :  { %v9197_v36 = vmax.f32 %v9195_v29, %v9196_v21 }
 0x553   :  { %4356 = vst.msk [vmem:[%s8459_s15 + $0x98] sm:$0xff] %vm4336_vm2, %v4330_v53  ;;  %v4248_v51 = vadd.f32 %v8089_v37, %v4219_v60  ;;  %v3953_v0 = vadd.f32 %v3920_v12, %v3829_v49 }
 0x555   :  { %v4273_v56 = vmax.f32 %v4248_v51, 0.0  ;;  %v4145_v17 = vadd.f32 %v4112_v5, %v3953_v0 }
 0x557   :  { %v4302_v7 = vmul.f32 %v8102_v19, %v4273_v56  ;;  %v4195_v41 = vmax.f32 %v8035_v16, %v4145_v17  ;;  %v3926_v10 = vpop.f32.mrf.mxu3 }
 0x558   :  { %v3831_v34 = vpop.f32.mrf.mxu2 }
 0x559   :  { %v4331_v22 = vadd.f32 %v8110_v8, %v4302_v7  ;;  %v4220_v55 = vmax.f32 %v9188_v30, %v4195_v41  ;;  %v3832_v47 = vadd.f32 %v3831_v34, %v3739_v14  ;;  %v3742_v16 = vpop.f32.mrf.mxu1  ;;  %v4118_v23 = vpop.f32.mrf.mxu0 }
 0x55b   :  { %4357 = vst.msk [vmem:[%s8459_s15 + $0xa0] sm:$0xff] %vm4336_vm2, %v4331_v22  ;;  %v4249_v38 = vadd.f32 %v8089_v37, %v4220_v55  ;;  %v3954_v42 = vadd.f32 %v3923_v44, %v3832_v47 }
 0x55d   :  { %v4274_v45 = vmax.f32 %v4249_v38, 0.0  ;;  %v4146_v40 = vadd.f32 %v4115_v26, %v3954_v42 }
 0x55f   :  { %v4303_v11 = vmul.f32 %v8102_v19, %v4274_v45  ;;  %v4196_v9 = vmax.f32 %v8046_v33, %v4146_v40  ;;  %v3929_v12 = vpop.f32.mrf.mxu3 }
 0x560   :  { %v3834_v18 = vpop.f32.mrf.mxu2 }
 0x561   :  { %v4332_v1 = vadd.f32 %v8110_v8, %v4303_v11  ;;  %v4221_v31 = vmax.f32 %v9191_v13, %v4196_v9  ;;  %v3835_v46 = vadd.f32 %v3834_v18, %v3742_v16  ;;  %v3745_v52 = vpop.f32.mrf.mxu1  ;;  %v4121_v5 = vpop.f32.mrf.mxu0 }
 0x563   :  { %4358 = vst.msk [vmem:[%s8459_s15 + $0xa8] sm:$0xff] %vm4336_vm2, %v4332_v1  ;;  %v4250_v15 = vadd.f32 %v8089_v37, %v4221_v31  ;;  %v3955_v35 = vadd.f32 %v3926_v10, %v3835_v46 }
 0x565   :  { %v4275_v54 = vmax.f32 %v4250_v15, 0.0  ;;  %v4147_v33 = vadd.f32 %v4118_v23, %v3955_v35 }
 0x567   :  { %v4304_v20 = vmul.f32 %v8102_v19, %v4275_v54  ;;  %v4197_v3 = vmax.f32 %v8057_v2, %v4147_v33 }
 0x568   :  { %v3837_v57 = vpop.f32.mrf.mxu2 }
 0x569   :  { %v4333_v24 = vadd.f32 %v8110_v8, %v4304_v20  ;;  %v4222_v39 = vmax.f32 %v9194_v63, %v4197_v3  ;;  %v3838_v50 = vadd.f32 %v3837_v57, %v3745_v52 }
 0x56b   :  { %4359 = vst.msk [vmem:[%s8459_s15 + $0xb0] sm:$0xff] %vm4336_vm2, %v4333_v24  ;;  %v4251_v59 = vadd.f32 %v8089_v37, %v4222_v39  ;;  %v3956_v43 = vadd.f32 %v3929_v12, %v3838_v50 }
 0x56d   :  { %v4276_v2 = vmax.f32 %v4251_v59, 0.0  ;;  %v4148_v25 = vadd.f32 %v4121_v5, %v3956_v43 }
 0x56f   :  { %v4305_v28 = vmul.f32 %v8102_v19, %v4276_v2  ;;  %v4198_v6 = vmax.f32 %v8068_v58, %v4148_v25 }
 0x571   :  { %v4334_v53 = vadd.f32 %v8110_v8, %v4305_v28  ;;  %v4223_v60 = vmax.f32 %v9197_v36, %v4198_v6 }
 0x573   :  { %4360 = vst.msk [vmem:[%s8459_s15 + $0xb8] sm:$0xff] %vm4336_vm2, %v4334_v53  ;;  %v4252_v49 = vadd.f32 %v8089_v37, %v4223_v60 }
 0x575   :  { %v4277_v51 = vmax.f32 %v4252_v49, 0.0 }
 0x577   :  { %v4306_v0 = vmul.f32 %v8102_v19, %v4277_v51 }
 0x579   :  { %v4335_v14 = vadd.f32 %v8110_v8, %v4306_v0 }
 0x57b   :  { %4362 = vst.msk [vmem:[%s8459_s15 + $0xc0] sm:$0xf] %vm4361_vm3, %v4335_v14 }

// kernel: siamese_share_forward.5
= control target key start
LH: loop header
LB: loop body
LE: loop exit
PB: predicated region body
PF: predicated region fallthrough
CT: control target
= control target key end

     0   :  { %s1234_s0 = inlined_call_operand.vmem [shape: f32[4,256], index: 0, kind: input, shape index: {}]   ;;  %s1235_s1 = inlined_call_operand.vmem [shape: f32[256,170], index: 1, kind: input, shape index: {}]   ;;  %s1236_s2 = inlined_call_operand.vmem [shape: f32[1,170], index: 2, kind: input, shape index: {}]   ;;  %s1237_s3 = inlined_call_operand.vmem [shape: f32[1,170], index: 3, kind: input, shape index: {}]   ;;  %s1238_s4 = inlined_call_operand.vmem [shape: f32[1,170], index: 4, kind: input, shape index: {}]   ;;  %s1239_s5 = inlined_call_operand.vmem [shape: f32[170,90], index: 5, kind: input, shape index: {}]   ;;  %s1240_s6 = inlined_call_operand.vmem [shape: f32[1,90], index: 6, kind: input, shape index: {}]   ;;  %s1241_s7 = inlined_call_operand.vmem [shape: f32[1,90], index: 7, kind: input, shape index: {}]   ;;  %s1242_s8 = inlined_call_operand.vmem [shape: f32[1,90], index: 8, kind: input, shape index: {}]   ;;  %s1243_s9 = inlined_call_operand.vmem [shape: f32[90,10], index: 9, kind: input, shape index: {}]   ;;  %s1244_s10 = inlined_call_operand.vmem [shape: f32[1,10], index: 10, kind: input, shape index: {}]   ;;  %s1245_s11 = inlined_call_operand.vmem [shape: f32[10,25], index: 11, kind: input, shape index: {}]   ;;  %s1246_s12 = inlined_call_operand.vmem [shape: f32[10,25], index: 12, kind: input, shape index: {}]   ;;  %s1247_s13 = inlined_call_operand.vmem [shape: f32[1,25], index: 13, kind: input, shape index: {}]   ;;  %s1248_s14 = inlined_call_operand.vmem [shape: f32[1,25], index: 14, kind: input, shape index: {}]   ;;  %s1249_s15 = inlined_call_operand.vmem [shape: f32[1,25], index: 15, kind: input, shape index: {}]   ;;  %s1250_s16 = inlined_call_operand.vmem [shape: f32[25,10], index: 16, kind: input, shape index: {}]   ;;  %s1251_s17 = inlined_call_operand.vmem [shape: f32[1,10], index: 17, kind: input, shape index: {}]   ;;  %s1252_s18 = inlined_call_operand.vmem [shape: f32[1,10], index: 18, kind: input, shape index: {}]   ;;  %s1253_s19 = inlined_call_operand.vmem [shape: f32[1,10], index: 19, kind: input, shape index: {}]   ;;  %s1254_s20 = inlined_call_operand.vmem [shape: f32[10,2], index: 20, kind: input, shape index: {}]   ;;  %s1255_s21 = inlined_call_operand.vmem [shape: f32[1,2], index: 21, kind: input, shape index: {}]   ;;  %s1256_s22 = inlined_call_operand.hbm [shape: f32[2,2], index: 22, kind: output, shape index: {0}]   ;;  %s1257_s23 = inlined_call_operand.hbm [shape: f32[2,10], index: 23, kind: output, shape index: {1}]   ;;  %s1258_s24 = inlined_call_operand.hbm [shape: f32[2,10], index: 24, kind: output, shape index: {2}]  }
   0x1   :  { %1261 = sst [smem:[#allocation9_spill]] %s1234_s0 }
   0x2   :  { %1262 = sst [smem:[#allocation10_spill]] %s1235_s1 }
   0x3   :  { %1263 = sst [smem:[#allocation11_spill]] %s1236_s2 }
   0x4   :  { %1264 = sst [smem:[#allocation12_spill]] %s1237_s3 }
   0x5   :  { %1265 = sst [smem:[#allocation13_spill]] %s1238_s4 }
   0x6   :  { %1266 = sst [smem:[#allocation14_spill]] %s1239_s5 }
   0x7   :  { %1267 = sst [smem:[#allocation15_spill]] %s1240_s6 }
   0x8   :  { %1268 = sst [smem:[#allocation16_spill]] %s1241_s7 }
   0x9   :  { %1269 = sst [smem:[#allocation17_spill]] %s1242_s8 }
   0xa   :  { %30 = vsyncpa [#allocation3], 0  ;;  %s1270_s27 = sld [smem:[#allocation10_spill]] }
   0xb   :  { %s1271_s2 = sld [smem:[#allocation9_spill]] }
  0x10   :  { %v108_v0 = vld [vmem:[%s1270_s27 + $0xf8] sm:$0xff]  ;;  %v106_v1 = vld [vmem:[%s1270_s27 + $0xe8] sm:$0xff]  ;;  %v107_v3 = vld [vmem:[%s1270_s27 + $0xf0] sm:$0xff] }
  0x11   :  { %v140_v2 = vld [vmem:[%s1270_s27 + $0x1f8] sm:$0xff]  ;;  %193 = vmatpush.msra.mxu2 %v108_v0  ;;  %v138_v4 = vld [vmem:[%s1270_s27 + $0x1e8] sm:$0xff]  ;;  %153 = vmatpush.msra.mxu0 %v107_v3  ;;  %v105_v6 = vld [vmem:[%s1270_s27 + $0xe0] sm:$0xff] }
  0x12   :  { %213 = vmatpush.msra.mxu3 %v140_v2  ;;  %v104_v5 = vld [vmem:[%s1270_s27 + $0xd8] sm:$0xff]  ;;  %v139_v7 = vld [vmem:[%s1270_s27 + $0x1f0] sm:$0xff]  ;;  %v137_v10 = vld [vmem:[%s1270_s27 + $0x1e0] sm:$0xff] }
  0x13   :  { %194 = vmatpush.msra.mxu2 %v106_v1  ;;  %v136_v8 = vld [vmem:[%s1270_s27 + $0x1d8] sm:$0xff]  ;;  %v103_v9 = vld [vmem:[%s1270_s27 + $0xd0] sm:$0xff]  ;;  %154 = vmatpush.msra.mxu0 %v105_v6  ;;  %v102_v11 = vld [vmem:[%s1270_s27 + $0xc8] sm:$0xff] }
  0x14   :  { %214 = vmatpush.msra.mxu3 %v138_v4  ;;  %173 = vmatpush.msra.mxu1 %v139_v7  ;;  %v134_v12 = vld [vmem:[%s1270_s27 + $0x1c8] sm:$0xff]  ;;  %v101_v13 = vld [vmem:[%s1270_s27 + $0xc0] sm:$0xff]  ;;  %v135_v14 = vld [vmem:[%s1270_s27 + $0x1d0] sm:$0xff] }
  0x15   :  { %195 = vmatpush.msra.mxu2 %v104_v5  ;;  %155 = vmatpush.msra.mxu0 %v103_v9  ;;  %v100_v15 = vld [vmem:[%s1270_s27 + $0xb8] sm:$0xff]  ;;  %v99_v17 = vld [vmem:[%s1270_s27 + $0xb0] sm:$0xff]  ;;  %v133_v18 = vld [vmem:[%s1270_s27 + $0x1c0] sm:$0xff] }
  0x16   :  { %215 = vmatpush.msra.mxu3 %v136_v8  ;;  %174 = vmatpush.msra.mxu1 %v137_v10  ;;  %v132_v16 = vld [vmem:[%s1270_s27 + $0x1b8] sm:$0xff]  ;;  %v98_v19 = vld [vmem:[%s1270_s27 + $0xa8] sm:$0xff]  ;;  %v97_v21 = vld [vmem:[%s1270_s27 + $0xa0] sm:$0xff] }
  0x17   :  { %196 = vmatpush.msra.mxu2 %v102_v11  ;;  %156 = vmatpush.msra.mxu0 %v101_v13  ;;  %v130_v20 = vld [vmem:[%s1270_s27 + $0x1a8] sm:$0xff]  ;;  %v131_v22 = vld [vmem:[%s1270_s27 + $0x1b0] sm:$0xff]  ;;  %v96_v23 = vld [vmem:[%s1270_s27 + $0x98] sm:$0xff] }
  0x18   :  { %216 = vmatpush.msra.mxu3 %v134_v12  ;;  %175 = vmatpush.msra.mxu1 %v135_v14  ;;  %v128_v24 = vld [vmem:[%s1270_s27 + $0x198] sm:$0xff]  ;;  %v95_v25 = vld [vmem:[%s1270_s27 + $0x90] sm:$0xff]  ;;  %v129_v26 = vld [vmem:[%s1270_s27 + $0x1a0] sm:$0xff] }
  0x19   :  { %197 = vmatpush.msra.mxu2 %v100_v15  ;;  %157 = vmatpush.msra.mxu0 %v99_v17  ;;  %v94_v27 = vld [vmem:[%s1270_s27 + $0x88] sm:$0xff]  ;;  %v93_v29 = vld [vmem:[%s1270_s27 + $0x80] sm:$0xff]  ;;  %v127_v30 = vld [vmem:[%s1270_s27 + $0x190] sm:$0xff] }
  0x1a   :  { %217 = vmatpush.msra.mxu3 %v132_v16  ;;  %176 = vmatpush.msra.mxu1 %v133_v18  ;;  %v126_v28 = vld [vmem:[%s1270_s27 + $0x188] sm:$0xff]  ;;  %v92_v31 = vld [vmem:[%s1270_s27 + $0x78] sm:$0xff]  ;;  %v91_v33 = vld [vmem:[%s1270_s27 + $0x70] sm:$0xff] }
  0x1b   :  { %198 = vmatpush.msra.mxu2 %v98_v19  ;;  %158 = vmatpush.msra.mxu0 %v97_v21  ;;  %v124_v32 = vld [vmem:[%s1270_s27 + $0x178] sm:$0xff]  ;;  %v125_v34 = vld [vmem:[%s1270_s27 + $0x180] sm:$0xff]  ;;  %v90_v35 = vld [vmem:[%s1270_s27 + $0x68] sm:$0xff] }
  0x1c   :  { %218 = vmatpush.msra.mxu3 %v130_v20  ;;  %177 = vmatpush.msra.mxu1 %v131_v22  ;;  %v122_v36 = vld [vmem:[%s1270_s27 + $0x168] sm:$0xff]  ;;  %v89_v37 = vld [vmem:[%s1270_s27 + $0x60] sm:$0xff]  ;;  %v123_v38 = vld [vmem:[%s1270_s27 + $0x170] sm:$0xff] }
  0x1d   :  { %199 = vmatpush.msra.mxu2 %v96_v23  ;;  %159 = vmatpush.msra.mxu0 %v95_v25  ;;  %v88_v39 = vld [vmem:[%s1270_s27 + $0x58] sm:$0xff]  ;;  %v87_v41 = vld [vmem:[%s1270_s27 + $0x50] sm:$0xff]  ;;  %v121_v42 = vld [vmem:[%s1270_s27 + $0x160] sm:$0xff] }
  0x1e   :  { %219 = vmatpush.msra.mxu3 %v128_v24  ;;  %178 = vmatpush.msra.mxu1 %v129_v26  ;;  %v120_v40 = vld [vmem:[%s1270_s27 + $0x158] sm:$0xff]  ;;  %v76_v43 = vld [vmem:[%s1271_s2] sm:$0xff]  ;;  %v86_v44 = vld [vmem:[%s1270_s27 + $0x48] sm:$0xff] }
  0x1f   :  { %200 = vmatpush.msra.mxu2 %v94_v27  ;;  %160 = vmatpush.msra.mxu0 %v93_v29  ;;  %v118_v45 = vld [vmem:[%s1270_s27 + $0x148] sm:$0xff]  ;;  %148 = vst [vmem:[#allocation1] ss:$2 sm:$0xff] %v76_v43  ;;  %v85_v46 = vld [vmem:[%s1270_s27 + $0x40] sm:$0xff]  ;;  %v119_v47 = vld [vmem:[%s1270_s27 + $0x150] sm:$0xff] }
  0x20   :  { %220 = vmatpush.msra.mxu3 %v126_v28  ;;  %179 = vmatpush.msra.mxu1 %v127_v30  ;;  %v84_v48 = vld [vmem:[%s1270_s27 + $0x38] sm:$0xff]  ;;  %v82_v49 = vld [vmem:[%s1270_s27 + $0x28] sm:$0xff]  ;;  %v83_v51 = vld [vmem:[%s1270_s27 + $0x30] sm:$0xff] }
  0x21   :  { %201 = vmatpush.msra.mxu2 %v92_v31  ;;  %161 = vmatpush.msra.mxu0 %v91_v33  ;;  %v116_v50 = vld [vmem:[%s1270_s27 + $0x138] sm:$0xff]  ;;  %v117_v52 = vld [vmem:[%s1270_s27 + $0x140] sm:$0xff]  ;;  %v114_v53 = vld [vmem:[%s1270_s27 + $0x128] sm:$0xff] }
  0x22   :  { %221 = vmatpush.msra.mxu3 %v124_v32  ;;  %180 = vmatpush.msra.mxu1 %v125_v34  ;;  %v80_v54 = vld [vmem:[%s1270_s27 + $0x18] sm:$0xff]  ;;  %v81_v55 = vld [vmem:[%s1270_s27 + $0x20] sm:$0xff]  ;;  %v115_v56 = vld [vmem:[%s1270_s27 + $0x130] sm:$0xff] }
  0x23   :  { %202 = vmatpush.msra.mxu2 %v90_v35  ;;  %162 = vmatpush.msra.mxu0 %v89_v37  ;;  %v112_v57 = vld [vmem:[%s1270_s27 + $0x118] sm:$0xff]  ;;  %v79_v58 = vld [vmem:[%s1270_s27 + $0x10] sm:$0xff]  ;;  %v113_v59 = vld [vmem:[%s1270_s27 + $0x120] sm:$0xff] }
  0x24   :  { %222 = vmatpush.msra.mxu3 %v122_v36  ;;  %181 = vmatpush.msra.mxu1 %v123_v38  ;;  %v78_v60 = vld [vmem:[%s1270_s27 + $0x8] sm:$0xff]  ;;  %v77_v0 = vld [vmem:[%s1270_s27] sm:$0xff]  ;;  %v111_v1 = vld [vmem:[%s1270_s27 + $0x110] sm:$0xff] }
  0x25   :  { %203 = vmatpush.msra.mxu2 %v88_v39  ;;  %163 = vmatpush.msra.mxu0 %v87_v41  ;;  %v110_v61 = vld [vmem:[%s1270_s27 + $0x108] sm:$0xff] }
  0x26   :  { %223 = vmatpush.msra.mxu3 %v120_v40  ;;  %182 = vmatpush.msra.mxu1 %v121_v42  ;;  %v149_v62 = vld.sshfl [vmem:[#allocation1] sm:$0xff pattern:$0x75316420]  ;;  %v150_v63 = vld.sshfl [vmem:[#allocation1 + $0x8] sm:$0xff pattern:$0x75316420] }
  0x27   :  { %204 = vmatpush.msra.mxu2 %v86_v44  ;;  %164 = vmatpush.msra.mxu0 %v85_v46 }
  0x28   :  { %224 = vmatpush.msra.mxu3 %v118_v45  ;;  %183 = vmatpush.msra.mxu1 %v119_v47 }
  0x29   :  { %205 = vmatpush.msra.mxu2 %v84_v48  ;;  %165 = vmatpush.msra.mxu0 %v83_v51 }
  0x2a   :  { %225 = vmatpush.msra.mxu3 %v116_v50  ;;  %184 = vmatpush.msra.mxu1 %v117_v52 }
  0x2b   :  { %206 = vmatpush.msra.mxu2 %v82_v49  ;;  %166 = vmatpush.msra.mxu0 %v81_v55 }
  0x2c   :  { %226 = vmatpush.msra.mxu3 %v114_v53  ;;  %185 = vmatpush.msra.mxu1 %v115_v56 }
  0x2d   :  { %207 = vmatpush.msra.mxu2 %v80_v54  ;;  %167 = vmatpush.msra.mxu0 %v79_v58 }
  0x2e   :  { %227 = vmatpush.msra.mxu3 %v112_v57  ;;  %186 = vmatpush.msra.mxu1 %v113_v59 }
  0x2f   :  { %31 = vsyncpa [#allocation5], 0  ;;  %208 = vmatpush.msra.mxu2 %v78_v60  ;;  %v109_v2 = vld [vmem:[%s1270_s27 + $0x100] sm:$0xff]  ;;  %s1272_s7 = sld [smem:[#allocation14_spill]]  ;;  %168 = vmatpush.msra.mxu0 %v77_v0  ;;  %vm281_vm0 = vcmask 1041408   ;;  %v346_v26 = vld [vmem:[%s1243_s9 + $0x50] sm:$0xff] }
  0x30   :  { %228 = vmatpush.msra.mxu3 %v110_v61  ;;  %209 = vmatmul.f32.vlgmr.msra.gmra.mxu2 %v149_v62  ;;  %v347_v25 = vld [vmem:[%s1243_s9 + $0x58] sm:$0x3]  ;;  %v345_v27 = vld [vmem:[%s1243_s9 + $0x48] sm:$0xff]  ;;  %v344_v28 = vld [vmem:[%s1243_s9 + $0x40] sm:$0xff]  ;;  %s1273_s0 = sld [smem:[#allocation11_spill]]  ;;  %vm277_vm1 = vcmask 343040  }
  0x31   :  { %229 = vmatmul.f32.vlgmr.msra.gmra.mxu3 %v150_v63  ;;  %187 = vmatpush.msra.mxu1 %v111_v1  ;;  %v343_v29 = vld [vmem:[%s1243_s9 + $0x38] sm:$0xff]  ;;  %v342_v30 = vld [vmem:[%s1243_s9 + $0x30] sm:$0xff]  ;;  %s1274_s25 = sld [smem:[#allocation12_spill]]  ;;  %v341_v54 = vld [vmem:[%s1243_s9 + $0x28] sm:$0xff]  ;;  %vm352_vm2 = vcmask 736256   ;;  %vm379_vm3 = vcmask 76800  }
  0x32   :  { %169 = vmatmul.f32.vlgmr.msra.gmra.mxu0 %v149_v62  ;;  %609 = vmatpush.msk.msrb.mxu2 %vm281_vm0, %v347_v25  ;;  %s1275_s4 = sld [smem:[#allocation13_spill]]  ;;  %v340_v55 = vld [vmem:[%s1243_s9 + $0x20] sm:$0xff]  ;;  %v339_v56 = vld [vmem:[%s1243_s9 + $0x18] sm:$0xff]  ;;  %v338_v57 = vld [vmem:[%s1243_s9 + $0x10] sm:$0xff]  ;;  %vm391_vm4 = vcmask 74752   ;;  %vm393_vm5 = vcmask 76802  }
  0x33   :  { %188 = vmatpush.msra.mxu1 %v109_v2  ;;  %v337_v58 = vld [vmem:[%s1243_s9 + $0x8] sm:$0xff]  ;;  %v336_v59 = vld [vmem:[%s1243_s9] sm:$0xff]  ;;  %s1278_s6 = sld [smem:[#allocation17_spill]]  ;;  %vm401_vm6 = vcmask 80896   ;;  %vm480_vm7 = vcmask 1040384   ;;  %vm476_vm8 = vcmask 203776  }
  0x34   :  { %189 = vmatmul.f32.vlgmr.msra.gmra.mxu1 %v150_v63  ;;  %364 = vmatpush.msrb.mxu2 %v346_v26  ;;  %v469_v25 = vld [vmem:[%s1250_s16 + $0x8] sm:$0xff]  ;;  %v468_v26 = vld [vmem:[%s1250_s16] sm:$0xff]  ;;  %vm547_vm9 = vcmask 9216   ;;  %s718_s26 = smov [#allocation6]   ;;  %s567_s29 = sshll.u32 %s1256_s22, 4  ;;  %s568_s29 = int_to_ptr.hbm [resolvable:$true] %s567_s29 }
  0x35   :  { %v266_v3 = vld [vmem:[%s1272_s7 + $0x78] sm:$0xff]  ;;  %v265_v4 = vld [vmem:[%s1272_s7 + $0x70] sm:$0xff]  ;;  %v264_v5 = vld [vmem:[%s1272_s7 + $0x68] sm:$0xff]  ;;  %s587_s28 = sshll.u32 %s718_s26, 4  ;;  %s588_s28 = int_to_ptr.vmem [resolvable:$true] %s587_s28 }
  0x36   :  { %285 = vmatpush.msrb.mxu0 %v266_v3  ;;  %v263_v6 = vld [vmem:[%s1272_s7 + $0x60] sm:$0xff]  ;;  %v262_v7 = vld [vmem:[%s1272_s7 + $0x58] sm:$0xff]  ;;  %v261_v8 = vld [vmem:[%s1272_s7 + $0x50] sm:$0xff]  ;;  %365 = vmatpush.msrb.mxu2 %v345_v27 }
  0x37   :  { %v260_v9 = vld [vmem:[%s1272_s7 + $0x48] sm:$0xff]  ;;  %v259_v10 = vld [vmem:[%s1272_s7 + $0x40] sm:$0xff]  ;;  %v258_v11 = vld [vmem:[%s1272_s7 + $0x38] sm:$0xff] }
  0x38   :  { %286 = vmatpush.msrb.mxu0 %v265_v4  ;;  %v257_v12 = vld [vmem:[%s1272_s7 + $0x30] sm:$0xff]  ;;  %v256_v13 = vld [vmem:[%s1272_s7 + $0x28] sm:$0xff]  ;;  %v255_v14 = vld [vmem:[%s1272_s7 + $0x20] sm:$0xff]  ;;  %366 = vmatpush.msrb.mxu2 %v344_v28 }
  0x39   :  { %v272_v15 = vld [vmem:[%s1272_s7 + $0xa8] sm:$0x3]  ;;  %v254_v16 = vld [vmem:[%s1272_s7 + $0x18] sm:$0xff]  ;;  %v271_v17 = vld [vmem:[%s1272_s7 + $0xa0] sm:$0xff] }
  0x3a   :  { %287 = vmatpush.msrb.mxu0 %v264_v5  ;;  %607 = vmatpush.msk.msrb.mxu1 %vm281_vm0, %v272_v15  ;;  %v253_v18 = vld [vmem:[%s1272_s7 + $0x10] sm:$0xff]  ;;  %v270_v19 = vld [vmem:[%s1272_s7 + $0x98] sm:$0xff]  ;;  %v252_v20 = vld [vmem:[%s1272_s7 + $0x8] sm:$0xff] }
  0x3b   :  { %v269_v21 = vld [vmem:[%s1272_s7 + $0x90] sm:$0xff]  ;;  %v251_v22 = vld [vmem:[%s1272_s7] sm:$0xff]  ;;  %v268_v23 = vld [vmem:[%s1272_s7 + $0x88] sm:$0xff]  ;;  %367 = vmatpush.msrb.mxu2 %v343_v29 }
  0x3c   :  { %288 = vmatpush.msrb.mxu0 %v263_v6  ;;  %316 = vmatpush.msrb.mxu1 %v271_v17  ;;  %v267_v24 = vld [vmem:[%s1272_s7 + $0x80] sm:$0xff]  ;;  %s1277_s7 = sld [smem:[#allocation16_spill]]  ;;  %v398_v15 = vld [vmem:[%s1246_s12 + $0x8] sm:$0x3] }
  0x3d   :  { %v141_v31 = vld [vmem:[%s1273_s0] sm:$0x3]  ;;  %368 = vmatpush.msrb.mxu2 %v342_v30  ;;  %611 = vmatpush.msk.msrb.mxu3 %vm281_vm0, %v398_v15  ;;  %v396_v17 = vld [vmem:[%s1245_s11 + $0x8] sm:$0x3] }
  0x3e   :  { %289 = vmatpush.msrb.mxu0 %v262_v7  ;;  %317 = vmatpush.msrb.mxu1 %v270_v19  ;;  %v143_v32 = vperm.slane %v141_v31, 0  ;;  %v235_v34 = vld [vmem:[%s1274_s25] sm:$0x3]  ;;  %v144_v36 = vperm.slane %v141_v31, 1 }
  0x3f   :  { %v243_v38 = vld [vmem:[%s1275_s4] sm:$0x3]  ;;  %v237_v40 = vperm.slane %v235_v34, 0  ;;  %v238_v48 = vperm.slane %v235_v34, 1  ;;  %369 = vmatpush.msrb.mxu2 %v341_v54  ;;  %s1276_s4 = sld [smem:[#allocation15_spill]] }
  0x40   :  { %290 = vmatpush.msrb.mxu0 %v261_v8  ;;  %318 = vmatpush.msrb.mxu1 %v269_v21  ;;  %v245_v45 = vperm.slane %v243_v38, 0  ;;  %v246_v50 = vperm.slane %v243_v38, 1  ;;  %v624_v3 = vld [vmem:[%s1278_s6] ss:$0 sm:$0xff] }
  0x41   :  { %370 = vmatpush.msrb.mxu2 %v340_v55  ;;  %v625_v6 = vld [vmem:[%s1244_s10] ss:$0 sm:$0xff] }
  0x42   :  { %291 = vmatpush.msrb.mxu0 %v260_v9  ;;  %319 = vmatpush.msrb.mxu1 %v268_v23  ;;  %v623_v1 = vld [vmem:[%s1277_s7] ss:$0 sm:$0xff]  ;;  %v471_v23 = vld [vmem:[%s1250_s16 + $0x18] sm:$0x1]  ;;  %s589_s7 = sshll.u32 %s1258_s24, 4  ;;  %s590_s7 = int_to_ptr.hbm [resolvable:$true] %s589_s7 }
  0x43   :  { %371 = vmatpush.msrb.mxu2 %v339_v56  ;;  %v626_v28 = vld [vmem:[%s1247_s13] ss:$0 sm:$0xff] }
  0x44   :  { %292 = vmatpush.msrb.mxu0 %v259_v10  ;;  %320 = vmatpush.msrb.mxu1 %v267_v24  ;;  %v470_v24 = vld [vmem:[%s1250_s16 + $0x10] sm:$0xff]  ;;  %v628_v34 = vld [vmem:[%s1249_s15] ss:$0 sm:$0xff] }
  0x45   :  { %372 = vmatpush.msrb.mxu2 %v338_v57  ;;  %v622_v60 = vld [vmem:[%s1276_s4] ss:$0 sm:$0xff] }
  0x46   :  { %293 = vmatpush.msrb.mxu0 %v258_v11  ;;  %615 = vmatpush.msk.msra.mxu1 %vm480_vm7, %v471_v23  ;;  %v515_v38 = vld [vmem:[%s1254_s20] sm:$0xff] }
  0x47   :  { %373 = vmatpush.msrb.mxu2 %v337_v58 }
  0x48   :  { %294 = vmatpush.msrb.mxu0 %v257_v12  ;;  %497 = vmatpush.msra.mxu1 %v470_v24 }
  0x49   :  { %374 = vmatpush.msrb.mxu2 %v336_v59 }
  0x4a   :  { %295 = vmatpush.msrb.mxu0 %v256_v13  ;;  %498 = vmatpush.msra.mxu1 %v469_v25 }
  0x4c   :  { %296 = vmatpush.msrb.mxu0 %v255_v14  ;;  %499 = vmatpush.msra.mxu1 %v468_v26 }
  0x4e   :  { %297 = vmatpush.msrb.mxu0 %v254_v16  ;;  %v397_v16 = vld [vmem:[%s1246_s12] sm:$0xff] }
  0x4f   :  { %422 = vmatpush.msrb.mxu3 %v397_v16 }
  0x50   :  { %298 = vmatpush.msrb.mxu0 %v253_v18  ;;  %v395_v18 = vld [vmem:[%s1245_s11] sm:$0xff]  ;;  %s717_s11 = smov [#allocation4]  }
  0x51   :  { %613 = vmatpush.msk.msra.mxu3 %vm281_vm0, %v396_v17  ;;  %s576_s1 = sshll.u32 %s717_s11, 4  ;;  %s577_s1 = int_to_ptr.vmem [resolvable:$true] %s576_s1 }
  0x52   :  { %299 = vmatpush.msrb.mxu0 %v252_v20 }
  0x53   :  { %447 = vmatpush.msra.mxu3 %v395_v18 }
  0x54   :  { %300 = vmatpush.msrb.mxu0 %v251_v22 }
  0xaf   :  { %v170_v33 = vpop.f32.mrf.mxu0 }
  0xb0   :  { %v171_v35 = vadd.f32 %v170_v33, %v143_v32  ;;  %v627_v32 = vld [vmem:[%s1248_s14] ss:$0 sm:$0xff] }
  0xb1   :  { %v190_v37 = vpop.f32.mrf.mxu1 }
  0xb2   :  { %v191_v39 = vadd.f32 %v190_v37, %v171_v35  ;;  %v516_v37 = vld [vmem:[%s1254_s20 + $0x8] sm:$0x3] }
  0xb3   :  { %v210_v41 = vpop.f32.mrf.mxu2 }
  0xb4   :  { %v230_v42 = vpop.f32.mrf.mxu3  ;;  %v233_v43 = vmax.f32 %v191_v39, 0.0  ;;  %v211_v44 = vadd.f32 %v210_v41, %v144_v36  ;;  %v629_v39 = vld [vmem:[%s1251_s17] ss:$0 sm:$0xff] }
  0xb6   :  { %v241_v46 = vmul.f32 %v237_v40, %v233_v43  ;;  %v231_v47 = vadd.f32 %v230_v42, %v211_v44  ;;  %v630_v42 = vld [vmem:[%s1252_s18] ss:$0 sm:$0xff] }
  0xb7   :  { %v631_v44 = vld [vmem:[%s1253_s19] ss:$0 sm:$0xff]  ;;  %s578_s19 = sshll.u32 %s1257_s23, 4  ;;  %s719_s23 = smov [#allocation2]   ;;  %s579_s19 = int_to_ptr.hbm [resolvable:$true] %s578_s19 }
  0xb8   :  { %v234_v49 = vmax.f32 %v231_v47, 0.0  ;;  %v249_v51 = vadd.f32 %v245_v45, %v241_v46  ;;  %v632_v47 = vld [vmem:[%s1255_s21] ss:$0 sm:$0xff]  ;;  %s565_s6 = sshll.u32 %s719_s23, 4  ;;  %s566_s6 = int_to_ptr.vmem [resolvable:$true] %s565_s6 }
  0xba   :  { %v242_v52 = vmul.f32 %v238_v48, %v234_v49  ;;  %301 = vmatmul.f32.vlgmr.msrb.gmra.mxu0 %v249_v51 }
  0xbc   :  { %v250_v53 = vadd.f32 %v246_v50, %v242_v52 }
  0xbe   :  { %608 = vmatmul.msk.f32.vlgmr.msrb.gmra.mxu1 %vm277_vm1, %v250_v53 }
 0x137   :  { %v302_v61 = vpop.f32.mrf.mxu0 }
 0x138   :  { %v303_v62 = vadd.f32 %v622_v60, %v302_v61 }
 0x13b   :  { %v322_v63 = vpop.f32.mrf.mxu1 }
 0x13c   :  { %v323_v0 = vadd.f32 %v322_v63, %v303_v62 }
 0x13e   :  { %v325_v2 = vmax.f32 %v323_v0, 0.0 }
 0x140   :  { %v330_v4 = vmul.f32 %v623_v1, %v325_v2 }
 0x142   :  { %v335_v5 = vadd.f32 %v624_v3, %v330_v4 }
 0x144   :  { %610 = vmatmul.msk.f32.vlgmr.msrb.gmra.mxu2 %vm352_vm2, %v335_v5 }
 0x1c7   :  { %v376_v7 = vpop.f32.mrf.mxu2 }
 0x1c8   :  { %v377_v8 = vadd.f32 %v625_v6, %v376_v7 }
 0x1ca   :  { %v380_v9 = vsel %vm379_vm3, %v377_v8, -inf }
 0x1cb   :  { %381 = vmax.xlane.f32.xlu0 %v380_v9 }
 0x23e   :  { %v382_v10 = vpop.xlane.xlu0 %381 }
 0x23f   :  { %v383_v11 = vsub.f32 %v377_v8, %v382_v10 }
 0x241   :  { %v384_v12 = vmul.f32 1.442695, %v383_v11 }
 0x243   :  { %633 = vpow2.f32 %v384_v12 }
 0x249   :  { %v634_v13 = vpop.eup %633 }
 0x24a   :  { %v386_v14 = vsel %vm379_vm3, %v634_v13, 0.0 }
 0x24b   :  { %387 = vadd.xlane.f32.xlu0 %v386_v14 }
 0x2be   :  { %v388_v19 = vpop.xlane.xlu0 %387 }
 0x2bf   :  { %635 = vrcp.f32 %v388_v19 }
 0x2c5   :  { %v636_v20 = vpop.eup %635 }
 0x2c6   :  { %v390_v21 = vmul.f32 %v636_v20, %v634_v13 }
 0x2c8   :  { %v400_v22 = vrot.slane %v390_v21, 2  ;;  %392 = vst.msk [vmem:[#allocation4] sm:$0x3] %vm391_vm4, %v390_v21 }
 0x2c9   :  { %394 = vst.msk [vmem:[#allocation6 - $0x2] sm:$0xc] %vm393_vm5, %v390_v21  ;;  %581 = dma.vmem_to_hbm [thread:$0]  %s577_s1, 32, %s579_s19, [#allocation5]  }
 0x2ca   :  { %612 = vmatmul.msk.f32.vlgmr.msrb.gmra.mxu3 %vm401_vm6, %v400_v22  ;;  %592 = dma.vmem_to_hbm [thread:$0]  %s588_s28, 32, %s590_s7, [#allocation5]  }
 0x2cb   :  { %617 = vmatpush.msk.msrb.mxu3 %vm281_vm0, %v516_v37 }
 0x2cd   :  { %542 = vmatpush.msrb.mxu3 %v515_v38 }
 0x2d2   :  { %614 = vmatmul.msk.f32.vlgmr.msra.gmra.mxu3 %vm401_vm6, %v390_v21 }
 0x34d   :  { %v424_v27 = vpop.f32.mrf.mxu3 }
 0x355   :  { %v449_v29 = vpop.f32.mrf.mxu3 }
 0x356   :  { %v450_v30 = vadd.f32 %v449_v29, %v424_v27 }
 0x358   :  { %v456_v31 = vadd.f32 %v626_v28, %v450_v30 }
 0x35a   :  { %v457_v33 = vmax.f32 %v456_v31, 0.0 }
 0x35c   :  { %v462_v35 = vmul.f32 %v627_v32, %v457_v33 }
 0x35e   :  { %v467_v36 = vadd.f32 %v628_v34, %v462_v35 }
 0x360   :  { %616 = vmatmul.msk.f32.vlgmr.msra.gmra.mxu1 %vm476_vm8, %v467_v36 }
 0x3dd   :  { %v501_v40 = vpop.f32.mrf.mxu1 }
 0x3de   :  { %v502_v41 = vadd.f32 %v629_v39, %v501_v40 }
 0x3e0   :  { %v504_v43 = vmax.f32 %v502_v41, 0.0 }
 0x3e2   :  { %v509_v45 = vmul.f32 %v630_v42, %v504_v43 }
 0x3e4   :  { %v514_v46 = vadd.f32 %v631_v44, %v509_v45 }
 0x3e6   :  { %618 = vmatmul.msk.f32.vlgmr.msrb.gmra.mxu3 %vm401_vm6, %v514_v46 }
 0x469   :  { %v544_v48 = vpop.f32.mrf.mxu3 }
 0x46a   :  { %v545_v49 = vadd.f32 %v632_v47, %v544_v48 }
 0x46c   :  { %v548_v50 = vsel %vm547_vm9, %v545_v49, -inf }
 0x46d   :  { %549 = vmax.xlane.f32.xlu1 %v548_v50 }
 0x4e0   :  { %v550_v51 = vpop.xlane.xlu1 %549 }
 0x4e1   :  { %v551_v52 = vsub.f32 %v545_v49, %v550_v51 }
 0x4e3   :  { %v552_v53 = vmul.f32 1.442695, %v551_v52 }
 0x4e5   :  { %637 = vpow2.f32 %v552_v53 }
 0x4eb   :  { %v638_v54 = vpop.eup %637 }
 0x4ec   :  { %v554_v55 = vsel %vm547_vm9, %v638_v54, 0.0 }
 0x4ed   :  { %555 = vadd.xlane.f32.xlu1 %v554_v55 }
 0x560   :  { %v556_v56 = vpop.xlane.xlu1 %555 }
 0x561   :  { %639 = vrcp.f32 %v556_v56 }
 0x567   :  { %v640_v57 = vpop.eup %639 }
 0x568   :  { %v558_v58 = vmul.f32 %v640_v57, %v638_v54 }
 0x56a   :  { %559 = vst.msk [vmem:[#allocation2] sm:$0x3] %vm547_vm9, %v558_v58 }
 0x56b   :  { %570 = dma.vmem_to_hbm [thread:$0]  %s566_s6, 32, %s568_s29, [#allocation3]  }
 0x56c   :  { %713 = dma.done.wait [#allocation3], 32  }
 0x56d   :  { %714 = vsyncadd [#allocation3], 4294967264 }
 0x56e   :  { %715 = dma.done.wait [#allocation5], 64  }
 0x56f   :  { %716 = vsyncadd [#allocation5], 4294967232 }
 0x570   :  { %605 = vsyncpa [#allocation3], 1 }
 0x571   :  { %606 = vsyncpa [#allocation5], 1 }

</bundles_post_ra>
